<compile_context>
chip_gen: v7x
topology: tpu7x:2x2x1
jax: 0.10.0
libtpu: 0.0.40
codegen_flags: <defaults>
</compile_context>

<pallas_src>
import math

import jax
import jax.numpy as jnp
from jax.experimental import pallas as pl
from jax.experimental.pallas import tpu as pltpu

# ---- synthetic "CLIP text model" config (small, but structurally faithful) ----
VOCAB = 1000
SEQ = 8                      # stands in for max_length = 77
HIDDEN = 128                 # stands in for 768 (lane-dense: multiple of 128)
HEADS = 4                    # stands in for 12
HEAD_DIM = HIDDEN // HEADS
MLP = 4 * HIDDEN             # CLIP MLP ratio = 4
LAYERS = 2                   # stands in for 12
LN_EPS = 1e-5

BATCH = 8
# v7x: ROW_TILES = 2 (one row tile per TensorCore).  v5e/v6e: ROW_TILES = 1 so the
# per-layer weight stack is streamed from HBM exactly once; grow BATCH_PER_TILE
# (-> ROWS, the MXU M dim) instead of adding row tiles.
ROW_TILES = 2
BATCH_PER_TILE = BATCH // ROW_TILES
ROWS = BATCH_PER_TILE * SEQ              # rows per tile (multiple of 8 sublanes)

# bf16 on v6e/v7x (bf16 VPU/EUP); use jnp.float32 on v5e (no bf16 vector units).
MLP_ELEMENTWISE_DTYPE = jnp.bfloat16
# exact softmax reciprocal toggle for parity tests vs the PyTorch reference
APPROX_RECIPROCAL = True


def _layernorm(x, gamma, beta):
    # x: (R, D) f32, gamma/beta: (D,) f32
    mu = jnp.mean(x, axis=-1, keepdims=True)
    var = jnp.mean(jnp.square(x - mu), axis=-1, keepdims=True)
    inv = jax.lax.rsqrt(var + LN_EPS)
    return (x - mu) * inv * gamma[None, :] + beta[None, :]


def _softmax_normalize(p_sum):
    if APPROX_RECIPROCAL:
        return pl.reciprocal(p_sum, approx=True)
    return 1.0 / p_sum


def clip_stack_kernel(x_ref, mask_ref, lnf_g_ref, lnf_b_ref,
                      ln1_g_ref, ln1_b_ref, wqkv_ref, bqkv_ref, wo_ref, bo_ref,
                      ln2_g_ref, ln2_b_ref, w1_ref, b1_ref, w2_ref, b2_ref,
                      o_ref):
    """Grid = (row_tile, layer).  o_ref is the resident residual stream."""
    layer = pl.program_id(1)
    n_layers = pl.num_programs(1)

    # layer 0: seed the resident residual stream with the embedded-token slab
    @pl.when(layer == 0)
    def _():
        o_ref[...] = x_ref[...]

    x = o_ref[...]                                  # (ROWS, D) f32 residual stream

    # ---- self-attention block (pre-LN, causal) ------------------------------
    h = _layernorm(x, ln1_g_ref[0], ln1_b_ref[0])
    qkv = jnp.dot(h.astype(jnp.bfloat16), wqkv_ref[...],
                  preferred_element_type=jnp.float32) + bqkv_ref[0]   # (ROWS, 3D)

    scale = 1.0 / math.sqrt(HEAD_DIM)
    q2d = qkv[:, 0 * HIDDEN:1 * HIDDEN] * scale     # fold scale into q (ROWS*D elems)
    k2d = qkv[:, 1 * HIDDEN:2 * HIDDEN]
    v2d = qkv[:, 2 * HIDDEN:3 * HIDDEN]

    mask = mask_ref[...][None, :, :]                # (1, S, S) additive causal mask

    head_outs = []
    for hh in range(HEADS):                         # static unroll (toy HEADS=4)
        lo = hh * HEAD_DIM
        hi = lo + HEAD_DIM
        qh = q2d[:, lo:hi].reshape(BATCH_PER_TILE, SEQ, HEAD_DIM).astype(jnp.bfloat16)
        kh = k2d[:, lo:hi].reshape(BATCH_PER_TILE, SEQ, HEAD_DIM).astype(jnp.bfloat16)
        vh = v2d[:, lo:hi].reshape(BATCH_PER_TILE, SEQ, HEAD_DIM).astype(jnp.bfloat16)
        s = jnp.einsum('bqd,bkd->bqk', qh, kh,
                       preferred_element_type=jnp.float32)            # (B, S, S) f32
        s = s + mask
        s = s - jnp.max(s, axis=-1, keepdims=True)
        p = jnp.exp(s)
        p = p * _softmax_normalize(jnp.sum(p, axis=-1, keepdims=True))
        oh = jnp.einsum('bqk,bkd->bqd', p.astype(jnp.bfloat16), vh,
                        preferred_element_type=jnp.float32)           # (B, S, Dh) f32
        head_outs.append(oh.reshape(ROWS, HEAD_DIM))

    # reassemble heads, then ONE full K=HIDDEN output projection
    attn = jnp.concatenate(head_outs, axis=-1)                        # (ROWS, D)
    proj = jnp.dot(attn.astype(jnp.bfloat16), wo_ref[...],
                   preferred_element_type=jnp.float32)
    x = x + proj + bo_ref[0]

    # ---- MLP block (quickGELU, as in openai/clip-vit-large-patch14) ---------
    h2 = _layernorm(x, ln2_g_ref[0], ln2_b_ref[0])
    m = jnp.dot(h2.astype(jnp.bfloat16), w1_ref[...],
                preferred_element_type=jnp.float32) + b1_ref[0]       # (ROWS, MLP)
    m = m.astype(MLP_ELEMENTWISE_DTYPE)
    m = m * jax.nn.sigmoid(1.702 * m)               # quick_gelu (bf16 on v6e/v7x)
    m = jnp.dot(m.astype(jnp.bfloat16), w2_ref[...],
                preferred_element_type=jnp.float32) + b2_ref[0]
    x = x + m

    # intermediate layers: store the residual; last layer: single final-LN store
    @pl.when(layer != n_layers - 1)
    def _():
        o_ref[...] = x

    @pl.when(layer == n_layers - 1)
    def _():
        o_ref[...] = _layernorm(x, lnf_g_ref[0], lnf_b_ref[0])


def _cost_estimate():
    rows_total = BATCH * SEQ
    flops_per_layer = (
        2 * rows_total * HIDDEN * (3 * HIDDEN)        # fused qkv projection
        + 2 * rows_total * HIDDEN * HIDDEN            # output projection (K=HIDDEN)
        + 4 * BATCH * HEADS * SEQ * SEQ * HEAD_DIM    # scores + weighted sum
        + 4 * rows_total * HIDDEN * MLP               # MLP up + down
    )
    transc_per_layer = BATCH * HEADS * SEQ * SEQ + rows_total * MLP + 2 * rows_total
    w_bytes_per_layer = (
        2 * (HIDDEN * 3 * HIDDEN + HIDDEN * HIDDEN + 2 * HIDDEN * MLP)  # bf16 weights
        + 4 * (3 * HIDDEN + HIDDEN + MLP + HIDDEN + 4 * HIDDEN)          # f32 bias/LN
    )
    act_bytes = 2 * rows_total * HIDDEN * 4
    return pl.CostEstimate(
        flops=LAYERS * flops_per_layer,
        transcendentals=LAYERS * transc_per_layer,
        bytes_accessed=LAYERS * w_bytes_per_layer * ROW_TILES + act_bytes,
    )


def clip_transformer_pallas(x2d, mask, stacked, lnf_g, lnf_b):
    """x2d: (B*S, D) f32 slab -> (B*S, D) f32 last_hidden_state slab."""
    weight_order = ["ln1_g", "ln1_b", "wqkv", "bqkv", "wo", "bo",
                    "ln2_g", "ln2_b", "w1", "b1", "w2", "b2"]
    weights = [stacked[k] for k in weight_order]

    act_spec = pl.BlockSpec((ROWS, HIDDEN), lambda bt, l: (bt, 0))
    const_specs = [
        pl.BlockSpec((SEQ, SEQ), lambda bt, l: (0, 0)),       # additive causal mask
        pl.BlockSpec((1, HIDDEN), lambda bt, l: (0, 0)),      # final LN gamma
        pl.BlockSpec((1, HIDDEN), lambda bt, l: (0, 0)),      # final LN beta
    ]
    layer_specs = [
        pl.BlockSpec((None,) + w.shape[1:], lambda bt, l: (l, 0, 0))
        for w in weights
    ]

    return pl.pallas_call(
        clip_stack_kernel,
        out_shape=jax.ShapeDtypeStruct(x2d.shape, jnp.float32),
        grid_spec=pltpu.PrefetchScalarGridSpec(
            num_scalar_prefetch=0,
            grid=(ROW_TILES, LAYERS),            # layer (reduction-like) axis last
            in_specs=[act_spec] + const_specs + layer_specs,
            out_specs=act_spec,
        ),
        compiler_params=pltpu.CompilerParams(
            dimension_semantics=("parallel", "arbitrary"),
            # explicit VMEM budget (default scoped limit is 32 MiB); ~48-56 MB is
            # the sweet spot for v7x (64 MiB physical), plenty for v5e/v6e.
            vmem_limit_bytes=56 * 1024 * 1024,
        ),
        cost_estimate=_cost_estimate(),
        # the embedded-token slab is consumed only at layer 0 and the output is
        # written back only after the last layer of each row tile -> alias them.
        input_output_aliases={0: 0},
    )(x2d, mask, lnf_g, lnf_b, *weights)


def init_params(key):
    def nrm(k, shape, scale=0.02):
        return jax.random.normal(k, shape, dtype=jnp.float32) * scale

    keys = jax.random.split(key, 2 + 4 * LAYERS)
    params = {
        "tok_emb": nrm(keys[0], (VOCAB, HIDDEN)),
        "pos_emb": nrm(keys[1], (SEQ, HIDDEN)),
        "ln_f_g": jnp.ones((1, HIDDEN), jnp.float32),
        "ln_f_b": jnp.zeros((1, HIDDEN), jnp.float32),
    }
    wqkv, wo, w1, w2 = [], [], [], []
    for li in range(LAYERS):
        k0, k1, k2, k3 = keys[2 + 4 * li: 2 + 4 * (li + 1)]
        wqkv.append(nrm(k0, (HIDDEN, 3 * HIDDEN)))
        wo.append(nrm(k1, (HIDDEN, HIDDEN)))
        w1.append(nrm(k2, (HIDDEN, MLP)))
        w2.append(nrm(k3, (MLP, HIDDEN)))
    # per-layer tensors stacked on a leading LAYERS axis; matmul weights in bf16
    params["layers"] = {
        "ln1_g": jnp.ones((LAYERS, 1, HIDDEN), jnp.float32),
        "ln1_b": jnp.zeros((LAYERS, 1, HIDDEN), jnp.float32),
        "wqkv": jnp.stack(wqkv).astype(jnp.bfloat16),
        "bqkv": jnp.zeros((LAYERS, 1, 3 * HIDDEN), jnp.float32),
        "wo": jnp.stack(wo).astype(jnp.bfloat16),
        "bo": jnp.zeros((LAYERS, 1, HIDDEN), jnp.float32),
        "ln2_g": jnp.ones((LAYERS, 1, HIDDEN), jnp.float32),
        "ln2_b": jnp.zeros((LAYERS, 1, HIDDEN), jnp.float32),
        "w1": jnp.stack(w1).astype(jnp.bfloat16),
        "b1": jnp.zeros((LAYERS, 1, MLP), jnp.float32),
        "w2": jnp.stack(w2).astype(jnp.bfloat16),
        "b2": jnp.zeros((LAYERS, 1, HIDDEN), jnp.float32),
    }
    return params


@jax.jit
def clip_text_forward(tokens, params):
    """Equivalent of FrozenAlignedCLIPTextEmbedder.forward on pre-tokenized ids.

    tokens: int32 [B, SEQ]  ->  last_hidden_state: float32 [B, SEQ, HIDDEN]
    """
    B = tokens.shape[0]
    # glue: embedding gather + position add, then fuse (B, S) into MXU rows
    x = jnp.take(params["tok_emb"], tokens, axis=0) + params["pos_emb"][None, :, :]
    x = x.astype(jnp.float32).reshape(B * SEQ, HIDDEN)

    # causal additive mask precomputed once (hoisted out of the kernel body);
    # kept in f32 so -1e30 is safe (would be -inf in bf16 -> NaN in softmax).
    row = jnp.arange(SEQ)
    mask = jnp.where(row[None, :] <= row[:, None], 0.0, -1e30).astype(jnp.float32)

    z = clip_transformer_pallas(x, mask, params["layers"],
                                params["ln_f_g"], params["ln_f_b"])
    return z.reshape(B, SEQ, HIDDEN)


if __name__ == "__main__":
    key = jax.random.PRNGKey(0)
    pkey, tkey = jax.random.split(key)
    params = init_params(pkey)

    tokens = jax.random.randint(tkey, (BATCH, SEQ), 0, VOCAB, dtype=jnp.int32)

    z = clip_text_forward(tokens, params)
    jax.block_until_ready(z)

    assert z.shape == (BATCH, SEQ, HIDDEN), z.shape
    assert z.dtype == jnp.float32
    assert bool(jnp.all(jnp.isfinite(z)))
    print("KERNEL_OK")
</pallas_src>

<mosaic_0001>
module attributes {stable_mosaic.version = 11 : i64} {
  func.func @clip_stack_kernel(%arg0: i32, %arg1: i32, %arg2: memref<32x128xf32, #tpu.memory_space<vmem>>, %arg3: memref<8x8xf32, #tpu.memory_space<vmem>>, %arg4: memref<1x128xf32, #tpu.memory_space<vmem>>, %arg5: memref<1x128xf32, #tpu.memory_space<vmem>>, %arg6: memref<1x1x128xf32, #tpu.memory_space<vmem>>, %arg7: memref<1x1x128xf32, #tpu.memory_space<vmem>>, %arg8: memref<1x128x384xbf16, #tpu.memory_space<vmem>>, %arg9: memref<1x1x384xf32, #tpu.memory_space<vmem>>, %arg10: memref<1x128x128xbf16, #tpu.memory_space<vmem>>, %arg11: memref<1x1x128xf32, #tpu.memory_space<vmem>>, %arg12: memref<1x1x128xf32, #tpu.memory_space<vmem>>, %arg13: memref<1x1x128xf32, #tpu.memory_space<vmem>>, %arg14: memref<1x128x512xbf16, #tpu.memory_space<vmem>>, %arg15: memref<1x1x512xf32, #tpu.memory_space<vmem>>, %arg16: memref<1x512x128xbf16, #tpu.memory_space<vmem>>, %arg17: memref<1x1x128xf32, #tpu.memory_space<vmem>>, %arg18: memref<32x128xf32, #tpu.memory_space<vmem>>) attributes {dimension_semantics = [#tpu.dimension_semantics<parallel>, #tpu.dimension_semantics<arbitrary>], iteration_bounds = array<i64: 2, 2>, scalar_prefetch = 0 : i64, scratch_operands = 0 : i64, tpu.core_type = #tpu.core_type<tc>, window_params = [{transform_indices = @transform_0, window_bounds = array<i64: 32, 128>}, {pipeline_mode = #tpu.pipeline_mode<synchronous>, transform_indices = @transform_1, window_bounds = array<i64: 8, 8>}, {pipeline_mode = #tpu.pipeline_mode<synchronous>, transform_indices = @transform_2, window_bounds = array<i64: 1, 128>}, {pipeline_mode = #tpu.pipeline_mode<synchronous>, transform_indices = @transform_3, window_bounds = array<i64: 1, 128>}, {transform_indices = @transform_4, window_bounds = array<i64: 1, 1, 128>}, {transform_indices = @transform_5, window_bounds = array<i64: 1, 1, 128>}, {transform_indices = @transform_6, window_bounds = array<i64: 1, 128, 384>}, {transform_indices = @transform_7, window_bounds = array<i64: 1, 1, 384>}, {transform_indices = @transform_8, window_bounds = array<i64: 1, 128, 128>}, {transform_indices = @transform_9, window_bounds = array<i64: 1, 1, 128>}, {transform_indices = @transform_10, window_bounds = array<i64: 1, 1, 128>}, {transform_indices = @transform_11, window_bounds = array<i64: 1, 1, 128>}, {transform_indices = @transform_12, window_bounds = array<i64: 1, 128, 512>}, {transform_indices = @transform_13, window_bounds = array<i64: 1, 1, 512>}, {transform_indices = @transform_14, window_bounds = array<i64: 1, 512, 128>}, {transform_indices = @transform_15, window_bounds = array<i64: 1, 1, 128>}, {transform_indices = @transform_16, window_bounds = array<i64: 32, 128>}]} {
    %c0_i32 = arith.constant 0 : i32
    %0 = arith.cmpi eq, %arg1, %c0_i32 : i32
    %1 = arith.extui %0 : i1 to i32
    %c0_i32_0 = arith.constant 0 : i32
    %2 = arith.cmpi ne, %1, %c0_i32_0 : i32
    scf.if %2 {
      %c0_75 = arith.constant 0 : index
      %c0_76 = arith.constant 0 : index
      %220 = vector.load %arg2[%c0_75, %c0_76] : memref<32x128xf32, #tpu.memory_space<vmem>>, vector<32x128xf32>
      %c0_77 = arith.constant 0 : index
      %c0_78 = arith.constant 0 : index
      %221 = vector.load %arg18[%c0_77, %c0_78] : memref<32x128xf32, #tpu.memory_space<vmem>>, vector<32x128xf32>
      tpu.vector_store %arg18[%c0_77, %c0_78], %220 {strides = array<i32>} : memref<32x128xf32, #tpu.memory_space<vmem>>, vector<32x128xf32>,
    } else {
    }
    %c0 = arith.constant 0 : index
    %c0_1 = arith.constant 0 : index
    %3 = vector.load %arg18[%c0, %c0_1] : memref<32x128xf32, #tpu.memory_space<vmem>>, vector<32x128xf32>
    %c0_2 = arith.constant 0 : index
    %c0_3 = arith.constant 0 : index
    %c0_4 = arith.constant 0 : index
    %4 = vector.load %arg6[%c0_2, %c0_3, %c0_4] : memref<1x1x128xf32, #tpu.memory_space<vmem>>, vector<1x1x128xf32>
    %5 = vector.shape_cast %4 : vector<1x1x128xf32> to vector<128xf32>
    %c0_5 = arith.constant 0 : index
    %c0_6 = arith.constant 0 : index
    %c0_7 = arith.constant 0 : index
    %6 = vector.load %arg7[%c0_5, %c0_6, %c0_7] : memref<1x1x128xf32, #tpu.memory_space<vmem>>, vector<1x1x128xf32>
    %7 = vector.shape_cast %6 : vector<1x1x128xf32> to vector<128xf32>
    %cst = arith.constant dense<0.000000e+00> : vector<32xf32>
    %8 = vector.multi_reduction <add>, %3, %cst [1] : vector<32x128xf32> to vector<32xf32>
    %9 = vector.shape_cast %8 : vector<32xf32> to vector<32x1xf32>
    %cst_8 = arith.constant 1.280000e+02 : f32
    %10 = vector.broadcast %cst_8 : f32 to vector<32x1xf32>
    %11 = arith.divf %9, %10 : vector<32x1xf32>
    %12 = vector.broadcast %11 : vector<32x1xf32> to vector<32x128xf32>
    %13 = arith.subf %3, %12 : vector<32x128xf32>
    %14 = arith.mulf %13, %13 : vector<32x128xf32>
    %cst_9 = arith.constant dense<0.000000e+00> : vector<32xf32>
    %15 = vector.multi_reduction <add>, %14, %cst_9 [1] : vector<32x128xf32> to vector<32xf32>
    %16 = vector.shape_cast %15 : vector<32xf32> to vector<32x1xf32>
    %cst_10 = arith.constant 1.280000e+02 : f32
    %17 = vector.broadcast %cst_10 : f32 to vector<32x1xf32>
    %18 = arith.divf %16, %17 : vector<32x1xf32>
    %cst_11 = arith.constant 9.99999974E-6 : f32
    %19 = vector.broadcast %cst_11 : f32 to vector<32x1xf32>
    %20 = arith.addf %18, %19 : vector<32x1xf32>
    %21 = math.rsqrt %20 : vector<32x1xf32>
    %22 = vector.broadcast %11 : vector<32x1xf32> to vector<32x128xf32>
    %23 = arith.subf %3, %22 : vector<32x128xf32>
    %24 = vector.broadcast %21 : vector<32x1xf32> to vector<32x128xf32>
    %25 = arith.mulf %23, %24 : vector<32x128xf32>
    %26 = vector.shape_cast %5 : vector<128xf32> to vector<1x128xf32>
    %27 = vector.broadcast %26 : vector<1x128xf32> to vector<32x128xf32>
    %28 = arith.mulf %25, %27 : vector<32x128xf32>
    %29 = vector.shape_cast %7 : vector<128xf32> to vector<1x128xf32>
    %30 = vector.broadcast %29 : vector<1x128xf32> to vector<32x128xf32>
    %31 = arith.addf %28, %30 : vector<32x128xf32>
    %32 = arith.truncf %31 : vector<32x128xf32> to vector<32x128xbf16>
    %c0_12 = arith.constant 0 : index
    %c0_13 = arith.constant 0 : index
    %c0_14 = arith.constant 0 : index
    %33 = vector.load %arg8[%c0_12, %c0_13, %c0_14] : memref<1x128x384xbf16, #tpu.memory_space<vmem>>, vector<1x128x384xbf16>
    %34 = vector.shape_cast %33 : vector<1x128x384xbf16> to vector<128x384xbf16>
    %cst_15 = arith.constant dense<0.000000e+00> : vector<32x384xf32>
    %35 = tpu.matmul %32, %34, %cst_15 {dimension_numbers = #tpu.dot_dimension_numbers<[1], [0], [0], [1], [0, 0, 1, 1], [], []>} : vector<32x128xbf16>, vector<128x384xbf16>, vector<32x384xf32> -> vector<32x384xf32>
    %c0_16 = arith.constant 0 : index
    %c0_17 = arith.constant 0 : index
    %c0_18 = arith.constant 0 : index
    %36 = vector.load %arg9[%c0_16, %c0_17, %c0_18] : memref<1x1x384xf32, #tpu.memory_space<vmem>>, vector<1x1x384xf32>
    %37 = vector.shape_cast %36 : vector<1x1x384xf32> to vector<384xf32>
    %38 = vector.shape_cast %37 : vector<384xf32> to vector<1x384xf32>
    %39 = vector.broadcast %38 : vector<1x384xf32> to vector<32x384xf32>
    %40 = arith.addf %35, %39 : vector<32x384xf32>
    %41 = vector.extract_strided_slice %40 {offsets = [0, 0], sizes = [32, 128], strides = [1, 1]} : vector<32x384xf32> to vector<32x128xf32>
    %cst_19 = arith.constant 0.176776692 : f32
    %42 = vector.broadcast %cst_19 : f32 to vector<32x128xf32>
    %43 = arith.mulf %41, %42 : vector<32x128xf32>
    %44 = vector.extract_strided_slice %40 {offsets = [0, 128], sizes = [32, 128], strides = [1, 1]} : vector<32x384xf32> to vector<32x128xf32>
    %45 = vector.extract_strided_slice %40 {offsets = [0, 256], sizes = [32, 128], strides = [1, 1]} : vector<32x384xf32> to vector<32x128xf32>
    %c0_20 = arith.constant 0 : index
    %c0_21 = arith.constant 0 : index
    %46 = vector.load %arg3[%c0_20, %c0_21] : memref<8x8xf32, #tpu.memory_space<vmem>>, vector<8x8xf32>
    %47 = vector.shape_cast %46 : vector<8x8xf32> to vector<1x8x8xf32>
    %48 = vector.extract_strided_slice %43 {offsets = [0, 0], sizes = [32, 32], strides = [1, 1]} : vector<32x128xf32> to vector<32x32xf32>
    %49 = vector.shape_cast %48 : vector<32x32xf32> to vector<4x8x32xf32>
    %50 = arith.truncf %49 : vector<4x8x32xf32> to vector<4x8x32xbf16>
    %51 = vector.extract_strided_slice %44 {offsets = [0, 0], sizes = [32, 32], strides = [1, 1]} : vector<32x128xf32> to vector<32x32xf32>
    %52 = vector.shape_cast %51 : vector<32x32xf32> to vector<4x8x32xf32>
    %53 = arith.truncf %52 : vector<4x8x32xf32> to vector<4x8x32xbf16>
    %54 = vector.extract_strided_slice %45 {offsets = [0, 0], sizes = [32, 32], strides = [1, 1]} : vector<32x128xf32> to vector<32x32xf32>
    %55 = vector.shape_cast %54 : vector<32x32xf32> to vector<4x8x32xf32>
    %56 = arith.truncf %55 : vector<4x8x32xf32> to vector<4x8x32xbf16>
    "tpu.trace_start"() <{level = 10 : i32, message = "bqd,bkd->bqk"}> : () -> ()
    %cst_22 = arith.constant dense<0.000000e+00> : vector<4x8x8xf32>
    %57 = tpu.matmul %50, %53, %cst_22 {dimension_numbers = #tpu.dot_dimension_numbers<[2], [2], [1], [1], [0, 0, 0, 1, 1, 1], [0], [0]>} : vector<4x8x32xbf16>, vector<4x8x32xbf16>, vector<4x8x8xf32> -> vector<4x8x8xf32>
    "tpu.trace_stop"() : () -> ()
    %58 = vector.broadcast %47 : vector<1x8x8xf32> to vector<4x8x8xf32>
    %59 = arith.addf %57, %58 : vector<4x8x8xf32>
    %cst_23 = arith.constant dense<0xFF800000> : vector<4x8xf32>
    %60 = vector.multi_reduction <maximumf>, %59, %cst_23 [2] : vector<4x8x8xf32> to vector<4x8xf32>
    %61 = vector.shape_cast %60 : vector<4x8xf32> to vector<4x8x1xf32>
    %62 = vector.broadcast %61 : vector<4x8x1xf32> to vector<4x8x8xf32>
    %63 = arith.subf %59, %62 : vector<4x8x8xf32>
    %64 = math.exp %63 : vector<4x8x8xf32>
    %cst_24 = arith.constant dense<0.000000e+00> : vector<4x8xf32>
    %65 = vector.multi_reduction <add>, %64, %cst_24 [2] : vector<4x8x8xf32> to vector<4x8xf32>
    %66 = vector.shape_cast %65 : vector<4x8xf32> to vector<4x8x1xf32>
    %67 = tpu.reciprocal %66 {approx = true} : vector<4x8x1xf32> -> vector<4x8x1xf32>
    %68 = vector.broadcast %67 : vector<4x8x1xf32> to vector<4x8x8xf32>
    %69 = arith.mulf %64, %68 : vector<4x8x8xf32>
    %70 = arith.truncf %69 : vector<4x8x8xf32> to vector<4x8x8xbf16>
    "tpu.trace_start"() <{level = 10 : i32, message = "bqk,bkd->bqd"}> : () -> ()
    %cst_25 = arith.constant dense<0.000000e+00> : vector<4x8x32xf32>
    %71 = tpu.matmul %70, %56, %cst_25 {dimension_numbers = #tpu.dot_dimension_numbers<[2], [1], [1], [2], [0, 0, 0, 1, 1, 2], [0], [0]>} : vector<4x8x8xbf16>, vector<4x8x32xbf16>, vector<4x8x32xf32> -> vector<4x8x32xf32>
    "tpu.trace_stop"() : () -> ()
    %72 = vector.shape_cast %71 : vector<4x8x32xf32> to vector<32x32xf32>
    %73 = vector.extract_strided_slice %43 {offsets = [0, 32], sizes = [32, 32], strides = [1, 1]} : vector<32x128xf32> to vector<32x32xf32>
    %74 = vector.shape_cast %73 : vector<32x32xf32> to vector<4x8x32xf32>
    %75 = arith.truncf %74 : vector<4x8x32xf32> to vector<4x8x32xbf16>
    %76 = vector.extract_strided_slice %44 {offsets = [0, 32], sizes = [32, 32], strides = [1, 1]} : vector<32x128xf32> to vector<32x32xf32>
    %77 = vector.shape_cast %76 : vector<32x32xf32> to vector<4x8x32xf32>
    %78 = arith.truncf %77 : vector<4x8x32xf32> to vector<4x8x32xbf16>
    %79 = vector.extract_strided_slice %45 {offsets = [0, 32], sizes = [32, 32], strides = [1, 1]} : vector<32x128xf32> to vector<32x32xf32>
    %80 = vector.shape_cast %79 : vector<32x32xf32> to vector<4x8x32xf32>
    %81 = arith.truncf %80 : vector<4x8x32xf32> to vector<4x8x32xbf16>
    "tpu.trace_start"() <{level = 10 : i32, message = "bqd,bkd->bqk"}> : () -> ()
    %cst_26 = arith.constant dense<0.000000e+00> : vector<4x8x8xf32>
    %82 = tpu.matmul %75, %78, %cst_26 {dimension_numbers = #tpu.dot_dimension_numbers<[2], [2], [1], [1], [0, 0, 0, 1, 1, 1], [0], [0]>} : vector<4x8x32xbf16>, vector<4x8x32xbf16>, vector<4x8x8xf32> -> vector<4x8x8xf32>
    "tpu.trace_stop"() : () -> ()
    %83 = vector.broadcast %47 : vector<1x8x8xf32> to vector<4x8x8xf32>
    %84 = arith.addf %82, %83 : vector<4x8x8xf32>
    %cst_27 = arith.constant dense<0xFF800000> : vector<4x8xf32>
    %85 = vector.multi_reduction <maximumf>, %84, %cst_27 [2] : vector<4x8x8xf32> to vector<4x8xf32>
    %86 = vector.shape_cast %85 : vector<4x8xf32> to vector<4x8x1xf32>
    %87 = vector.broadcast %86 : vector<4x8x1xf32> to vector<4x8x8xf32>
    %88 = arith.subf %84, %87 : vector<4x8x8xf32>
    %89 = math.exp %88 : vector<4x8x8xf32>
    %cst_28 = arith.constant dense<0.000000e+00> : vector<4x8xf32>
    %90 = vector.multi_reduction <add>, %89, %cst_28 [2] : vector<4x8x8xf32> to vector<4x8xf32>
    %91 = vector.shape_cast %90 : vector<4x8xf32> to vector<4x8x1xf32>
    %92 = tpu.reciprocal %91 {approx = true} : vector<4x8x1xf32> -> vector<4x8x1xf32>
    %93 = vector.broadcast %92 : vector<4x8x1xf32> to vector<4x8x8xf32>
    %94 = arith.mulf %89, %93 : vector<4x8x8xf32>
    %95 = arith.truncf %94 : vector<4x8x8xf32> to vector<4x8x8xbf16>
    "tpu.trace_start"() <{level = 10 : i32, message = "bqk,bkd->bqd"}> : () -> ()
    %cst_29 = arith.constant dense<0.000000e+00> : vector<4x8x32xf32>
    %96 = tpu.matmul %95, %81, %cst_29 {dimension_numbers = #tpu.dot_dimension_numbers<[2], [1], [1], [2], [0, 0, 0, 1, 1, 2], [0], [0]>} : vector<4x8x8xbf16>, vector<4x8x32xbf16>, vector<4x8x32xf32> -> vector<4x8x32xf32>
    "tpu.trace_stop"() : () -> ()
    %97 = vector.shape_cast %96 : vector<4x8x32xf32> to vector<32x32xf32>
    %98 = vector.extract_strided_slice %43 {offsets = [0, 64], sizes = [32, 32], strides = [1, 1]} : vector<32x128xf32> to vector<32x32xf32>
    %99 = vector.shape_cast %98 : vector<32x32xf32> to vector<4x8x32xf32>
    %100 = arith.truncf %99 : vector<4x8x32xf32> to vector<4x8x32xbf16>
    %101 = vector.extract_strided_slice %44 {offsets = [0, 64], sizes = [32, 32], strides = [1, 1]} : vector<32x128xf32> to vector<32x32xf32>
    %102 = vector.shape_cast %101 : vector<32x32xf32> to vector<4x8x32xf32>
    %103 = arith.truncf %102 : vector<4x8x32xf32> to vector<4x8x32xbf16>
    %104 = vector.extract_strided_slice %45 {offsets = [0, 64], sizes = [32, 32], strides = [1, 1]} : vector<32x128xf32> to vector<32x32xf32>
    %105 = vector.shape_cast %104 : vector<32x32xf32> to vector<4x8x32xf32>
    %106 = arith.truncf %105 : vector<4x8x32xf32> to vector<4x8x32xbf16>
    "tpu.trace_start"() <{level = 10 : i32, message = "bqd,bkd->bqk"}> : () -> ()
    %cst_30 = arith.constant dense<0.000000e+00> : vector<4x8x8xf32>
    %107 = tpu.matmul %100, %103, %cst_30 {dimension_numbers = #tpu.dot_dimension_numbers<[2], [2], [1], [1], [0, 0, 0, 1, 1, 1], [0], [0]>} : vector<4x8x32xbf16>, vector<4x8x32xbf16>, vector<4x8x8xf32> -> vector<4x8x8xf32>
    "tpu.trace_stop"() : () -> ()
    %108 = vector.broadcast %47 : vector<1x8x8xf32> to vector<4x8x8xf32>
    %109 = arith.addf %107, %108 : vector<4x8x8xf32>
    %cst_31 = arith.constant dense<0xFF800000> : vector<4x8xf32>
    %110 = vector.multi_reduction <maximumf>, %109, %cst_31 [2] : vector<4x8x8xf32> to vector<4x8xf32>
    %111 = vector.shape_cast %110 : vector<4x8xf32> to vector<4x8x1xf32>
    %112 = vector.broadcast %111 : vector<4x8x1xf32> to vector<4x8x8xf32>
    %113 = arith.subf %109, %112 : vector<4x8x8xf32>
    %114 = math.exp %113 : vector<4x8x8xf32>
    %cst_32 = arith.constant dense<0.000000e+00> : vector<4x8xf32>
    %115 = vector.multi_reduction <add>, %114, %cst_32 [2] : vector<4x8x8xf32> to vector<4x8xf32>
    %116 = vector.shape_cast %115 : vector<4x8xf32> to vector<4x8x1xf32>
    %117 = tpu.reciprocal %116 {approx = true} : vector<4x8x1xf32> -> vector<4x8x1xf32>
    %118 = vector.broadcast %117 : vector<4x8x1xf32> to vector<4x8x8xf32>
    %119 = arith.mulf %114, %118 : vector<4x8x8xf32>
    %120 = arith.truncf %119 : vector<4x8x8xf32> to vector<4x8x8xbf16>
    "tpu.trace_start"() <{level = 10 : i32, message = "bqk,bkd->bqd"}> : () -> ()
    %cst_33 = arith.constant dense<0.000000e+00> : vector<4x8x32xf32>
    %121 = tpu.matmul %120, %106, %cst_33 {dimension_numbers = #tpu.dot_dimension_numbers<[2], [1], [1], [2], [0, 0, 0, 1, 1, 2], [0], [0]>} : vector<4x8x8xbf16>, vector<4x8x32xbf16>, vector<4x8x32xf32> -> vector<4x8x32xf32>
    "tpu.trace_stop"() : () -> ()
    %122 = vector.shape_cast %121 : vector<4x8x32xf32> to vector<32x32xf32>
    %123 = vector.extract_strided_slice %43 {offsets = [0, 96], sizes = [32, 32], strides = [1, 1]} : vector<32x128xf32> to vector<32x32xf32>
    %124 = vector.shape_cast %123 : vector<32x32xf32> to vector<4x8x32xf32>
    %125 = arith.truncf %124 : vector<4x8x32xf32> to vector<4x8x32xbf16>
    %126 = vector.extract_strided_slice %44 {offsets = [0, 96], sizes = [32, 32], strides = [1, 1]} : vector<32x128xf32> to vector<32x32xf32>
    %127 = vector.shape_cast %126 : vector<32x32xf32> to vector<4x8x32xf32>
    %128 = arith.truncf %127 : vector<4x8x32xf32> to vector<4x8x32xbf16>
    %129 = vector.extract_strided_slice %45 {offsets = [0, 96], sizes = [32, 32], strides = [1, 1]} : vector<32x128xf32> to vector<32x32xf32>
    %130 = vector.shape_cast %129 : vector<32x32xf32> to vector<4x8x32xf32>
    %131 = arith.truncf %130 : vector<4x8x32xf32> to vector<4x8x32xbf16>
    "tpu.trace_start"() <{level = 10 : i32, message = "bqd,bkd->bqk"}> : () -> ()
    %cst_34 = arith.constant dense<0.000000e+00> : vector<4x8x8xf32>
    %132 = tpu.matmul %125, %128, %cst_34 {dimension_numbers = #tpu.dot_dimension_numbers<[2], [2], [1], [1], [0, 0, 0, 1, 1, 1], [0], [0]>} : vector<4x8x32xbf16>, vector<4x8x32xbf16>, vector<4x8x8xf32> -> vector<4x8x8xf32>
    "tpu.trace_stop"() : () -> ()
    %133 = vector.broadcast %47 : vector<1x8x8xf32> to vector<4x8x8xf32>
    %134 = arith.addf %132, %133 : vector<4x8x8xf32>
    %cst_35 = arith.constant dense<0xFF800000> : vector<4x8xf32>
    %135 = vector.multi_reduction <maximumf>, %134, %cst_35 [2] : vector<4x8x8xf32> to vector<4x8xf32>
    %136 = vector.shape_cast %135 : vector<4x8xf32> to vector<4x8x1xf32>
    %137 = vector.broadcast %136 : vector<4x8x1xf32> to vector<4x8x8xf32>
    %138 = arith.subf %134, %137 : vector<4x8x8xf32>
    %139 = math.exp %138 : vector<4x8x8xf32>
    %cst_36 = arith.constant dense<0.000000e+00> : vector<4x8xf32>
    %140 = vector.multi_reduction <add>, %139, %cst_36 [2] : vector<4x8x8xf32> to vector<4x8xf32>
    %141 = vector.shape_cast %140 : vector<4x8xf32> to vector<4x8x1xf32>
    %142 = tpu.reciprocal %141 {approx = true} : vector<4x8x1xf32> -> vector<4x8x1xf32>
    %143 = vector.broadcast %142 : vector<4x8x1xf32> to vector<4x8x8xf32>
    %144 = arith.mulf %139, %143 : vector<4x8x8xf32>
    %145 = arith.truncf %144 : vector<4x8x8xf32> to vector<4x8x8xbf16>
    "tpu.trace_start"() <{level = 10 : i32, message = "bqk,bkd->bqd"}> : () -> ()
    %cst_37 = arith.constant dense<0.000000e+00> : vector<4x8x32xf32>
    %146 = tpu.matmul %145, %131, %cst_37 {dimension_numbers = #tpu.dot_dimension_numbers<[2], [1], [1], [2], [0, 0, 0, 1, 1, 2], [0], [0]>} : vector<4x8x8xbf16>, vector<4x8x32xbf16>, vector<4x8x32xf32> -> vector<4x8x32xf32>
    "tpu.trace_stop"() : () -> ()
    %147 = vector.shape_cast %146 : vector<4x8x32xf32> to vector<32x32xf32>
    %148 = tpu.concatenate %72, %97, %122, %147 in 1 : vector<32x32xf32>, vector<32x32xf32>, vector<32x32xf32>, vector<32x32xf32> -> vector<32x128xf32>
    %149 = arith.truncf %148 : vector<32x128xf32> to vector<32x128xbf16>
    %c0_38 = arith.constant 0 : index
    %c0_39 = arith.constant 0 : index
    %c0_40 = arith.constant 0 : index
    %150 = vector.load %arg10[%c0_38, %c0_39, %c0_40] : memref<1x128x128xbf16, #tpu.memory_space<vmem>>, vector<1x128x128xbf16>
    %151 = vector.shape_cast %150 : vector<1x128x128xbf16> to vector<128x128xbf16>
    %cst_41 = arith.constant dense<0.000000e+00> : vector<32x128xf32>
    %152 = tpu.matmul %149, %151, %cst_41 {dimension_numbers = #tpu.dot_dimension_numbers<[1], [0], [0], [1], [0, 0, 1, 1], [], []>} : vector<32x128xbf16>, vector<128x128xbf16>, vector<32x128xf32> -> vector<32x128xf32>
    %153 = arith.addf %3, %152 : vector<32x128xf32>
    %c0_42 = arith.constant 0 : index
    %c0_43 = arith.constant 0 : index
    %c0_44 = arith.constant 0 : index
    %154 = vector.load %arg11[%c0_42, %c0_43, %c0_44] : memref<1x1x128xf32, #tpu.memory_space<vmem>>, vector<1x1x128xf32>
    %155 = vector.shape_cast %154 : vector<1x1x128xf32> to vector<128xf32>
    %156 = vector.shape_cast %155 : vector<128xf32> to vector<1x128xf32>
    %157 = vector.broadcast %156 : vector<1x128xf32> to vector<32x128xf32>
    %158 = arith.addf %153, %157 : vector<32x128xf32>
    %c0_45 = arith.constant 0 : index
    %c0_46 = arith.constant 0 : index
    %c0_47 = arith.constant 0 : index
    %159 = vector.load %arg12[%c0_45, %c0_46, %c0_47] : memref<1x1x128xf32, #tpu.memory_space<vmem>>, vector<1x1x128xf32>
    %160 = vector.shape_cast %159 : vector<1x1x128xf32> to vector<128xf32>
    %c0_48 = arith.constant 0 : index
    %c0_49 = arith.constant 0 : index
    %c0_50 = arith.constant 0 : index
    %161 = vector.load %arg13[%c0_48, %c0_49, %c0_50] : memref<1x1x128xf32, #tpu.memory_space<vmem>>, vector<1x1x128xf32>
    %162 = vector.shape_cast %161 : vector<1x1x128xf32> to vector<128xf32>
    %cst_51 = arith.constant dense<0.000000e+00> : vector<32xf32>
    %163 = vector.multi_reduction <add>, %158, %cst_51 [1] : vector<32x128xf32> to vector<32xf32>
    %164 = vector.shape_cast %163 : vector<32xf32> to vector<32x1xf32>
    %cst_52 = arith.constant 1.280000e+02 : f32
    %165 = vector.broadcast %cst_52 : f32 to vector<32x1xf32>
    %166 = arith.divf %164, %165 : vector<32x1xf32>
    %167 = vector.broadcast %166 : vector<32x1xf32> to vector<32x128xf32>
    %168 = arith.subf %158, %167 : vector<32x128xf32>
    %169 = arith.mulf %168, %168 : vector<32x128xf32>
    %cst_53 = arith.constant dense<0.000000e+00> : vector<32xf32>
    %170 = vector.multi_reduction <add>, %169, %cst_53 [1] : vector<32x128xf32> to vector<32xf32>
    %171 = vector.shape_cast %170 : vector<32xf32> to vector<32x1xf32>
    %cst_54 = arith.constant 1.280000e+02 : f32
    %172 = vector.broadcast %cst_54 : f32 to vector<32x1xf32>
    %173 = arith.divf %171, %172 : vector<32x1xf32>
    %cst_55 = arith.constant 9.99999974E-6 : f32
    %174 = vector.broadcast %cst_55 : f32 to vector<32x1xf32>
    %175 = arith.addf %173, %174 : vector<32x1xf32>
    %176 = math.rsqrt %175 : vector<32x1xf32>
    %177 = vector.broadcast %166 : vector<32x1xf32> to vector<32x128xf32>
    %178 = arith.subf %158, %177 : vector<32x128xf32>
    %179 = vector.broadcast %176 : vector<32x1xf32> to vector<32x128xf32>
    %180 = arith.mulf %178, %179 : vector<32x128xf32>
    %181 = vector.shape_cast %160 : vector<128xf32> to vector<1x128xf32>
    %182 = vector.broadcast %181 : vector<1x128xf32> to vector<32x128xf32>
    %183 = arith.mulf %180, %182 : vector<32x128xf32>
    %184 = vector.shape_cast %162 : vector<128xf32> to vector<1x128xf32>
    %185 = vector.broadcast %184 : vector<1x128xf32> to vector<32x128xf32>
    %186 = arith.addf %183, %185 : vector<32x128xf32>
    %187 = arith.truncf %186 : vector<32x128xf32> to vector<32x128xbf16>
    %c0_56 = arith.constant 0 : index
    %c0_57 = arith.constant 0 : index
    %c0_58 = arith.constant 0 : index
    %188 = vector.load %arg14[%c0_56, %c0_57, %c0_58] : memref<1x128x512xbf16, #tpu.memory_space<vmem>>, vector<1x128x512xbf16>
    %189 = vector.shape_cast %188 : vector<1x128x512xbf16> to vector<128x512xbf16>
    %cst_59 = arith.constant dense<0.000000e+00> : vector<32x512xf32>
    %190 = tpu.matmul %187, %189, %cst_59 {dimension_numbers = #tpu.dot_dimension_numbers<[1], [0], [0], [1], [0, 0, 1, 1], [], []>} : vector<32x128xbf16>, vector<128x512xbf16>, vector<32x512xf32> -> vector<32x512xf32>
    %c0_60 = arith.constant 0 : index
    %c0_61 = arith.constant 0 : index
    %c0_62 = arith.constant 0 : index
    %191 = vector.load %arg15[%c0_60, %c0_61, %c0_62] : memref<1x1x512xf32, #tpu.memory_space<vmem>>, vector<1x1x512xf32>
    %192 = vector.shape_cast %191 : vector<1x1x512xf32> to vector<512xf32>
    %193 = vector.shape_cast %192 : vector<512xf32> to vector<1x512xf32>
    %194 = vector.broadcast %193 : vector<1x512xf32> to vector<32x512xf32>
    %195 = arith.addf %190, %194 : vector<32x512xf32>
    %196 = arith.truncf %195 : vector<32x512xf32> to vector<32x512xbf16>
    %cst_63 = arith.constant 1.703130e+00 : bf16
    %197 = vector.broadcast %cst_63 : bf16 to vector<32x512xbf16>
    %198 = arith.mulf %197, %196 : vector<32x512xbf16>
    %199 = arith.negf %198 : vector<32x512xbf16>
    %200 = math.exp %199 : vector<32x512xbf16>
    %cst_64 = arith.constant 1.000000e+00 : bf16
    %201 = vector.broadcast %cst_64 : bf16 to vector<32x512xbf16>
    %202 = arith.addf %201, %200 : vector<32x512xbf16>
    %203 = arith.divf %201, %202 : vector<32x512xbf16>
    %204 = arith.mulf %196, %203 : vector<32x512xbf16>
    %c0_65 = arith.constant 0 : index
    %c0_66 = arith.constant 0 : index
    %c0_67 = arith.constant 0 : index
    %205 = vector.load %arg16[%c0_65, %c0_66, %c0_67] : memref<1x512x128xbf16, #tpu.memory_space<vmem>>, vector<1x512x128xbf16>
    %206 = vector.shape_cast %205 : vector<1x512x128xbf16> to vector<512x128xbf16>
    %cst_68 = arith.constant dense<0.000000e+00> : vector<32x128xf32>
    %207 = tpu.matmul %204, %206, %cst_68 {dimension_numbers = #tpu.dot_dimension_numbers<[1], [0], [0], [1], [0, 0, 1, 1], [], []>} : vector<32x512xbf16>, vector<512x128xbf16>, vector<32x128xf32> -> vector<32x128xf32>
    %c0_69 = arith.constant 0 : index
    %c0_70 = arith.constant 0 : index
    %c0_71 = arith.constant 0 : index
    %208 = vector.load %arg17[%c0_69, %c0_70, %c0_71] : memref<1x1x128xf32, #tpu.memory_space<vmem>>, vector<1x1x128xf32>
    %209 = vector.shape_cast %208 : vector<1x1x128xf32> to vector<128xf32>
    %210 = vector.shape_cast %209 : vector<128xf32> to vector<1x128xf32>
    %211 = vector.broadcast %210 : vector<1x128xf32> to vector<32x128xf32>
    %212 = arith.addf %207, %211 : vector<32x128xf32>
    %213 = arith.addf %158, %212 : vector<32x128xf32>
    %c1_i32 = arith.constant 1 : i32
    %214 = arith.cmpi ne, %arg1, %c1_i32 : i32
    %215 = arith.extui %214 : i1 to i32
    %c0_i32_72 = arith.constant 0 : i32
    %216 = arith.cmpi ne, %215, %c0_i32_72 : i32
    scf.if %216 {
      %c0_75 = arith.constant 0 : index
      %c0_76 = arith.constant 0 : index
      %220 = vector.load %arg18[%c0_75, %c0_76] : memref<32x128xf32, #tpu.memory_space<vmem>>, vector<32x128xf32>
      tpu.vector_store %arg18[%c0_75, %c0_76], %213 {strides = array<i32>} : memref<32x128xf32, #tpu.memory_space<vmem>>, vector<32x128xf32>,
    } else {
    }
    %c1_i32_73 = arith.constant 1 : i32
    %217 = arith.cmpi eq, %arg1, %c1_i32_73 : i32
    %218 = arith.extui %217 : i1 to i32
    %c0_i32_74 = arith.constant 0 : i32
    %219 = arith.cmpi ne, %218, %c0_i32_74 : i32
    scf.if %219 {
      %c0_75 = arith.constant 0 : index
      %c0_76 = arith.constant 0 : index
      %220 = vector.load %arg4[%c0_75, %c0_76] : memref<1x128xf32, #tpu.memory_space<vmem>>, vector<1x128xf32>
      %221 = vector.shape_cast %220 : vector<1x128xf32> to vector<128xf32>
      %c0_77 = arith.constant 0 : index
      %c0_78 = arith.constant 0 : index
      %222 = vector.load %arg5[%c0_77, %c0_78] : memref<1x128xf32, #tpu.memory_space<vmem>>, vector<1x128xf32>
      %223 = vector.shape_cast %222 : vector<1x128xf32> to vector<128xf32>
      %cst_79 = arith.constant dense<0.000000e+00> : vector<32xf32>
      %224 = vector.multi_reduction <add>, %213, %cst_79 [1] : vector<32x128xf32> to vector<32xf32>
      %225 = vector.shape_cast %224 : vector<32xf32> to vector<32x1xf32>
      %cst_80 = arith.constant 1.280000e+02 : f32
      %226 = vector.broadcast %cst_80 : f32 to vector<32x1xf32>
      %227 = arith.divf %225, %226 : vector<32x1xf32>
      %228 = vector.broadcast %227 : vector<32x1xf32> to vector<32x128xf32>
      %229 = arith.subf %213, %228 : vector<32x128xf32>
      %230 = arith.mulf %229, %229 : vector<32x128xf32>
      %cst_81 = arith.constant dense<0.000000e+00> : vector<32xf32>
      %231 = vector.multi_reduction <add>, %230, %cst_81 [1] : vector<32x128xf32> to vector<32xf32>
      %232 = vector.shape_cast %231 : vector<32xf32> to vector<32x1xf32>
      %cst_82 = arith.constant 1.280000e+02 : f32
      %233 = vector.broadcast %cst_82 : f32 to vector<32x1xf32>
      %234 = arith.divf %232, %233 : vector<32x1xf32>
      %cst_83 = arith.constant 9.99999974E-6 : f32
      %235 = vector.broadcast %cst_83 : f32 to vector<32x1xf32>
      %236 = arith.addf %234, %235 : vector<32x1xf32>
      %237 = math.rsqrt %236 : vector<32x1xf32>
      %238 = vector.broadcast %227 : vector<32x1xf32> to vector<32x128xf32>
      %239 = arith.subf %213, %238 : vector<32x128xf32>
      %240 = vector.broadcast %237 : vector<32x1xf32> to vector<32x128xf32>
      %241 = arith.mulf %239, %240 : vector<32x128xf32>
      %242 = vector.shape_cast %221 : vector<128xf32> to vector<1x128xf32>
      %243 = vector.broadcast %242 : vector<1x128xf32> to vector<32x128xf32>
      %244 = arith.mulf %241, %243 : vector<32x128xf32>
      %245 = vector.shape_cast %223 : vector<128xf32> to vector<1x128xf32>
      %246 = vector.broadcast %245 : vector<1x128xf32> to vector<32x128xf32>
      %247 = arith.addf %244, %246 : vector<32x128xf32>
      %c0_84 = arith.constant 0 : index
      %c0_85 = arith.constant 0 : index
      %248 = vector.load %arg18[%c0_84, %c0_85] : memref<32x128xf32, #tpu.memory_space<vmem>>, vector<32x128xf32>
      tpu.vector_store %arg18[%c0_84, %c0_85], %247 {strides = array<i32>} : memref<32x128xf32, #tpu.memory_space<vmem>>, vector<32x128xf32>,
    } else {
    }
    return
  }
  func.func @transform_0(%arg0: i32, %arg1: i32) -> (i32, i32) {
    %c0_i32 = arith.constant 0 : i32
    %c0_i32_0 = arith.constant 0 : i32
    return %arg0, %c0_i32 : i32, i32
  }
  func.func @transform_1(%arg0: i32, %arg1: i32) -> (i32, i32) {
    %c0_i32 = arith.constant 0 : i32
    %c0_i32_0 = arith.constant 0 : i32
    %c0_i32_1 = arith.constant 0 : i32
    return %c0_i32, %c0_i32_0 : i32, i32
  }
  func.func @transform_2(%arg0: i32, %arg1: i32) -> (i32, i32) {
    %c0_i32 = arith.constant 0 : i32
    %c0_i32_0 = arith.constant 0 : i32
    %c0_i32_1 = arith.constant 0 : i32
    return %c0_i32, %c0_i32_0 : i32, i32
  }
  func.func @transform_3(%arg0: i32, %arg1: i32) -> (i32, i32) {
    %c0_i32 = arith.constant 0 : i32
    %c0_i32_0 = arith.constant 0 : i32
    %c0_i32_1 = arith.constant 0 : i32
    return %c0_i32, %c0_i32_0 : i32, i32
  }
  func.func @transform_4(%arg0: i32, %arg1: i32) -> (i32, i32, i32) {
    %c0_i32 = arith.constant 0 : i32
    %c0_i32_0 = arith.constant 0 : i32
    %c0_i32_1 = arith.constant 0 : i32
    return %arg1, %c0_i32, %c0_i32_0 : i32, i32, i32
  }
  func.func @transform_5(%arg0: i32, %arg1: i32) -> (i32, i32, i32) {
    %c0_i32 = arith.constant 0 : i32
    %c0_i32_0 = arith.constant 0 : i32
    %c0_i32_1 = arith.constant 0 : i32
    return %arg1, %c0_i32, %c0_i32_0 : i32, i32, i32
  }
  func.func @transform_6(%arg0: i32, %arg1: i32) -> (i32, i32, i32) {
    %c0_i32 = arith.constant 0 : i32
    %c0_i32_0 = arith.constant 0 : i32
    %c0_i32_1 = arith.constant 0 : i32
    return %arg1, %c0_i32, %c0_i32_0 : i32, i32, i32
  }
  func.func @transform_7(%arg0: i32, %arg1: i32) -> (i32, i32, i32) {
    %c0_i32 = arith.constant 0 : i32
    %c0_i32_0 = arith.constant 0 : i32
    %c0_i32_1 = arith.constant 0 : i32
    return %arg1, %c0_i32, %c0_i32_0 : i32, i32, i32
  }
  func.func @transform_8(%arg0: i32, %arg1: i32) -> (i32, i32, i32) {
    %c0_i32 = arith.constant 0 : i32
    %c0_i32_0 = arith.constant 0 : i32
    %c0_i32_1 = arith.constant 0 : i32
    return %arg1, %c0_i32, %c0_i32_0 : i32, i32, i32
  }
  func.func @transform_9(%arg0: i32, %arg1: i32) -> (i32, i32, i32) {
    %c0_i32 = arith.constant 0 : i32
    %c0_i32_0 = arith.constant 0 : i32
    %c0_i32_1 = arith.constant 0 : i32
    return %arg1, %c0_i32, %c0_i32_0 : i32, i32, i32
  }
  func.func @transform_10(%arg0: i32, %arg1: i32) -> (i32, i32, i32) {
    %c0_i32 = arith.constant 0 : i32
    %c0_i32_0 = arith.constant 0 : i32
    %c0_i32_1 = arith.constant 0 : i32
    return %arg1, %c0_i32, %c0_i32_0 : i32, i32, i32
  }
  func.func @transform_11(%arg0: i32, %arg1: i32) -> (i32, i32, i32) {
    %c0_i32 = arith.constant 0 : i32
    %c0_i32_0 = arith.constant 0 : i32
    %c0_i32_1 = arith.constant 0 : i32
    return %arg1, %c0_i32, %c0_i32_0 : i32, i32, i32
  }
  func.func @transform_12(%arg0: i32, %arg1: i32) -> (i32, i32, i32) {
    %c0_i32 = arith.constant 0 : i32
    %c0_i32_0 = arith.constant 0 : i32
    %c0_i32_1 = arith.constant 0 : i32
    return %arg1, %c0_i32, %c0_i32_0 : i32, i32, i32
  }
  func.func @transform_13(%arg0: i32, %arg1: i32) -> (i32, i32, i32) {
    %c0_i32 = arith.constant 0 : i32
    %c0_i32_0 = arith.constant 0 : i32
    %c0_i32_1 = arith.constant 0 : i32
    return %arg1, %c0_i32, %c0_i32_0 : i32, i32, i32
  }
  func.func @transform_14(%arg0: i32, %arg1: i32) -> (i32, i32, i32) {
    %c0_i32 = arith.constant 0 : i32
    %c0_i32_0 = arith.constant 0 : i32
    %c0_i32_1 = arith.constant 0 : i32
    return %arg1, %c0_i32, %c0_i32_0 : i32, i32, i32
  }
  func.func @transform_15(%arg0: i32, %arg1: i32) -> (i32, i32, i32) {
    %c0_i32 = arith.constant 0 : i32
    %c0_i32_0 = arith.constant 0 : i32
    %c0_i32_1 = arith.constant 0 : i32
    return %arg1, %c0_i32, %c0_i32_0 : i32, i32, i32
  }
  func.func @transform_16(%arg0: i32, %arg1: i32) -> (i32, i32) {
    %c0_i32 = arith.constant 0 : i32
    %c0_i32_0 = arith.constant 0 : i32
    return %arg0, %c0_i32 : i32, i32
  }
}

</mosaic_0001>

<bundles_post_ra>
// kernel: clip_text_forward.1
= control target key start
LH: loop header
LB: loop body
LE: loop exit
PB: predicated region body
PF: predicated region fallthrough
CT: control target
= control target key end

     0   :  { %s6260_s0 = inlined_call_operand.vmem [shape: f32[64,128], index: 0, kind: input, shape index: {}, may-alias: {0,16}]   ;;  %s6261_s1 = inlined_call_operand.vmem [shape: f32[8,8], index: 1, kind: input, shape index: {}]   ;;  %s6262_s2 = inlined_call_operand.vmem [shape: f32[1,128], index: 2, kind: input, shape index: {}]   ;;  %s6263_s3 = inlined_call_operand.vmem [shape: f32[1,128], index: 3, kind: input, shape index: {}]   ;;  %s6264_s4 = inlined_call_operand.vmem [shape: f32[2,1,128], index: 4, kind: input, shape index: {}]   ;;  %s6265_s5 = inlined_call_operand.vmem [shape: f32[2,1,128], index: 5, kind: input, shape index: {}]   ;;  %s6266_s6 = inlined_call_operand.hbm [shape: bf16[2,128,384], index: 6, kind: input, shape index: {}]   ;;  %s6267_s7 = inlined_call_operand.vmem [shape: f32[2,1,384], index: 7, kind: input, shape index: {}]   ;;  %s6268_s8 = inlined_call_operand.vmem [shape: bf16[2,128,128], index: 8, kind: input, shape index: {}]   ;;  %s6269_s9 = inlined_call_operand.vmem [shape: f32[2,1,128], index: 9, kind: input, shape index: {}]   ;;  %s6270_s10 = inlined_call_operand.vmem [shape: f32[2,1,128], index: 10, kind: input, shape index: {}]   ;;  %s6271_s11 = inlined_call_operand.vmem [shape: f32[2,1,128], index: 11, kind: input, shape index: {}]   ;;  %s6272_s12 = inlined_call_operand.vmem [shape: bf16[2,128,512], index: 12, kind: input, shape index: {}]   ;;  %s6273_s13 = inlined_call_operand.vmem [shape: f32[2,1,512], index: 13, kind: input, shape index: {}]   ;;  %s6274_s14 = inlined_call_operand.hbm [shape: bf16[2,512,128], index: 14, kind: input, shape index: {}]   ;;  %s6275_s15 = inlined_call_operand.vmem [shape: f32[2,1,128], index: 15, kind: input, shape index: {}]   ;;  %s6276_s16 = inlined_call_operand.vmem [shape: f32[64,128], index: 16, kind: output, shape index: {}, may-alias: {0,16}]  }
   0x1   :  { %6285 = sst [smem:[#allocation17_spill]] %s6260_s0 }
   0x2   :  { %6286 = sst [smem:[#allocation18_spill]] %s6261_s1 }
   0x3   :  { %6287 = sst [smem:[#allocation19_spill]] %s6262_s2 }
   0x4   :  { %6288 = sst [smem:[#allocation20_spill]] %s6263_s3 }
   0x5   :  { %6289 = sst [smem:[#allocation21_spill]] %s6266_s6 }
   0x6   :  { %6290 = sst [smem:[#allocation22_spill]] %s6267_s7 }
   0x7   :  { %6291 = sst [smem:[#allocation23_spill]] %s6268_s8 }
   0x8   :  { %6292 = sst [smem:[#allocation24_spill]] %s6274_s14 }
   0x9   :  { %6293 = sst [smem:[#allocation25_spill]] %s6275_s15 }
   0xa   :  { %6294 = sst [smem:[#allocation26_spill]] %s6276_s16 }
   0xb   :  { %21 = vsyncpa [#allocation3], 0 }
   0xc   :  { %23 = vsyncpa [#allocation3 + $0x1], 0 }
   0xd   :  { %24 = vsyncpa [#allocation5], 0 }
   0xe   :  { %26 = vsyncpa [#allocation5 + $0x1], 0  ;;  %s5369_s21 = smov 0   ;;  %s5371_s22 = smov 0  }
   0xf   :  { %s5373_s23 = smov 0   ;;  %s5375_s24 = smov 0  }
  0x10   :  { %s5377_s25 = smov 0   ;;  %s5379_s26 = smov 0  }
  0x11   :  { %s5381_s27 = smov 0   ;;  %s5383_s28 = smov 0  }
  0x12 LB: > { %6295 = sst [smem:[#allocation8_spill]] %s5246_s22  ;;  %s4233_s29 = sadd.s32 4294967295, %s5270_s28   ;;  %s5270_s28 = sphi %s5383_s28, %s32_s28   ;;  %s5266_s27 = sphi %s5381_s27, %s6331_s27   ;;  %s5262_s26 = sphi %s5379_s26, %s6330_s26   ;;  %s5258_s25 = sphi %s5377_s25, %s6329_s25   ;;  %s5254_s24 = sphi %s5375_s24, %s6328_s24   ;;  %s5250_s23 = sphi %s5373_s23, %s6327_s23   ;;  %s5246_s22 = sphi %s5371_s22, %s6326_s22   ;;  %s5242_s21 = sphi %s5369_s21, %s6325_s21  }
  0x13   : > { %6296 = sst [smem:[#allocation9_spill]] %s5250_s23  ;;  %s41_s30 = sadd.s32 1, %s5262_s26 }
  0x14   : > { %6297 = sst [smem:[#allocation10_spill]] %s5262_s26  ;;  %p42_p0 = scmp.ge.s32.totalorder %s41_s30, 2 }
  0x15   : > { %6298 = sst [smem:[#allocation11_spill]] %s5266_s27  ;;  %s44_s0 = sadd.s32 1, %s5266_s27 }
  0x16   : > { %6299 = sst [smem:[#allocation12_spill]] %s5270_s28  ;;  %s192_s17 = sadd.s32 1, %s5250_s23 }
  0x17   : > { %p199_p1 = scmp.ne.s32.totalorder %s5250_s23, %s5246_s22  ;;  %s6333_s30 = smov (%p42_p0, %s41_s30), 0 }
  0x18   : > { %6300 = sst [smem:[#allocation13_spill]] %s6333_s30  ;;  %s6335_s0 = smov (!%p42_p0, %s44_s0), %s5266_s27 }
  0x19   : > { %s189_s18 = ssub.s32 %s5262_s26, %s6333_s30  ;;  %p200_p2 = scmp.eq.s32.totalorder %s5270_s28, 0 }
  0x1a   : > { %p46_p3 = scmp.ge.s32.totalorder %s6335_s0, 2  ;;  %p190_p4 = scmp.eq.s32.totalorder %s189_s18, 0 }
  0x1b   : > { %p201_p5 = por %p200_p2, %p199_p1  ;;  %p205_p6 = scmp.ne.s32.totalorder %s5246_s22, %s5242_s21 }
  0x1c   : > { %s6337_s0 = smov (%p46_p3, %s6335_s0), 0  ;;  %p206_p7 = scmp.eq.s32.totalorder %s4233_s29, 0 }
  0x1d   : > { %6301 = sst [smem:[#allocation14_spill]] %s6337_s0  ;;  %p4791_p8 = scmp.lt.s32.totalorder %s5270_s28, 4 }
  0x1e   : > { %s5423_s19 = scalar_select %p190_p4, %s5250_s23, %s192_s17  }
  0x1f   : > { %s5427_s20 = sand.u32 1, %s5250_s23   ;;  %p5429_p9 = por %p206_p7, %p205_p6 }
  0x20   : > { %6302 = sst [smem:[#allocation15_spill]] %s5423_s19  ;;  %s4776_s30 = smul.u32 192, %s5427_s20 }
  0x21   : > { %s6303_s3 = scalar_select %p5429_p9, 1, 0 }
  0x22   : > { %p5434_p10 = pnand %p4791_p8, %p201_p5  ;;  %s4777_s21 = smul.u32 3072, %s5262_s26 }
  0x23   : > { %s6305_s6 = sld [smem:[#allocation21_spill]]  ;;  %s523_s0 = scalar_lea.vmem [#allocation2], %s4776_s30 }
  0x24   : > { %s530_s19 = sshll.u32 %s523_s0, 4  ;;  %s520_s23 = scalar_lea.sflag [#allocation3], %s5427_s20  ;;  %s5444_s19 = int_to_ptr.vmem [resolvable:$true] %s530_s19 }
  0x25   : > { %p5142_p12 = pneg %p5434_p10 }
  0x29   : > { %s5442_s29 = scalar_lea.hbm %s6305_s6, %s4777_s21  ;;  %s5145_s18 = scalar_lea.hbm %s6305_s6, 6144 }
  0x2a   : > { %s5140_s2 = scalar_lea.hbm %s5442_s29, 3072  ;;  %p5146_p1 = scmp.lt.u32.totalorder %s5442_s29, %s6305_s6 }
  0x2b   : > { %p5141_p11 = scmp.ne.s32.totalorder %s5442_s29, %s5140_s2  ;;  %p5147_p2 = scmp.lt.u32.totalorder %s5145_s18, %s5140_s2 }
  0x2c   : > { %p5149_p4 = scmp.lt.u32.totalorder %s5140_s2, %s5442_s29 }
  0x2d   : > { %p5143_p13 = pnand %p5142_p12, %p5141_p11  ;;  %p5148_p3 = por %p5147_p2, %p5146_p1 }
  0x2f   : > { %p5144_p0 = pneg %p5143_p13  ;;  %p5150_p5 = por %p5149_p4, %p5148_p3 }
  0x31   : > { %p5151_p6 = pnand %p5150_p5, %p5144_p0 }
  0x33   : > { %5154 = shalt.err (!%p5151_p6)
}
  0x34   : > { %s5155_s30 = scalar_lea.vmem %s5444_s19, 3072  ;;  %s5272_s0 = smov [#allocation2]  }
  0x35   : > { %p5156_p7 = scmp.ne.s32.totalorder %s5444_s19, %s5155_s30  ;;  %s5160_s17 = sshll.u32 %s5272_s0, 4  ;;  %s5161_s17 = int_to_ptr.vmem [resolvable:$false] %s5160_s17 }
  0x36   : > { %s5162_s1 = scalar_lea.vmem %s5161_s17, 6144  ;;  %p5163_p13 = scmp.lt.s32.totalorder %s5444_s19, %s5161_s17 }
  0x37   : > { %p5158_p8 = pnand %p5156_p7, %p5142_p12  ;;  %p5164_p1 = scmp.lt.s32.totalorder %s5162_s1, %s5155_s30 }
  0x39   : > { %p5159_p11 = pneg %p5158_p8  ;;  %p5165_p2 = por %p5164_p1, %p5163_p13 }
  0x3b   : > { %p5166_p3 = pnand %p5165_p2, %p5159_p11 }
  0x3d   : > { %5169 = shalt.err (!%p5166_p3)
}
  0x3e   : > { %s5273_s2 = smov 192   ;;  %s5274_s16 = smov 12  }
  0x3f   : > { %4787 = dma.hbm_to_vmem [thread:$0]  (!%p5434_p10), %s5442_s29, 3072, %s5444_s19, %s520_s23, %s5273_s2, %s5273_s2, %s5274_s16  }
  0x40   : > { %p4241_p0 = scmp.ge.s32.totalorder %s5270_s28, 1  ;;  %p613_p4 = scmp.lt.s32.totalorder %s5270_s28, 5 }
  0x41   : > { %s4238_s21 = sshll.u32 %s5427_s20, 8  ;;  %s4401_s30 = sshll.u32 %s5262_s26, 12 }
  0x42   : > { %p5477_p5 = pnand %p4241_p0, %p613_p4  ;;  %s592_s0 = scalar_lea.vmem [#allocation4], %s4238_s21 }
  0x43   : > { %s599_s17 = sshll.u32 %s592_s0, 4  ;;  %s6307_s14 = sld [smem:[#allocation24_spill]]  ;;  %s5487_s17 = int_to_ptr.vmem [resolvable:$true] %s599_s17 }
  0x44   : > { %s589_s23 = scalar_lea.sflag [#allocation5], %s5427_s20 }
  0x49   : > { %s5485_s15 = scalar_lea.hbm %s6307_s14, %s4401_s30  ;;  %s5175_s16 = scalar_lea.hbm %s6307_s14, 8192 }
  0x4a   : > { %s5170_s19 = scalar_lea.hbm %s5485_s15, 4096  ;;  %p5176_p11 = scmp.lt.u32.totalorder %s5485_s15, %s6307_s14 }
  0x4b   : > { %p5171_p6 = scmp.ne.s32.totalorder %s5485_s15, %s5170_s19  ;;  %p5177_p13 = scmp.lt.u32.totalorder %s5175_s16, %s5170_s19 }
  0x4c   : > { %p5179_p2 = scmp.lt.u32.totalorder %s5170_s19, %s5485_s15 }
  0x4d   : > { %p5173_p7 = pnand %p5171_p6, %p5142_p12  ;;  %p5178_p1 = por %p5177_p13, %p5176_p11 }
  0x4f   : > { %p5174_p8 = pneg %p5173_p7  ;;  %p5180_p3 = por %p5179_p2, %p5178_p1 }
  0x51   : > { %p5181_p0 = pnand %p5180_p3, %p5174_p8 }
  0x53   : > { %5184 = shalt.err (!%p5181_p0)
}
  0x54   : > { %s5185_s30 = scalar_lea.vmem %s5487_s17, 4096  ;;  %s5275_s0 = smov [#allocation4]  }
  0x55   : > { %p5186_p4 = scmp.ne.s32.totalorder %s5487_s17, %s5185_s30  ;;  %s5190_s1 = sshll.u32 %s5275_s0, 4  ;;  %s5191_s1 = int_to_ptr.vmem [resolvable:$false] %s5190_s1 }
  0x56   : > { %s5192_s29 = scalar_lea.vmem %s5191_s1, 8192  ;;  %p5193_p9 = scmp.lt.s32.totalorder %s5487_s17, %s5191_s1 }
  0x57   : > { %p5188_p6 = pnand %p5186_p4, %p5142_p12  ;;  %p5194_p11 = scmp.lt.s32.totalorder %s5192_s29, %s5185_s30 }
  0x59   : > { %p5189_p7 = pneg %p5188_p6  ;;  %p5195_p13 = por %p5194_p11, %p5193_p9 }
  0x5b   : > { %p5196_p1 = pnand %p5195_p13, %p5189_p7 }
  0x5d   : > { %5199 = shalt.err (!%p5196_p1)
}
  0x5e   : > { %s5276_s19 = smov 64   ;;  %s5277_s2 = smov 4  }
  0x5f   : > { %4790 = dma.hbm_to_vmem [thread:$0]  (!%p5434_p10), %s5485_s15, 4096, %s5487_s17, %s589_s23, %s5276_s19, %s5276_s19, %s5277_s2  }
  0x60   : > { %617 = sbr.rel (%p5477_p5) target bundleno = 4725 (0x1275), region = 84 }
  0x67   : > { %s619_s16 = sand.u32 1, %s5246_s22   ;;  %p6308_p9 = scmp.ne.s32.totalorder %s6303_s3, 0 }
  0x68   : > { %s4778_s6 = smul.u32 192, %s619_s16  ;;  %s620_s21 = scalar_lea.sflag [#allocation3], %s619_s16 }
  0x6a   : > { %s5518_s30 = scalar_lea.vmem [#allocation2], %s4778_s6 }
  0x6b   : > { %5233 = dma.done.wait (%p6308_p9), %s620_s21, 3072  }
  0x6c   : > { %5235 = vsyncadd (%p6308_p9), %s620_s21, 4294964224  ;;  %s4242_s0 = sshll.u32 %s619_s16, 8  ;;  %s629_s27 = scalar_lea.sflag [#allocation5], %s619_s16 }
  0x6d   : > { %s5524_s20 = scalar_lea.vmem [#allocation4], %s4242_s0 }
  0x6e   : > { %6309 = sst [smem:[#allocation16_spill]] %s5524_s20 }
  0x6f   : > { %5237 = dma.done.wait (%p6308_p9), %s629_s27, 4096  }
  0x70   : > { %5239 = vsyncadd (%p6308_p9), %s629_s27, 4294963200  ;;  %s4243_s15 = sshll.u32 %s5258_s25, 2  ;;  %p733_p10 = scmp.lt.s32.totalorder %s5254_s24, 1 }
  0x71   : > { %p728_p12 = scmp.lt.s32.totalorder %s4243_s15, 7  ;;  %s6310_s21 = sld [smem:[#allocation17_spill]] }
  0x72   : > { %s5533_s18 = scalar_select %p733_p10, %s5254_s24, 1 }
  0x73   : > { %s6339_s15 = smov (!%p728_p12, %s4243_s15), 7  ;;  %s6311_s7 = sld [smem:[#allocation22_spill]] }
  0x74   : > { %s4244_s19 = sshll.u32 %s6339_s15, 3  ;;  %s4779_s2 = smul.u32 3, %s5533_s18 }
  0x75   : > { %s4402_s27 = sshll.u32 %s5533_s18, 6  ;;  %s6312_s8 = sld [smem:[#allocation23_spill]] }
  0x76   : > { %s756_s20 = scalar_lea.vmem %s6271_s11, %s5533_s18  ;;  %s4403_s14 = sshll.u32 %s5533_s18, 8 }
  0x77   : > { %s731_s0 = scalar_lea.vmem %s6310_s21, %s4244_s19  ;;  %s4249_s28 = sshll.u32 %s5533_s18, 2 }
  0x78   : > { %s5580_s23 = scalar_lea.vmem %s6273_s13, %s4249_s28  ;;  %s6313_s29 = sld [smem:[#allocation25_spill]] }
  0x79   : > { %s5551_s22 = scalar_lea.vmem %s6311_s7, %s4779_s2  ;;  %s5574_s7 = scalar_lea.vmem %s6272_s12, %s4403_s14 }
  0x7a   : > { %s6314_s6 = sld [smem:[#allocation26_spill]]  ;;  %p4252_p5 = scmp.ne.s32.totalorder %s5254_s24, 0 }
  0x7b   : > { %s5556_s17 = scalar_lea.vmem %s6312_s8, %s4402_s27  ;;  %v782_v0 = vld [vmem:[%s731_s0] sm:$0xff] (!%p4252_p5)  ;;  %v783_v1 = vld [vmem:[%s731_s0 + $0x8] sm:$0xff] (!%p4252_p5)  ;;  %v784_v2 = vld [vmem:[%s731_s0 + $0x10] sm:$0xff] (!%p4252_p5) }
  0x7c   : > { %781 = sbr.rel (%p4252_p5) target bundleno = 131 (0x83), region = 96  ;;  %v785_v3 = vld [vmem:[%s731_s0 + $0x18] sm:$0xff] (!%p4252_p5) }
  0x7e   : > { %s768_s1 = scalar_lea.vmem %s6313_s29, %s5533_s18 }
  0x80   : > { %s5589_s21 = scalar_lea.vmem %s6314_s6, %s4244_s19 }
  0x81   : > { %786 = vst [vmem:[%s5589_s21] sm:$0xff] (!%p4252_p5), %v782_v0  ;;  %787 = vst [vmem:[%s5589_s21 + $0x8] sm:$0xff] (!%p4252_p5), %v783_v1 }
  0x82   : > { %788 = vst [vmem:[%s5589_s21 + $0x10] sm:$0xff] (!%p4252_p5), %v784_v2  ;;  %789 = vst [vmem:[%s5589_s21 + $0x18] sm:$0xff] (!%p4252_p5), %v785_v3 }
  0x83 PF: > { %v4896_v8 = vld [vmem:[%s5518_s30 + $0x4] ss:$12 sps:$4 sm:$0xff]   ;;  %v4898_v9 = vld [vmem:[%s5518_s30] ss:$12 sps:$4 sm:$0xff]   ;;  %v4899_v10 = vld [vmem:[%s5518_s30 + $0x1c] ss:$12 sps:$4 sm:$0xff]   ;;  %s6315_s19 = scalar_lea.vmem %s6264_s4, %s5533_s18  ;;  %s6316_s16 = scalar_lea.vmem %s6265_s5, %s5533_s18 }
  0x84   : > { %v4901_v11 = vld [vmem:[%s5518_s30 + $0x8] ss:$12 sps:$4 sm:$0xff]   ;;  %1040 = vmatprep.subr.bf16.mxu0 %v4896_v8  ;;  %v4902_v28 = vld [vmem:[%s5518_s30 + $0x18] ss:$12 sps:$4 sm:$0xff]   ;;  %v4905_v30 = vld [vmem:[%s5518_s30 + $0x20] ss:$12 sps:$4 sm:$0xff]   ;;  %s6318_s25 = scalar_lea.vmem %s6269_s9, %s5533_s18  ;;  %s6319_s6 = scalar_lea.vmem %s6270_s10, %s5533_s18 }
  0x85   : > { %1041 = vmatpush1.bf16.msra.mxu0 %v4898_v9  ;;  %4544 = vmatprep.subr.bf16.mxu1 %v4901_v11  ;;  %v4903_v29 = vld [vmem:[%s5518_s30 + $0x34] ss:$12 sps:$4 sm:$0xff]   ;;  %v4906_v31 = vld [vmem:[%s5518_s30 + $0x30] ss:$12 sps:$4 sm:$0xff]   ;;  %v4907_v32 = vld [vmem:[%s5518_s30 + $0x4c] ss:$12 sps:$4 sm:$0xff]  }
  0x86   : > { %1042 = vmatprep.subr.bf16.mxu0 %v4899_v10  ;;  %4545 = vmatpush3.bf16.msra.mxu1 %v4901_v11  ;;  %v4909_v33 = vld [vmem:[%s5518_s30 + $0x38] ss:$12 sps:$4 sm:$0xff]   ;;  %v4910_v34 = vld [vmem:[%s5518_s30 + $0x48] ss:$12 sps:$4 sm:$0xff]   ;;  %v4913_v36 = vld [vmem:[%s5518_s30 + $0x50] ss:$12 sps:$4 sm:$0xff]  }
  0x87   : > { %4546 = vmatprep.subr.bf16.mxu1 %v4905_v30  ;;  %v4911_v35 = vld [vmem:[%s5518_s30 + $0x64] ss:$12 sps:$4 sm:$0xff]   ;;  %v4914_v37 = vld [vmem:[%s5518_s30 + $0x60] ss:$12 sps:$4 sm:$0xff]   ;;  %v4915_v38 = vld [vmem:[%s5518_s30 + $0x7c] ss:$12 sps:$4 sm:$0xff]  }
  0x88   : > { %v790_v4 = vld [vmem:[%s5589_s21] sm:$0xff]  ;;  %v791_v6 = vld [vmem:[%s5589_s21 + $0x8] sm:$0xff]  ;;  %v5278_v43 = vmov 0   ;;  %v4922_v44 = vld [vmem:[%s5518_s30 + $0x90] ss:$12 sps:$4 sm:$0xff]   ;;  %vm5280_vm0 = vmmov 0  }
  0x89   : > { %v792_v5 = vld [vmem:[%s5589_s21 + $0x10] sm:$0xff]  ;;  %796 = vadd.xlane.f32.xlu0 %v790_v4  ;;  %v793_v7 = vld [vmem:[%s5589_s21 + $0x18] sm:$0xff]  ;;  %1043 = vmatpush1.bf16.msra.mxu0 %v4902_v28  ;;  %v4921_v42 = vld [vmem:[%s5518_s30 + $0x80] ss:$12 sps:$4 sm:$0xff]   ;;  %vm1159_vm1 = vcmask 261120   ;;  %vm1396_vm2 = vcmask 1043456  }
  0x8a   : > { %800 = vadd.xlane.f32.xlu1 %v792_v5  ;;  %1044 = vmatprep.subr.bf16.mxu0 %v4903_v29  ;;  %v4917_v39 = vld [vmem:[%s5518_s30 + $0x68] ss:$12 sps:$4 sm:$0xff]   ;;  %v4918_v40 = vld [vmem:[%s5518_s30 + $0x78] ss:$12 sps:$4 sm:$0xff]   ;;  %v4927_v48 = vld [vmem:[%s5518_s30 + $0xb0] ss:$12 sps:$4 sm:$0xff]  }
  0x8b   : > { %4547 = vmatpush3.bf16.msra.mxu1 %v4905_v30  ;;  %v4919_v41 = vld [vmem:[%s5518_s30 + $0x94] ss:$12 sps:$4 sm:$0xff]   ;;  %1072 = vmatprep.mubr.bf16.mxu0 %v5278_v43  ;;  %v4923_v45 = vld [vmem:[%s5518_s30 + $0xac] ss:$12 sps:$4 sm:$0xff]   ;;  %s6317_s26 = sld [smem:[#allocation18_spill]]  ;;  %vm1344_vm3 = vcmask 64512  }
  0x8c   : > { %4548 = vmatprep.subr.bf16.mxu1 %v4909_v33  ;;  %v4925_v46 = vld [vmem:[%s5518_s30 + $0x98] ss:$12 sps:$4 sm:$0xff]   ;;  %v4926_v47 = vld [vmem:[%s5518_s30 + $0xa8] ss:$12 sps:$4 sm:$0xff]   ;;  %v4253_v63 = vld [vmem:[%s6315_s19] ss:$0 sm:$0xff] }
  0x8d   : > { %798 = vadd.xlane.f32.xlu0 %v791_v6  ;;  %1045 = vmatpush1.bf16.msra.mxu0 %v4906_v31  ;;  %s5281_s2 = smov 96   ;;  %s5282_s28 = smov 64   ;;  %vm2962_vm4 = vcmask 523264   ;;  %vm2967_vm5 = vcmask 785408  }
  0x8e   : > { %802 = vadd.xlane.f32.xlu1 %v793_v7  ;;  %1046 = vmatprep.subr.bf16.mxu0 %v4907_v32  ;;  %s5283_s27 = smov 32   ;;  %s6320_s19 = sld [smem:[#allocation16_spill]] }
  0x8f   : > { %4549 = vmatpush3.bf16.msra.mxu1 %v4909_v33  ;;  %p4395_p8 = scmp.eq.s32.totalorder %s5254_s24, 1 }
  0x90   : > { %4550 = vmatprep.subr.bf16.mxu1 %v4913_v36 }
  0x91   : > { %1047 = vmatpush1.bf16.msra.mxu0 %v4910_v34 }
  0x92   : > { %1048 = vmatprep.subr.bf16.mxu0 %v4911_v35 }
  0x93   : > { %4551 = vmatpush3.bf16.msra.mxu1 %v4913_v36 }
  0x94   : > { %4552 = vmatprep.subr.bf16.mxu1 %v4917_v39 }
  0x95   : > { %1049 = vmatpush1.bf16.msra.mxu0 %v4914_v37 }
  0x96   : > { %1050 = vmatprep.subr.bf16.mxu0 %v4915_v38 }
  0x97   : > { %4553 = vmatpush3.bf16.msra.mxu1 %v4917_v39 }
  0x98   : > { %4554 = vmatprep.subr.bf16.mxu1 %v4921_v42 }
  0x99   : > { %1051 = vmatpush1.bf16.msra.mxu0 %v4918_v40 }
  0x9a   : > { %1052 = vmatprep.subr.bf16.mxu0 %v4919_v41 }
  0x9b   : > { %4555 = vmatpush3.bf16.msra.mxu1 %v4921_v42 }
  0x9c   : > { %4556 = vmatprep.subr.bf16.mxu1 %v4925_v46 }
  0x9d   : > { %1053 = vmatpush1.bf16.msra.mxu0 %v4922_v44 }
  0x9e   : > { %1054 = vmatprep.subr.bf16.mxu0 %v4923_v45 }
  0x9f   : > { %4557 = vmatpush3.bf16.msra.mxu1 %v4925_v46 }
  0xa0   : > { %4558 = vmatprep.subr.bf16.mxu1 %v4927_v48 }
  0xa1   : > { %1055 = vmatpush1.bf16.msra.mxu0 %v4926_v47 }
  0xa3   : > { %4559 = vmatpush3.bf16.msra.mxu1 %v4927_v48 }
 0x116   : > { %v797_v12 = vpop.xlane.xlu0 %796 }
 0x117   : > { %v801_v13 = vpop.xlane.xlu1 %800  ;;  %v805_v14 = vmul.f32 0.0078125, %v797_v12 }
 0x118   : > { %v807_v15 = vmul.f32 0.0078125, %v801_v13 }
 0x119   : > { %v5604_v16 = vsub.f32 %v790_v4, %v805_v14  ;;  %v4254_v4 = vld [vmem:[%s6316_s16] ss:$0 sm:$0xff] }
 0x11a   : > { %v5606_v17 = vsub.f32 %v792_v5, %v807_v15  ;;  %v799_v18 = vpop.xlane.xlu0 %798 }
 0x11b   : > { %v803_v19 = vpop.xlane.xlu1 %802  ;;  %v806_v20 = vmul.f32 0.0078125, %v799_v18  ;;  %v813_v21 = vmul.f32 %v5604_v16, %v5604_v16  ;;  %v897_v18 = vlaneseq }
 0x11c   : > { %v808_v22 = vmul.f32 0.0078125, %v803_v19  ;;  %v815_v25 = vmul.f32 %v5606_v17, %v5606_v17 }
 0x11d   : > { %v5610_v23 = vsub.f32 %v791_v6, %v806_v20  ;;  %817 = vadd.xlane.f32.xlu0 %v813_v21  ;;  %v5662_v19 = vshrl.u32 %v897_v18, 7  ;;  %v895_v21 = vld [vmem:[%s5551_s22] sm:$0x7] }
 0x11e   : > { %v5612_v24 = vsub.f32 %v793_v7, %v808_v22 }
 0x11f   : > { %v814_v26 = vmul.f32 %v5610_v23, %v5610_v23  ;;  %v903_v20 = vsub.s32 1, %v5662_v19  ;;  %v899_v22 = vsub.s32 0, %v5662_v19 }
 0x120   : > { %v816_v27 = vmul.f32 %v5612_v24, %v5612_v24 }
 0x121   : > { %821 = vadd.xlane.f32.xlu0 %v815_v25  ;;  %819 = vadd.xlane.f32.xlu1 %v814_v26  ;;  %v900_v25 = vrot.slane %v895_v21, %v899_v22 }
 0x125   : > { %823 = vadd.xlane.f32.xlu1 %v816_v27 }
 0x1aa   : > { %v818_v49 = vpop.xlane.xlu0 %817 }
 0x1ab   : > { %v825_v50 = vmul.f32 0.0078125, %v818_v49 }
 0x1ad   : > { %v829_v51 = vadd.f32 1e-05, %v825_v50 }
 0x1ae   : > { %v820_v52 = vpop.xlane.xlu1 %819  ;;  %v822_v53 = vpop.xlane.xlu0 %821 }
 0x1af   : > { %5016 = vrsqrt.f32 %v829_v51  ;;  %v826_v54 = vmul.f32 0.0078125, %v820_v52  ;;  %v827_v55 = vmul.f32 0.0078125, %v822_v53 }
 0x1b1   : > { %v830_v56 = vadd.f32 1e-05, %v826_v54  ;;  %v831_v57 = vadd.f32 1e-05, %v827_v55 }
 0x1b2   : > { %v824_v58 = vpop.xlane.xlu1 %823 }
 0x1b3   : > { %5018 = vrsqrt.f32 %v830_v56  ;;  %v828_v59 = vmul.f32 0.0078125, %v824_v58 }
 0x1b4   : > { %5020 = vrsqrt.f32 %v831_v57 }
 0x1b5   : > { %v832_v60 = vadd.f32 1e-05, %v828_v59 }
 0x1b7   : > { %5022 = vrsqrt.f32 %v832_v60 }
 0x1b9   : > { %v5017_v61 = vpop.eup %5016 }
 0x1ba   : > { %v837_v62 = vmul.f32 %v5017_v61, %v5604_v16 }
 0x1bc   : > { %v847_v3 = vmul.f32 %v4253_v63, %v837_v62 }
 0x1bd   : > { %v5019_v0 = vpop.eup %5018 }
 0x1be   : > { %v5021_v1 = vpop.eup %5020  ;;  %v838_v2 = vmul.f32 %v5019_v0, %v5610_v23  ;;  %v857_v8 = vadd.f32 %v4254_v4, %v847_v3  ;;  %v907_v23 = vsub.s32 2, %v5662_v19 }
 0x1bf   : > { %v839_v5 = vmul.f32 %v5021_v1, %v5606_v17  ;;  %v5279_v17 = vmov 0.0  }
 0x1c0   : > { %v848_v6 = vmul.f32 %v4253_v63, %v838_v2  ;;  %4564 = vmatprep.subr.bf16.mxu0 %v5279_v17  ;;  %4576 = vmatprep.subr.bf16.mxu1 %v5279_v17  ;;  %v908_v28 = vrot.slane %v895_v21, %v907_v23 }
 0x1c1   : > { %v5023_v7 = vpop.eup %5022  ;;  %v849_v11 = vmul.f32 %v4253_v63, %v839_v5 }
 0x1c2   : > { %v858_v9 = vadd.f32 %v4254_v4, %v848_v6  ;;  %v840_v10 = vmul.f32 %v5023_v7, %v5612_v24  ;;  %v904_v24 = vrot.slane %v895_v21, %v903_v20 }
 0x1c3   : > { %v859_v14 = vadd.f32 %v4254_v4, %v849_v11 }
 0x1c4   : > { %v861_v12 = vpack.c.bf16 %v858_v9, %v857_v8  ;;  %v850_v13 = vmul.f32 %v4253_v63, %v840_v10  ;;  %v5735_v8 = vld [vmem:[%s6317_s26] sm:$0xff] }
 0x1c6   : > { %1073 = vmatmul.mubr.bf16.vlgmr.msra.gmra.mrb[0].mxu0 %v861_v12  ;;  %4560 = vmatprep.mubr.bf16.mxu1 %v861_v12  ;;  %v860_v15 = vadd.f32 %v4254_v4, %v850_v13 }
 0x1c7   : > { %1082 = vmatprep.mubr.bf16.mxu0 %v5278_v43 }
 0x1c8   : > { %v862_v16 = vpack.c.bf16 %v860_v15, %v859_v14 }
 0x1ca   : > { %4561 = vmatmul.mubr.bf16.vlgmr.msra.gmra.mrb[0].mxu1 %v862_v16 }
 0x1cb   : > { %4578 = vmatprep.mubr.msk.bf16.mxu1 %vm5280_vm0, %v5279_v17 }
 0x1ce   : > { %1083 = vmatmul.mubr.bf16.gmra.mrb[4].mxu0 %v862_v16 }
 0x1cf   : > { %4566 = vmatprep.mubr.msk.bf16.mxu0 %vm5280_vm0, %v5279_v17 }
 0x299   : > { %v1074_v26 = vpop.f32.mrb[0].mxu0 }
 0x29a   : > { %v1076_v27 = vpop.f32.mrb[1].mxu0  ;;  %v1075_v32 = vadd.f32 %v1074_v26, %v900_v25 }
 0x29b   : > { %v1077_v29 = vadd.f32 %v1076_v27, %v904_v24  ;;  %v1078_v30 = vpop.f32.mrb[2].mxu0 }
 0x29c   : > { %v1080_v31 = vpop.f32.mrb[3].mxu0  ;;  %v1142_v42 = vmul.f32 0.17677669, %v1075_v32  ;;  %v1079_v51 = vadd.f32 %v1078_v30, %v900_v25 }
 0x29d   : > { %v5674_v33 = vpack.c.bf16 %v1077_v29, %v1077_v29  ;;  %v4562_v34 = vpop.f32.mrb[0].mxu1  ;;  %v1081_v37 = vadd.f32 %v1080_v31, %v904_v24 }
 0x29e   : > { %v5676_v35 = vadd.f32 %v4562_v34, %v908_v28  ;;  %v1127_v36 = vpop.f32.mrb[1].mxu1  ;;  %v5685_v50 = vpack.c.bf16 %v1142_v42, %v1142_v42  ;;  %v1143_v58 = vmul.f32 0.17677669, %v1079_v51 }
 0x29f   : > { %v4563_v38 = vpop.f32.mrb[2].mxu1  ;;  %v1164_v39 = vsel %vm1159_vm1, %v5674_v33, 0  ;;  %v5683_v46 = vpack.c.bf16 %v1081_v37, %v1081_v37  ;;  %v1128_v54 = vadd.f32 %v1127_v36, %v908_v28 }
 0x2a0   : > { %v5680_v40 = vadd.f32 %v4563_v38, %v908_v28  ;;  %v1130_v41 = vpop.f32.mrb[3].mxu1  ;;  %4565 = vmatpush3.bf16.xpose.msra.mxu0 %v1164_v39  ;;  %v5703_v62 = vpack.c.bf16 %v1143_v58, %v1143_v58 }
 0x2a1   : > { %v1084_v44 = vpop.f32.mrb[4].mxu0  ;;  %4570 = vmatprep.subr.bf16.mxu0 %v5279_v17  ;;  %v1210_v56 = vsel %vm1159_vm1, %v5683_v46, 0  ;;  %v5699_v60 = vpack.c.bf16 %v1128_v54, %v1128_v54  ;;  %v1131_v1 = vadd.f32 %v1130_v41, %v908_v28 }
 0x2a2   : > { %v1086_v45 = vpop.f32.mrb[5].mxu0  ;;  %v1085_v52 = vadd.f32 %v1084_v44, %v900_v25 }
 0x2a3   : > { %v1087_v47 = vadd.f32 %v1086_v45, %v904_v24  ;;  %v1088_v48 = vpop.f32.mrb[6].mxu0  ;;  %v1398_v3 = vsel %vm1396_vm2, %v5699_v60, 0  ;;  %v5721_v5 = vpack.c.bf16 %v1131_v1, %v1131_v1 }
 0x2a4   : > { %v1090_v49 = vpop.f32.mrb[7].mxu0  ;;  %v1144_v59 = vmul.f32 0.17677669, %v1085_v52  ;;  %v1089_v0 = vadd.f32 %v1088_v48, %v900_v25 }
 0x2a5   : > { %v5687_v53 = vpack.c.bf16 %v1087_v47, %v1087_v47  ;;  %v1091_v55 = vadd.f32 %v1090_v49, %v904_v24  ;;  %v1444_v7 = vsel %vm1396_vm2, %v5721_v5, 0 }
 0x2a6   : > { %v5705_v63 = vpack.c.bf16 %v1144_v59, %v1144_v59  ;;  %v1145_v4 = vmul.f32 0.17677669, %v1089_v0 }
 0x2a7   : > { %4567 = vmatmul.mubr.msk.bf16.vlgmr.msra.gmra.mrb[8].mxu0 %vm1159_vm1, %v5685_v50  ;;  %v1256_v57 = vsel %vm1159_vm1, %v5687_v53, 0  ;;  %v5701_v61 = vpack.c.bf16 %v1091_v55, %v1091_v55 }
 0x2a8   : > { %4571 = vmatpush3.bf16.xpose.msra.mxu0 %v1210_v56  ;;  %4577 = vmatpush3.bf16.xpose.msra.mxu1 %v1256_v57  ;;  %v5723_v6 = vpack.c.bf16 %v1145_v4, %v1145_v4 }
 0x2a9   : > { %4572 = vmatprep.mubr.msk.bf16.mxu0 %vm5280_vm0, %v5279_v17  ;;  %4582 = vmatprep.subr.bf16.mxu0 %v5279_v17  ;;  %v1302_v2 = vsel %vm1159_vm1, %v5701_v61, 0 }
 0x2aa   : > { %4588 = vmatprep.subr.bf16.mxu1 %v5279_v17 }
 0x2af   : > { %4573 = vmatmul.mubr.msk.bf16.vlgmr.msra.gmra.mrb[12].mxu0 %vm1159_vm1, %v5703_v62  ;;  %4579 = vmatmul.mubr.msk.bf16.vlgmr.msra.gmra.mrb[4].mxu1 %vm1159_vm1, %v5705_v63 }
 0x2b0   : > { %4583 = vmatpush3.bf16.xpose.msra.mxu0 %v1302_v2  ;;  %4589 = vmatpush3.bf16.msra.mxu1 %v1398_v3 }
 0x2b1   : > { %4584 = vmatprep.mubr.msk.bf16.mxu0 %vm5280_vm0, %v5279_v17  ;;  %4594 = vmatprep.subr.bf16.mxu0 %v5279_v17 }
 0x2b2   : > { %4590 = vmatprep.mubr.msk.bf16.mxu1 %vm5280_vm0, %v5279_v17  ;;  %4600 = vmatprep.subr.bf16.mxu1 %v5279_v17 }
 0x2b7   : > { %4585 = vmatmul.mubr.msk.bf16.vlgmr.msra.gmra.mrb[16].mxu0 %vm1159_vm1, %v5723_v6 }
 0x2b8   : > { %4595 = vmatpush3.bf16.msra.mxu0 %v1444_v7  ;;  %4596 = vmatprep.mubr.msk.bf16.mxu0 %vm5280_vm0, %v5279_v17 }
 0x2b9   : > { %4606 = vmatprep.subr.bf16.mxu0 %v5279_v17 }
 0x37a   : > { %v1200_v9 = vpop.f32.mrb[8].mxu0 }
 0x37b   : > { %v1201_v10 = vadd.f32 %v1200_v9, %v5735_v8  ;;  %v4568_v11 = vpop.f32.mrb[9].mxu0 }
 0x37c   : > { %v1203_v12 = vpop.f32.mrb[10].mxu0 }
 0x37d   : > { %v4569_v13 = vpop.f32.mrb[11].mxu0  ;;  %v1345_v14 = vsel %vm1344_vm3, %v1201_v10, -inf  ;;  %v5767_v12 = vpack.c.bf16 %v5676_v35, %v5676_v35 }
 0x37e   : > { %1346 = vmax.xlane.f32.xlu0 %v1345_v14 }
 0x382   : > { %v1246_v15 = vpop.f32.mrb[12].mxu0  ;;  %v1292_v16 = vpop.f32.mrb[4].mxu1 }
 0x383   : > { %v1247_v18 = vadd.f32 %v1246_v15, %v5735_v8  ;;  %v1293_v21 = vadd.f32 %v1292_v16, %v5735_v8  ;;  %v4574_v24 = vpop.f32.mrb[13].mxu0  ;;  %v4580_v25 = vpop.f32.mrb[5].mxu1  ;;  %v1490_v15 = vsel %vm1396_vm2, %v5767_v12, 0 }
 0x384   : > { %v1249_v26 = vpop.f32.mrb[14].mxu0  ;;  %v1295_v27 = vpop.f32.mrb[6].mxu1 }
 0x385   : > { %v4575_v28 = vpop.f32.mrb[15].mxu0  ;;  %v4581_v29 = vpop.f32.mrb[7].mxu1  ;;  %v1348_v30 = vsel %vm1344_vm3, %v1247_v18, -inf  ;;  %v1351_v31 = vsel %vm1344_vm3, %v1293_v21, -inf }
 0x386   : > { %1349 = vmax.xlane.f32.xlu1 %v1348_v30  ;;  %1352 = vmax.xlane.f32.xlu0 %v1351_v31 }
 0x38a   : > { %v1338_v32 = vpop.f32.mrb[16].mxu0 }
 0x38b   : > { %v1339_v34 = vadd.f32 %v1338_v32, %v5735_v8  ;;  %v4586_v36 = vpop.f32.mrb[17].mxu0 }
 0x38c   : > { %v1341_v37 = vpop.f32.mrb[18].mxu0 }
 0x38d   : > { %v4587_v38 = vpop.f32.mrb[19].mxu0  ;;  %v1354_v39 = vsel %vm1344_vm3, %v1339_v34, -inf }
 0x38e   : > { %1355 = vmax.xlane.f32.xlu1 %v1354_v39 }
 0x40b   : > { %v1347_v41 = vpop.xlane.xlu0 %1346 }
 0x40c   : > { %v1357_v42 = vsub.f32 %v1201_v10, %v1347_v41 }
 0x40e   : > { %v1361_v44 = vmul.f32 1.442695, %v1357_v42 }
 0x410   : > { %5024 = vpow2.f32 %v1361_v44 }
 0x413   : > { %v1350_v45 = vpop.xlane.xlu1 %1349  ;;  %v1353_v47 = vpop.xlane.xlu0 %1352 }
 0x414   : > { %v1358_v48 = vsub.f32 %v1247_v18, %v1350_v45  ;;  %v1359_v49 = vsub.f32 %v1293_v21, %v1353_v47  ;;  %v5777_v21 = vpack.c.bf16 %v5680_v40, %v5680_v40 }
 0x416   : > { %v1363_v51 = vmul.f32 1.442695, %v1358_v48  ;;  %v1365_v52 = vmul.f32 1.442695, %v1359_v49  ;;  %v1536_v28 = vsel %vm1396_vm2, %v5777_v21, 0 }
 0x418   : > { %5026 = vpow2.f32 %v1363_v51 }
 0x419   : > { %5028 = vpow2.f32 %v1365_v52 }
 0x41a   : > { %v5025_v54 = vpop.eup %5024 }
 0x41b   : > { %v1369_v55 = vsel %vm1344_vm3, %v5025_v54, 0.0  ;;  %v1356_v0 = vpop.xlane.xlu1 %1355 }
 0x41c   : > { %1370 = vadd.xlane.f32.xlu0 %v1369_v55  ;;  %v1360_v1 = vsub.f32 %v1339_v34, %v1356_v0 }
 0x41e   : > { %v1367_v2 = vmul.f32 1.442695, %v1360_v1 }
 0x420   : > { %5030 = vpow2.f32 %v1367_v2 }
 0x422   : > { %v5027_v56 = vpop.eup %5026 }
 0x423   : > { %v5029_v57 = vpop.eup %5028  ;;  %v1372_v58 = vsel %vm1344_vm3, %v5027_v56, 0.0 }
 0x424   : > { %1373 = vadd.xlane.f32.xlu1 %v1372_v58  ;;  %v1375_v59 = vsel %vm1344_vm3, %v5029_v57, 0.0 }
 0x425   : > { %1376 = vadd.xlane.f32.xlu0 %v1375_v59 }
 0x42a   : > { %v5031_v3 = vpop.eup %5030 }
 0x42b   : > { %v1378_v4 = vsel %vm1344_vm3, %v5031_v3, 0.0 }
 0x435   : > { %1634 = vrot.lane.b32.xlu1 %v5683_v46, %s5281_s2 }
 0x439   : > { %1579 = vrot.lane.b32.xlu1 %v5685_v50, %s5281_s2 }
 0x43b   : > { %1582 = vrot.lane.b32.xlu0 %v5674_v33, %s5281_s2 }
 0x43f   : > { %1686 = vrot.lane.b32.xlu0 %v5687_v53, %s5281_s2 }
 0x443   : > { %1683 = vrot.lane.b32.xlu0 %v5705_v63, %s5281_s2 }
 0x45d   : > { %1379 = vadd.xlane.f32.xlu1 %v1378_v4 }
 0x46e   : > { %1631 = vrot.lane.b32.xlu1 %v5703_v62, %s5281_s2 }
 0x472   : > { %1738 = vrot.lane.b32.xlu1 %v5701_v61, %s5281_s2 }
 0x476   : > { %1735 = vrot.lane.b32.xlu1 %v5723_v6, %s5281_s2 }
 0x4a9   : > { %v1371_v7 = vpop.xlane.xlu0 %1370 }
 0x4aa   : > { %5032 = vrcp.f32 %v1371_v7 }
 0x4b1   : > { %v1374_v9 = vpop.xlane.xlu1 %1373 }
 0x4b2   : > { %5034 = vrcp.f32 %v1374_v9  ;;  %v1377_v10 = vpop.xlane.xlu0 %1376 }
 0x4b3   : > { %5036 = vrcp.f32 %v1377_v10 }
 0x4b4   : > { %v5033_v11 = vpop.eup %5032 }
 0x4b5   : > { %v1385_v13 = vmul.f32 %v5033_v11, %v5025_v54  ;;  %v1635_v30 = vpop.permute.xlu1 %1634 }
 0x4b6   : > { %v1583_v25 = vpop.permute.xlu0 %1582  ;;  %v1640_v42 = vsel %vm1159_vm1, %v1635_v30, 0 }
 0x4b7   : > { %v1389_v14 = vpack.c.bf16 %v1385_v13, %v1385_v13  ;;  %v1588_v29 = vsel %vm1159_vm1, %v1583_v25, 0 }
 0x4b9   : > { %4591 = vmatmul.mubr.msk.bf16.vlgmr.msra.gmra.mrb[8].mxu1 %vm1344_vm3, %v1389_v14  ;;  %v1580_v31 = vpop.permute.xlu1 %1579 }
 0x4ba   : > { %4601 = vmatpush3.bf16.msra.mxu1 %v1490_v15  ;;  %4602 = vmatprep.mubr.msk.bf16.mxu1 %vm5280_vm0, %v5279_v17  ;;  %v1687_v40 = vpop.permute.xlu0 %1686 }
 0x4bb   : > { %4612 = vmatprep.subr.bf16.mxu1 %v5279_v17  ;;  %v1692_v32 = vsel %vm1159_vm1, %v1687_v40, 0 }
 0x4bc   : > { %v5035_v16 = vpop.eup %5034 }
 0x4bd   : > { %v5037_v18 = vpop.eup %5036  ;;  %v1386_v35 = vmul.f32 %v5035_v16, %v5027_v56 }
 0x4be   : > { %v1387_v24 = vmul.f32 %v5037_v18, %v5029_v57  ;;  %v1684_v34 = vpop.permute.xlu0 %1683 }
 0x4bf   : > { %v1390_v26 = vpack.c.bf16 %v1386_v35, %v1386_v35 }
 0x4c0   : > { %v1391_v27 = vpack.c.bf16 %v1387_v24, %v1387_v24 }
 0x4c1   : > { %4597 = vmatmul.mubr.msk.bf16.vlgmr.msra.gmra.mrb[20].mxu0 %vm1344_vm3, %v1390_v26 }
 0x4c2   : > { %4603 = vmatmul.mubr.msk.bf16.vlgmr.msra.gmra.mrb[12].mxu1 %vm1344_vm3, %v1391_v27  ;;  %4607 = vmatpush3.bf16.msra.mxu0 %v1536_v28 }
 0x4c3   : > { %4613 = vmatpush3.bf16.xpose.msra.mxu1 %v1588_v29  ;;  %4614 = vmatprep.mubr.msk.bf16.mxu1 %vm5280_vm0, %v5279_v17 }
 0x4c4   : > { %4624 = vmatprep.subr.bf16.mxu1 %v5279_v17  ;;  %4608 = vmatprep.mubr.msk.bf16.mxu0 %vm5280_vm0, %v5279_v17 }
 0x4c5   : > { %4618 = vmatprep.subr.bf16.mxu0 %v5279_v17 }
 0x4ca   : > { %4615 = vmatmul.mubr.msk.bf16.vlgmr.msra.gmra.mrb[16].mxu1 %vm1159_vm1, %v1580_v31 }
 0x4cb   : > { %4625 = vmatpush3.bf16.xpose.msra.mxu1 %v1692_v32  ;;  %4626 = vmatprep.mubr.msk.bf16.mxu1 %vm5280_vm0, %v5279_v17 }
 0x4cc   : > { %4636 = vmatprep.subr.bf16.mxu1 %v5279_v17 }
 0x4d2   : > { %4627 = vmatmul.mubr.msk.bf16.vlgmr.msra.gmra.mrb[20].mxu1 %vm1159_vm1, %v1684_v34 }
 0x4d3   : > { %4638 = vmatprep.mubr.msk.bf16.mxu1 %vm5280_vm0, %v5279_v17 }
 0x4ea   : > { %v1380_v36 = vpop.xlane.xlu1 %1379 }
 0x4eb   : > { %5038 = vrcp.f32 %v1380_v36 }
 0x4ee   : > { %v1632_v41 = vpop.permute.xlu1 %1631 }
 0x4f2   : > { %v1739_v44 = vpop.permute.xlu1 %1738 }
 0x4f3   : > { %v1744_v45 = vsel %vm1159_vm1, %v1739_v44, 0 }
 0x4f5   : > { %v5039_v37 = vpop.eup %5038 }
 0x4f6   : > { %v1388_v38 = vmul.f32 %v5039_v37, %v5031_v3  ;;  %v1736_v47 = vpop.permute.xlu1 %1735 }
 0x4f8   : > { %v1392_v39 = vpack.c.bf16 %v1388_v38, %v1388_v38 }
 0x4fa   : > { %4609 = vmatmul.mubr.msk.bf16.vlgmr.msra.gmra.mrb[24].mxu0 %vm1344_vm3, %v1392_v39 }
 0x4fb   : > { %4619 = vmatpush3.bf16.xpose.msra.mxu0 %v1640_v42  ;;  %4620 = vmatprep.mubr.msk.bf16.mxu0 %vm5280_vm0, %v5279_v17 }
 0x4fc   : > { %4630 = vmatprep.subr.bf16.mxu0 %v5279_v17 }
 0x502   : > { %4621 = vmatmul.mubr.msk.bf16.vlgmr.msra.gmra.mrb[28].mxu0 %vm1159_vm1, %v1632_v41 }
 0x503   : > { %4631 = vmatpush3.bf16.xpose.msra.mxu0 %v1744_v45  ;;  %4632 = vmatprep.mubr.msk.bf16.mxu0 %vm5280_vm0, %v5279_v17 }
 0x504   : > { %4642 = vmatprep.subr.bf16.mxu0 %v5279_v17 }
 0x50a   : > { %4633 = vmatmul.mubr.msk.bf16.vlgmr.msra.gmra.mrb[32].mxu0 %vm1159_vm1, %v1736_v47 }
 0x50b   : > { %4644 = vmatprep.mubr.msk.bf16.mxu0 %vm5280_vm0, %v5279_v17 }
 0x58c   : > { %v5811_v48 = vpop.f32.mrb[8].mxu1 }
 0x58d   : > { %v4592_v49 = vpop.f32.mrb[9].mxu1 }
 0x58e   : > { %v1437_v51 = vpop.f32.mrb[10].mxu1 }
 0x58f   : > { %v4593_v52 = vpop.f32.mrb[11].mxu1 }
 0x594   : > { %v5813_v54 = vpop.f32.mrb[20].mxu0 }
 0x595   : > { %v5815_v55 = vpop.f32.mrb[12].mxu1  ;;  %v4598_v56 = vpop.f32.mrb[21].mxu0 }
 0x596   : > { %v4604_v57 = vpop.f32.mrb[13].mxu1  ;;  %v1483_v58 = vpop.f32.mrb[22].mxu0 }
 0x597   : > { %v1529_v59 = vpop.f32.mrb[14].mxu1  ;;  %v4599_v0 = vpop.f32.mrb[23].mxu0 }
 0x598   : > { %v4605_v1 = vpop.f32.mrb[15].mxu1 }
 0x59d   : > { %v1624_v2 = vpop.f32.mrb[16].mxu1 }
 0x59e   : > { %v1625_v3 = vadd.f32 %v1624_v2, %v5735_v8  ;;  %v4616_v4 = vpop.f32.mrb[17].mxu1 }
 0x59f   : > { %v1627_v7 = vpop.f32.mrb[18].mxu1 }
 0x5a0   : > { %v4617_v9 = vpop.f32.mrb[19].mxu1  ;;  %v1786_v10 = vsel %vm1344_vm3, %v1625_v3, -inf }
 0x5a1   : > { %1787 = vmax.xlane.f32.xlu0 %v1786_v10 }
 0x5a5   : > { %v1728_v11 = vpop.f32.mrb[20].mxu1 }
 0x5a6   : > { %v1729_v13 = vadd.f32 %v1728_v11, %v5735_v8  ;;  %v4628_v14 = vpop.f32.mrb[21].mxu1 }
 0x5a7   : > { %v1731_v15 = vpop.f32.mrb[22].mxu1 }
 0x5a8   : > { %v4629_v16 = vpop.f32.mrb[23].mxu1  ;;  %v1792_v18 = vsel %vm1344_vm3, %v1729_v13, -inf }
 0x5a9   : > { %1793 = vmax.xlane.f32.xlu0 %v1792_v18 }
 0x5cd   : > { %v5821_v35 = vpop.f32.mrb[24].mxu0 }
 0x5ce   : > { %v4610_v24 = vpop.f32.mrb[25].mxu0 }
 0x5cf   : > { %v1575_v25 = vpop.f32.mrb[26].mxu0 }
 0x5d0   : > { %v4611_v26 = vpop.f32.mrb[27].mxu0 }
 0x5d5   : > { %v1676_v27 = vpop.f32.mrb[28].mxu0 }
 0x5d6   : > { %v1677_v28 = vadd.f32 %v1676_v27, %v5735_v8  ;;  %v4622_v29 = vpop.f32.mrb[29].mxu0 }
 0x5d7   : > { %v1679_v30 = vpop.f32.mrb[30].mxu0 }
 0x5d8   : > { %v4623_v40 = vpop.f32.mrb[31].mxu0  ;;  %v1789_v31 = vsel %vm1344_vm3, %v1677_v28, -inf }
 0x5d9   : > { %1790 = vmax.xlane.f32.xlu1 %v1789_v31 }
 0x5dd   : > { %v1780_v32 = vpop.f32.mrb[32].mxu0 }
 0x5de   : > { %v1781_v34 = vadd.f32 %v1780_v32, %v5735_v8  ;;  %v4634_v36 = vpop.f32.mrb[33].mxu0 }
 0x5df   : > { %v1783_v37 = vpop.f32.mrb[34].mxu0 }
 0x5e0   : > { %v4635_v38 = vpop.f32.mrb[35].mxu0  ;;  %v1795_v39 = vsel %vm1344_vm3, %v1781_v34, -inf }
 0x5e1   : > { %1796 = vmax.xlane.f32.xlu0 %v1795_v39 }
 0x5ea   : > { %1884 = vrot.lane.b32.xlu1 %v5721_v5, %s5281_s2 }
 0x5ee   : > { %1933 = vrot.lane.b32.xlu1 %v5767_v12, %s5281_s2 }
 0x5f2   : > { %1982 = vrot.lane.b32.xlu1 %v5777_v21, %s5281_s2 }
 0x62e   : > { %v1788_v41 = vpop.xlane.xlu0 %1787 }
 0x62f   : > { %v1798_v42 = vsub.f32 %v1625_v3, %v1788_v41 }
 0x631   : > { %v1802_v44 = vmul.f32 1.442695, %v1798_v42 }
 0x633   : > { %5040 = vpow2.f32 %v1802_v44 }
 0x636   : > { %v1794_v49 = vpop.xlane.xlu0 %1793 }
 0x637   : > { %v1800_v51 = vsub.f32 %v1729_v13, %v1794_v49 }
 0x639   : > { %v1806_v52 = vmul.f32 1.442695, %v1800_v51 }
 0x63b   : > { %5042 = vpow2.f32 %v1806_v52 }
 0x63d   : > { %v5041_v45 = vpop.eup %5040 }
 0x63e   : > { %v1810_v47 = vsel %vm1344_vm3, %v5041_v45, 0.0 }
 0x63f   : > { %1811 = vadd.xlane.f32.xlu0 %v1810_v47 }
 0x645   : > { %v5043_v1 = vpop.eup %5042 }
 0x646   : > { %v1816_v2 = vsel %vm1344_vm3, %v5043_v1, 0.0 }
 0x655   : > { %1835 = vrot.lane.b32.xlu0 %v5699_v60, %s5281_s2 }
 0x666   : > { %v1791_v56 = vpop.xlane.xlu1 %1790 }
 0x667   : > { %v1799_v57 = vsub.f32 %v1677_v28, %v1791_v56 }
 0x669   : > { %v1804_v58 = vmul.f32 1.442695, %v1799_v57 }
 0x66a   : > { %v1885_v59 = vpop.permute.xlu1 %1884 }
 0x66b   : > { %5044 = vpow2.f32 %v1804_v58  ;;  %v1890_v0 = vsel %vm1396_vm2, %v1885_v59, 0 }
 0x66c   : > { %4643 = vmatpush3.bf16.msra.mxu0 %v1890_v0 }
 0x66d   : > { %4654 = vmatprep.subr.bf16.mxu0 %v5279_v17 }
 0x66e   : > { %v1797_v7 = vpop.xlane.xlu0 %1796  ;;  %v1934_v25 = vpop.permute.xlu1 %1933 }
 0x66f   : > { %v1801_v9 = vsub.f32 %v1781_v34, %v1797_v7  ;;  %v1939_v27 = vsel %vm1396_vm2, %v1934_v25, 0 }
 0x671   : > { %v1808_v10 = vmul.f32 1.442695, %v1801_v9 }
 0x672   : > { %v1983_v28 = vpop.permute.xlu1 %1982 }
 0x673   : > { %5046 = vpow2.f32 %v1808_v10  ;;  %v1988_v42 = vsel %vm1396_vm2, %v1983_v28, 0 }
 0x674   : > { %1817 = vadd.xlane.f32.xlu0 %v1816_v2 }
 0x675   : > { %v5045_v3 = vpop.eup %5044 }
 0x676   : > { %v1813_v4 = vsel %vm1344_vm3, %v5045_v3, 0.0 }
 0x677   : > { %1814 = vadd.xlane.f32.xlu1 %v1813_v4 }
 0x67d   : > { %v5047_v11 = vpop.eup %5046 }
 0x67e   : > { %v1819_v13 = vsel %vm1344_vm3, %v5047_v11, 0.0 }
 0x688   : > { %2082 = vrot.lane.b32.xlu1 %v5683_v46, %s5282_s28 }
 0x68a   : > { %2032 = vrot.lane.b32.xlu0 %v5674_v33, %s5282_s28 }
 0x68e   : > { %2030 = vrot.lane.b32.xlu0 %v5685_v50, %s5282_s28 }
 0x692   : > { %2132 = vrot.lane.b32.xlu0 %v5687_v53, %s5282_s28 }
 0x696   : > { %2130 = vrot.lane.b32.xlu0 %v5705_v63, %s5282_s28 }
 0x6ac   : > { %1820 = vadd.xlane.f32.xlu1 %v1819_v13 }
 0x6bd   : > { %2080 = vrot.lane.b32.xlu1 %v5703_v62, %s5282_s28 }
 0x6c1   : > { %2182 = vrot.lane.b32.xlu1 %v5701_v61, %s5282_s28 }
 0x6c5   : > { %2180 = vrot.lane.b32.xlu1 %v5723_v6, %s5282_s28 }
 0x6cc   : > { %v1812_v14 = vpop.xlane.xlu0 %1811 }
 0x6cd   : > { %5048 = vrcp.f32 %v1812_v14 }
 0x6d0   : > { %v1836_v15 = vpop.permute.xlu0 %1835 }
 0x6d1   : > { %v1841_v16 = vsel %vm1396_vm2, %v1836_v15, 0 }
 0x6d2   : > { %4637 = vmatpush3.bf16.msra.mxu1 %v1841_v16 }
 0x6d3   : > { %4648 = vmatprep.subr.bf16.mxu1 %v5279_v17 }
 0x6d7   : > { %v5049_v18 = vpop.eup %5048 }
 0x6d8   : > { %v1826_v24 = vmul.f32 %v5049_v18, %v5041_v45 }
 0x6da   : > { %v1830_v26 = vpack.c.bf16 %v1826_v24, %v1826_v24 }
 0x6dc   : > { %4639 = vmatmul.mubr.msk.bf16.vlgmr.msra.gmra.mrb[24].mxu1 %vm1344_vm3, %v1830_v26 }
 0x6dd   : > { %4649 = vmatpush3.bf16.msra.mxu1 %v1939_v27  ;;  %4650 = vmatprep.mubr.msk.bf16.mxu1 %vm5280_vm0, %v5279_v17 }
 0x6de   : > { %4660 = vmatprep.subr.bf16.mxu1 %v5279_v17 }
 0x701   : > { %v1818_v29 = vpop.xlane.xlu0 %1817 }
 0x702   : > { %5050 = vrcp.f32 %v1818_v29 }
 0x704   : > { %v1815_v30 = vpop.xlane.xlu1 %1814 }
 0x705   : > { %5052 = vrcp.f32 %v1815_v30  ;;  %v2033_v40 = vpop.permute.xlu0 %2032 }
 0x706   : > { %v2038_v39 = vsel %vm1159_vm1, %v2033_v40, 0 }
 0x708   : > { %v2083_v49 = vpop.permute.xlu1 %2082 }
 0x709   : > { %v2031_v38 = vpop.permute.xlu0 %2030  ;;  %v2088_v59 = vsel %vm1159_vm1, %v2083_v49, 0 }
 0x70c   : > { %v5051_v31 = vpop.eup %5050 }
 0x70d   : > { %v1828_v32 = vmul.f32 %v5051_v31, %v5043_v1  ;;  %v2133_v44 = vpop.permute.xlu0 %2132 }
 0x70e   : > { %v2138_v45 = vsel %vm1159_vm1, %v2133_v44, 0 }
 0x70f   : > { %v5053_v34 = vpop.eup %5052  ;;  %v1832_v36 = vpack.c.bf16 %v1828_v32, %v1828_v32 }
 0x710   : > { %v1827_v37 = vmul.f32 %v5053_v34, %v5045_v3 }
 0x711   : > { %4651 = vmatmul.mubr.msk.bf16.vlgmr.msra.gmra.mrb[28].mxu1 %vm1344_vm3, %v1832_v36  ;;  %v2131_v47 = vpop.permute.xlu0 %2130 }
 0x712   : > { %4661 = vmatpush3.bf16.xpose.msra.mxu1 %v2038_v39  ;;  %v1831_v41 = vpack.c.bf16 %v1827_v37, %v1827_v37  ;;  %4662 = vmatprep.mubr.msk.bf16.mxu1 %vm5280_vm0, %v5279_v17 }
 0x713   : > { %4672 = vmatprep.subr.bf16.mxu1 %v5279_v17 }
 0x714   : > { %4645 = vmatmul.mubr.msk.bf16.vlgmr.msra.gmra.mrb[36].mxu0 %vm1344_vm3, %v1831_v41 }
 0x715   : > { %4655 = vmatpush3.bf16.msra.mxu0 %v1988_v42  ;;  %4656 = vmatprep.mubr.msk.bf16.mxu0 %vm5280_vm0, %v5279_v17 }
 0x716   : > { %4666 = vmatprep.subr.bf16.mxu0 %v5279_v17 }
 0x719   : > { %4663 = vmatmul.mubr.msk.bf16.vlgmr.msra.gmra.mrb[32].mxu1 %vm1159_vm1, %v2031_v38 }
 0x71a   : > { %4673 = vmatpush3.bf16.xpose.msra.mxu1 %v2138_v45  ;;  %4674 = vmatprep.mubr.msk.bf16.mxu1 %vm5280_vm0, %v5279_v17 }
 0x71b   : > { %4684 = vmatprep.subr.bf16.mxu1 %v5279_v17 }
 0x721   : > { %4675 = vmatmul.mubr.msk.bf16.vlgmr.msra.gmra.mrb[36].mxu1 %vm1159_vm1, %v2131_v47 }
 0x722   : > { %4686 = vmatprep.mubr.msk.bf16.mxu1 %vm5280_vm0, %v5279_v17 }
 0x739   : > { %v1821_v51 = vpop.xlane.xlu1 %1820 }
 0x73a   : > { %5054 = vrcp.f32 %v1821_v51 }
 0x73d   : > { %v2081_v58 = vpop.permute.xlu1 %2080 }
 0x741   : > { %v2183_v0 = vpop.permute.xlu1 %2182 }
 0x742   : > { %v2188_v1 = vsel %vm1159_vm1, %v2183_v0, 0 }
 0x744   : > { %v5055_v52 = vpop.eup %5054 }
 0x745   : > { %v1829_v56 = vmul.f32 %v5055_v52, %v5047_v11  ;;  %v2181_v2 = vpop.permute.xlu1 %2180 }
 0x747   : > { %v1833_v57 = vpack.c.bf16 %v1829_v56, %v1829_v56 }
 0x749   : > { %4657 = vmatmul.mubr.msk.bf16.vlgmr.msra.gmra.mrb[40].mxu0 %vm1344_vm3, %v1833_v57 }
 0x74a   : > { %4667 = vmatpush3.bf16.xpose.msra.mxu0 %v2088_v59  ;;  %4668 = vmatprep.mubr.msk.bf16.mxu0 %vm5280_vm0, %v5279_v17 }
 0x74b   : > { %4678 = vmatprep.subr.bf16.mxu0 %v5279_v17 }
 0x751   : > { %4669 = vmatmul.mubr.msk.bf16.vlgmr.msra.gmra.mrb[44].mxu0 %vm1159_vm1, %v2081_v58 }
 0x752   : > { %4679 = vmatpush3.bf16.xpose.msra.mxu0 %v2188_v1  ;;  %4680 = vmatprep.mubr.msk.bf16.mxu0 %vm5280_vm0, %v5279_v17 }
 0x753   : > { %4690 = vmatprep.subr.bf16.mxu0 %v5279_v17 }
 0x759   : > { %4681 = vmatmul.mubr.msk.bf16.vlgmr.msra.gmra.mrb[48].mxu0 %vm1159_vm1, %v2181_v2 }
 0x75a   : > { %4692 = vmatprep.mubr.msk.bf16.mxu0 %vm5280_vm0, %v5279_v17 }
 0x7af   : > { %v5895_v3 = vpop.f32.mrb[24].mxu1 }
 0x7b0   : > { %v4640_v4 = vpop.f32.mrb[25].mxu1 }
 0x7b1   : > { %v1880_v7 = vpop.f32.mrb[26].mxu1 }
 0x7b2   : > { %v4641_v9 = vpop.f32.mrb[27].mxu1 }
 0x7e4   : > { %v5897_v10 = vpop.f32.mrb[28].mxu1 }
 0x7e5   : > { %v4652_v11 = vpop.f32.mrb[29].mxu1 }
 0x7e6   : > { %v1978_v13 = vpop.f32.mrb[30].mxu1 }
 0x7e7   : > { %v4653_v14 = vpop.f32.mrb[31].mxu1  ;;  %v5899_v15 = vpop.f32.mrb[36].mxu0 }
 0x7e8   : > { %v4866_v16 = vpack.i.bf16 %v5899_v15, %v5895_v3  ;;  %v4646_v18 = vpop.f32.mrb[37].mxu0 }
 0x7e9   : > { %v1929_v24 = vpop.f32.mrb[38].mxu0 }
 0x7ea   : > { %v4647_v25 = vpop.f32.mrb[39].mxu0 }
 0x7ec   : > { %v2074_v26 = vpop.f32.mrb[32].mxu1 }
 0x7ed   : > { %v2075_v27 = vadd.f32 %v2074_v26, %v5735_v8  ;;  %v4664_v28 = vpop.f32.mrb[33].mxu1 }
 0x7ee   : > { %v2077_v29 = vpop.f32.mrb[34].mxu1 }
 0x7ef   : > { %v4665_v30 = vpop.f32.mrb[35].mxu1  ;;  %v2230_v40 = vsel %vm1344_vm3, %v2075_v27, -inf }
 0x7f0   : > { %2231 = vmax.xlane.f32.xlu0 %v2230_v40 }
 0x7f4   : > { %v2174_v31 = vpop.f32.mrb[36].mxu1 }
 0x7f5   : > { %v2175_v32 = vadd.f32 %v2174_v31, %v5735_v8  ;;  %v4676_v34 = vpop.f32.mrb[37].mxu1 }
 0x7f6   : > { %v2177_v36 = vpop.f32.mrb[38].mxu1 }
 0x7f7   : > { %v4677_v37 = vpop.f32.mrb[39].mxu1  ;;  %v2236_v38 = vsel %vm1344_vm3, %v2175_v32, -inf }
 0x7f8   : > { %2237 = vmax.xlane.f32.xlu0 %v2236_v38 }
 0x81c   : > { %v5907_v39 = vpop.f32.mrb[40].mxu0 }
 0x81d   : > { %v4871_v41 = vpack.i.bf16 %v5907_v39, %v5897_v10  ;;  %v4658_v42 = vpop.f32.mrb[41].mxu0 }
 0x81e   : > { %v2027_v44 = vpop.f32.mrb[42].mxu0 }
 0x81f   : > { %v4659_v45 = vpop.f32.mrb[43].mxu0 }
 0x824   : > { %v2124_v47 = vpop.f32.mrb[44].mxu0 }
 0x825   : > { %v2125_v49 = vadd.f32 %v2124_v47, %v5735_v8  ;;  %v4670_v51 = vpop.f32.mrb[45].mxu0 }
 0x826   : > { %v2127_v52 = vpop.f32.mrb[46].mxu0 }
 0x827   : > { %v4671_v56 = vpop.f32.mrb[47].mxu0  ;;  %v2233_v57 = vsel %vm1344_vm3, %v2125_v49, -inf }
 0x828   : > { %2234 = vmax.xlane.f32.xlu1 %v2233_v57 }
 0x82c   : > { %v2224_v58 = vpop.f32.mrb[48].mxu0 }
 0x82d   : > { %v2225_v59 = vadd.f32 %v2224_v58, %v5735_v8  ;;  %v4682_v0 = vpop.f32.mrb[49].mxu0 }
 0x82e   : > { %v2227_v1 = vpop.f32.mrb[50].mxu0 }
 0x82f   : > { %v4683_v2 = vpop.f32.mrb[51].mxu0  ;;  %v2239_v4 = vsel %vm1344_vm3, %v2225_v59, -inf }
 0x830   : > { %2240 = vmax.xlane.f32.xlu0 %v2239_v4 }
 0x839   : > { %2326 = vrot.lane.b32.xlu1 %v5721_v5, %s5282_s28 }
 0x83d   : > { %2374 = vrot.lane.b32.xlu1 %v5767_v12, %s5282_s28 }
 0x841   : > { %2422 = vrot.lane.b32.xlu1 %v5777_v21, %s5282_s28 }
 0x87d   : > { %v2232_v7 = vpop.xlane.xlu0 %2231 }
 0x87e   : > { %v2242_v9 = vsub.f32 %v2075_v27, %v2232_v7 }
 0x880   : > { %v2246_v11 = vmul.f32 1.442695, %v2242_v9 }
 0x882   : > { %5056 = vpow2.f32 %v2246_v11 }
 0x885   : > { %v2238_v18 = vpop.xlane.xlu0 %2237 }
 0x886   : > { %v2244_v24 = vsub.f32 %v2175_v32, %v2238_v18 }
 0x888   : > { %v2250_v25 = vmul.f32 1.442695, %v2244_v24 }
 0x88a   : > { %5058 = vpow2.f32 %v2250_v25 }
 0x88c   : > { %v5057_v13 = vpop.eup %5056 }
 0x88d   : > { %v2254_v14 = vsel %vm1344_vm3, %v5057_v13, 0.0 }
 0x88e   : > { %2255 = vadd.xlane.f32.xlu0 %v2254_v14 }
 0x894   : > { %v5059_v40 = vpop.eup %5058 }
 0x895   : > { %v2260_v31 = vsel %vm1344_vm3, %v5059_v40, 0.0 }
 0x8a4   : > { %2278 = vrot.lane.b32.xlu0 %v5699_v60, %s5282_s28 }
 0x8b5   : > { %v2235_v26 = vpop.xlane.xlu1 %2234 }
 0x8b6   : > { %v2243_v28 = vsub.f32 %v2125_v49, %v2235_v26 }
 0x8b8   : > { %v2248_v29 = vmul.f32 1.442695, %v2243_v28 }
 0x8b9   : > { %v2327_v30 = vpop.permute.xlu1 %2326 }
 0x8ba   : > { %5060 = vpow2.f32 %v2248_v29  ;;  %v2332_v27 = vsel %vm1396_vm2, %v2327_v30, 0 }
 0x8bb   : > { %4691 = vmatpush3.bf16.msra.mxu0 %v2332_v27 }
 0x8bc   : > { %4702 = vmatprep.subr.bf16.mxu0 %v5279_v17 }
 0x8bd   : > { %v2241_v32 = vpop.xlane.xlu0 %2240  ;;  %v2375_v45 = vpop.permute.xlu1 %2374 }
 0x8be   : > { %v2245_v37 = vsub.f32 %v2225_v59, %v2241_v32 }
 0x8c0   : > { %v2252_v38 = vmul.f32 1.442695, %v2245_v37 }
 0x8c2   : > { %5062 = vpow2.f32 %v2252_v38 }
 0x8c3   : > { %2261 = vadd.xlane.f32.xlu0 %v2260_v31 }
 0x8c4   : > { %v5061_v34 = vpop.eup %5060 }
 0x8c5   : > { %v2257_v36 = vsel %vm1344_vm3, %v5061_v34, 0.0 }
 0x8c6   : > { %2258 = vadd.xlane.f32.xlu1 %v2257_v36 }
 0x8cc   : > { %v5063_v42 = vpop.eup %5062 }
 0x8cd   : > { %v2263_v44 = vsel %vm1344_vm3, %v5063_v42, 0.0 }
 0x8d7   : > { %2522 = vrot.lane.b32.xlu1 %v5683_v46, %s5283_s27 }
 0x8d9   : > { %2472 = vrot.lane.b32.xlu0 %v5674_v33, %s5283_s27 }
 0x8dd   : > { %2470 = vrot.lane.b32.xlu0 %v5685_v50, %s5283_s27 }
 0x8e1   : > { %2572 = vrot.lane.b32.xlu0 %v5687_v53, %s5283_s27 }
 0x8e5   : > { %2570 = vrot.lane.b32.xlu0 %v5705_v63, %s5283_s27 }
 0x8fb   : > { %2264 = vadd.xlane.f32.xlu1 %v2263_v44 }
 0x90c   : > { %2520 = vrot.lane.b32.xlu1 %v5703_v62, %s5283_s27  ;;  %v2380_v62 = vsel %vm1396_vm2, %v2375_v45, 0 }
 0x910   : > { %2622 = vrot.lane.b32.xlu1 %v5701_v61, %s5283_s27  ;;  %v2423_v61 = vpop.permute.xlu1 %2422 }
 0x911   : > { %v2428_v4 = vsel %vm1396_vm2, %v2423_v61, 0 }
 0x914   : > { %2620 = vrot.lane.b32.xlu1 %v5723_v6, %s5283_s27 }
 0x91b   : > { %v2256_v33 = vpop.xlane.xlu0 %2255 }
 0x91c   : > { %5064 = vrcp.f32 %v2256_v33 }
 0x91f   : > { %v2279_v46 = vpop.permute.xlu0 %2278 }
 0x920   : > { %v2284_v50 = vsel %vm1396_vm2, %v2279_v46, 0 }
 0x921   : > { %4685 = vmatpush3.bf16.msra.mxu1 %v2284_v50 }
 0x922   : > { %4696 = vmatprep.subr.bf16.mxu1 %v5279_v17 }
 0x926   : > { %v5065_v53 = vpop.eup %5064 }
 0x927   : > { %v2270_v63 = vmul.f32 %v5065_v53, %v5057_v13 }
 0x929   : > { %v2274_v47 = vpack.c.bf16 %v2270_v63, %v2270_v63 }
 0x92b   : > { %4687 = vmatmul.mubr.msk.bf16.vlgmr.msra.gmra.mrb[40].mxu1 %vm1344_vm3, %v2274_v47 }
 0x92c   : > { %4697 = vmatpush3.bf16.msra.mxu1 %v2380_v62  ;;  %4698 = vmatprep.mubr.msk.bf16.mxu1 %vm5280_vm0, %v5279_v17 }
 0x92d   : > { %4708 = vmatprep.subr.bf16.mxu1 %v5279_v17 }
 0x950   : > { %v2262_v6 = vpop.xlane.xlu0 %2261 }
 0x951   : > { %5066 = vrcp.f32 %v2262_v6 }
 0x953   : > { %v2259_v49 = vpop.xlane.xlu1 %2258 }
 0x954   : > { %5068 = vrcp.f32 %v2259_v49  ;;  %v2473_v51 = vpop.permute.xlu0 %2472 }
 0x955   : > { %v2478_v1 = vsel %vm1159_vm1, %v2473_v51, 0 }
 0x957   : > { %v2523_v13 = vpop.permute.xlu1 %2522 }
 0x958   : > { %v2471_v0 = vpop.permute.xlu0 %2470  ;;  %v2528_v28 = vsel %vm1159_vm1, %v2523_v13, 0 }
 0x95b   : > { %v5067_v52 = vpop.eup %5066 }
 0x95c   : > { %v2272_v56 = vmul.f32 %v5067_v52, %v5059_v40  ;;  %v2573_v7 = vpop.permute.xlu0 %2572 }
 0x95d   : > { %v2578_v9 = vsel %vm1159_vm1, %v2573_v7, 0 }
 0x95e   : > { %v5069_v57 = vpop.eup %5068  ;;  %v2276_v58 = vpack.c.bf16 %v2272_v56, %v2272_v56 }
 0x95f   : > { %v2271_v59 = vmul.f32 %v5069_v57, %v5061_v34 }
 0x960   : > { %4699 = vmatmul.mubr.msk.bf16.vlgmr.msra.gmra.mrb[44].mxu1 %vm1344_vm3, %v2276_v58  ;;  %v2571_v11 = vpop.permute.xlu0 %2570 }
 0x961   : > { %4709 = vmatpush3.bf16.xpose.msra.mxu1 %v2478_v1  ;;  %v2275_v2 = vpack.c.bf16 %v2271_v59, %v2271_v59  ;;  %4710 = vmatprep.mubr.msk.bf16.mxu1 %vm5280_vm0, %v5279_v17 }
 0x962   : > { %4720 = vmatprep.subr.bf16.mxu1 %v5279_v17 }
 0x963   : > { %4693 = vmatmul.mubr.msk.bf16.vlgmr.msra.gmra.mrb[52].mxu0 %vm1344_vm3, %v2275_v2 }
 0x964   : > { %4703 = vmatpush3.bf16.msra.mxu0 %v2428_v4  ;;  %4704 = vmatprep.mubr.msk.bf16.mxu0 %vm5280_vm0, %v5279_v17 }
 0x965   : > { %4714 = vmatprep.subr.bf16.mxu0 %v5279_v17 }
 0x968   : > { %4711 = vmatmul.mubr.msk.bf16.vlgmr.msra.gmra.mrb[48].mxu1 %vm1159_vm1, %v2471_v0 }
 0x969   : > { %4721 = vmatpush3.bf16.xpose.msra.mxu1 %v2578_v9  ;;  %4722 = vmatprep.mubr.msk.bf16.mxu1 %vm5280_vm0, %v5279_v17 }
 0x96a   : > { %4732 = vmatprep.subr.bf16.mxu1 %v5279_v17 }
 0x970   : > { %4723 = vmatmul.mubr.msk.bf16.vlgmr.msra.gmra.mrb[52].mxu1 %vm1159_vm1, %v2571_v11 }
 0x971   : > { %4734 = vmatprep.mubr.msk.bf16.mxu1 %vm5280_vm0, %v5279_v17 }
 0x988   : > { %v2265_v14 = vpop.xlane.xlu1 %2264 }
 0x989   : > { %5070 = vrcp.f32 %v2265_v14 }
 0x98c   : > { %v2521_v26 = vpop.permute.xlu1 %2520 }
 0x990   : > { %v2623_v29 = vpop.permute.xlu1 %2622 }
 0x991   : > { %v2628_v30 = vsel %vm1159_vm1, %v2623_v29, 0 }
 0x993   : > { %v5071_v18 = vpop.eup %5070 }
 0x994   : > { %v2273_v24 = vmul.f32 %v5071_v18, %v5063_v42  ;;  %v2621_v27 = vpop.permute.xlu1 %2620 }
 0x996   : > { %v2277_v25 = vpack.c.bf16 %v2273_v24, %v2273_v24 }
 0x998   : > { %4705 = vmatmul.mubr.msk.bf16.vlgmr.msra.gmra.mrb[56].mxu0 %vm1344_vm3, %v2277_v25 }
 0x999   : > { %4715 = vmatpush3.bf16.xpose.msra.mxu0 %v2528_v28  ;;  %4716 = vmatprep.mubr.msk.bf16.mxu0 %vm5280_vm0, %v5279_v17 }
 0x99a   : > { %4726 = vmatprep.subr.bf16.mxu0 %v5279_v17 }
 0x9a0   : > { %4717 = vmatmul.mubr.msk.bf16.vlgmr.msra.gmra.mrb[60].mxu0 %vm1159_vm1, %v2521_v26 }
 0x9a1   : > { %4727 = vmatpush3.bf16.xpose.msra.mxu0 %v2628_v30  ;;  %4728 = vmatprep.mubr.msk.bf16.mxu0 %vm5280_vm0, %v5279_v17 }
 0x9a2   : > { %4738 = vmatprep.subr.bf16.mxu0 %v5279_v17 }
 0x9a8   : > { %4729 = vmatmul.mubr.msk.bf16.vlgmr.msra.gmra.mrb[64].mxu0 %vm1159_vm1, %v2621_v27 }
 0x9a9   : > { %4740 = vmatprep.mubr.msk.bf16.mxu0 %vm5280_vm0, %v5279_v17 }
 0x9fe   : > { %v2320_v40 = vpop.f32.mrb[40].mxu1 }
 0x9ff   : > { %v4688_v31 = vpop.f32.mrb[41].mxu1 }
 0xa00   : > { %v2323_v34 = vpop.f32.mrb[42].mxu1 }
 0xa01   : > { %v4689_v36 = vpop.f32.mrb[43].mxu1 }
 0xa33   : > { %v5983_v32 = vpop.f32.mrb[44].mxu1 }
 0xa34   : > { %v4700_v37 = vpop.f32.mrb[45].mxu1 }
 0xa35   : > { %v2419_v38 = vpop.f32.mrb[46].mxu1 }
 0xa36   : > { %v4701_v42 = vpop.f32.mrb[47].mxu1  ;;  %v2368_v44 = vpop.f32.mrb[52].mxu0 }
 0xa37   : > { %v4876_v33 = vpack.i.bf16 %v2368_v44, %v2320_v40  ;;  %v4694_v46 = vpop.f32.mrb[53].mxu0 }
 0xa38   : > { %v2371_v50 = vpop.f32.mrb[54].mxu0 }
 0xa39   : > { %v4695_v53 = vpop.f32.mrb[55].mxu0 }
 0xa3b   : > { %v2514_v63 = vpop.f32.mrb[48].mxu1 }
 0xa3c   : > { %v2515_v45 = vadd.f32 %v2514_v63, %v5735_v8  ;;  %v4712_v47 = vpop.f32.mrb[49].mxu1 }
 0xa3d   : > { %v2517_v62 = vpop.f32.mrb[50].mxu1 }
 0xa3e   : > { %v4713_v61 = vpop.f32.mrb[51].mxu1  ;;  %v2670_v6 = vsel %vm1344_vm3, %v2515_v45, -inf }
 0xa3f   : > { %2671 = vmax.xlane.f32.xlu0 %v2670_v6 }
 0xa43   : > { %v2614_v49 = vpop.f32.mrb[52].mxu1 }
 0xa44   : > { %v2615_v51 = vadd.f32 %v2614_v49, %v5735_v8  ;;  %v4724_v52 = vpop.f32.mrb[53].mxu1 }
 0xa45   : > { %v2617_v56 = vpop.f32.mrb[54].mxu1 }
 0xa46   : > { %v4725_v57 = vpop.f32.mrb[55].mxu1  ;;  %v2676_v58 = vsel %vm1344_vm3, %v2615_v51, -inf }
 0xa47   : > { %2677 = vmax.xlane.f32.xlu0 %v2676_v58 }
 0xa6b   : > { %v2464_v59 = vpop.f32.mrb[56].mxu0 }
 0xa6c   : > { %v4881_v0 = vpack.i.bf16 %v2464_v59, %v5983_v32  ;;  %v4706_v1 = vpop.f32.mrb[57].mxu0 }
 0xa6d   : > { %v2467_v2 = vpop.f32.mrb[58].mxu0 }
 0xa6e   : > { %v4707_v4 = vpop.f32.mrb[59].mxu0 }
 0xa73   : > { %v2564_v7 = vpop.f32.mrb[60].mxu0 }
 0xa74   : > { %v2565_v9 = vadd.f32 %v2564_v7, %v5735_v8  ;;  %v4718_v11 = vpop.f32.mrb[61].mxu0 }
 0xa75   : > { %v2567_v13 = vpop.f32.mrb[62].mxu0 }
 0xa76   : > { %v4719_v14 = vpop.f32.mrb[63].mxu0  ;;  %v2673_v18 = vsel %vm1344_vm3, %v2565_v9, -inf }
 0xa77   : > { %2674 = vmax.xlane.f32.xlu1 %v2673_v18 }
 0xa7b   : > { %v2664_v24 = vpop.f32.mrb[64].mxu0 }
 0xa7c   : > { %v2665_v25 = vadd.f32 %v2664_v24, %v5735_v8  ;;  %v4730_v26 = vpop.f32.mrb[65].mxu0  ;;  %v4929_v24 = vld [vmem:[%s5556_s17 + $0x8] sm:$0xff]  }
 0xa7d   : > { %v2667_v28 = vpop.f32.mrb[66].mxu0 }
 0xa7e   : > { %v4731_v29 = vpop.f32.mrb[67].mxu0  ;;  %v2679_v30 = vsel %vm1344_vm3, %v2665_v25, -inf }
 0xa7f   : > { %2680 = vmax.xlane.f32.xlu0 %v2679_v30  ;;  %v4930_v29 = vld [vmem:[%s5556_s17 + $0x10] sm:$0xff]  }
 0xacc   : > { %v2672_v27 = vpop.xlane.xlu0 %2671 }
 0xacd   : > { %v2682_v40 = vsub.f32 %v2515_v45, %v2672_v27 }
 0xacf   : > { %v2686_v31 = vmul.f32 1.442695, %v2682_v40 }
 0xad1   : > { %5072 = vpow2.f32 %v2686_v31 }
 0xad4   : > { %v2678_v34 = vpop.xlane.xlu0 %2677 }
 0xad5   : > { %v2684_v36 = vsub.f32 %v2615_v51, %v2678_v34 }
 0xad7   : > { %v2690_v32 = vmul.f32 1.442695, %v2684_v36 }
 0xad9   : > { %5074 = vpow2.f32 %v2690_v32  ;;  %v4931_v32 = vld [vmem:[%s5556_s17 + $0x18] sm:$0xff]  }
 0xadb   : > { %v5073_v37 = vpop.eup %5072 }
 0xadc   : > { %v2694_v38 = vsel %vm1344_vm3, %v5073_v37, 0.0 }
 0xadd   : > { %2695 = vadd.xlane.f32.xlu0 %v2694_v38  ;;  %v4933_v38 = vld [vmem:[%s5556_s17 + $0x28] sm:$0xff]  }
 0xae3   : > { %v5075_v42 = vpop.eup %5074 }
 0xae4   : > { %v2700_v8 = vsel %vm1344_vm3, %v5075_v42, 0.0 }
 0xae5   : > { %2701 = vadd.xlane.f32.xlu0 %v2700_v8  ;;  %v4935_v8 = vld [vmem:[%s5556_s17 + $0x38] sm:$0xff]  }
 0xafb   : > { %2718 = vrot.lane.b32.xlu0 %v5699_v60, %s5283_s27 }
 0xaff   : > { %4867 = vrot.lane.b32.xlu0 %v4866_v16, %s5283_s27 }
 0xb03   : > { %4877 = vrot.lane.b32.xlu0 %v4876_v33, %s5282_s28 }
 0xb04   : > { %v2675_v44 = vpop.xlane.xlu1 %2674 }
 0xb05   : > { %v2683_v46 = vsub.f32 %v2565_v9, %v2675_v44 }
 0xb07   : > { %v2688_v50 = vmul.f32 1.442695, %v2683_v46 }
 0xb09   : > { %5076 = vpow2.f32 %v2688_v50 }
 0xb0c   : > { %v2681_v60 = vpop.xlane.xlu0 %2680 }
 0xb0d   : > { %v2685_v45 = vsub.f32 %v2665_v25, %v2681_v60 }
 0xb0f   : > { %v2692_v3 = vmul.f32 1.442695, %v2685_v45 }
 0xb11   : > { %5078 = vpow2.f32 %v2692_v3 }
 0xb13   : > { %v5077_v53 = vpop.eup %5076 }
 0xb14   : > { %v2697_v63 = vsel %vm1344_vm3, %v5077_v53, 0.0 }
 0xb15   : > { %2698 = vadd.xlane.f32.xlu1 %v2697_v63 }
 0xb1b   : > { %v5079_v15 = vpop.eup %5078 }
 0xb1c   : > { %v2703_v16 = vsel %vm1344_vm3, %v5079_v15, 0.0 }
 0xb26   : > { %2766 = vrot.lane.b32.xlu1 %v5721_v5, %s5283_s27 }
 0xb2a   : > { %2814 = vrot.lane.b32.xlu1 %v5767_v12, %s5283_s27 }
 0xb4e   : > { %2704 = vadd.xlane.f32.xlu1 %v2703_v16 }
 0xb5f   : > { %2862 = vrot.lane.b32.xlu1 %v5777_v21, %s5283_s27 }
 0xb63   : > { %4872 = vrot.lane.b32.xlu1 %v4871_v41, %s5283_s27 }
 0xb67   : > { %4882 = vrot.lane.b32.xlu1 %v4881_v0, %s5282_s28 }
 0xb6a   : > { %v2696_v5 = vpop.xlane.xlu0 %2695 }
 0xb6b   : > { %5080 = vrcp.f32 %v2696_v5 }
 0xb72   : > { %v2702_v12 = vpop.xlane.xlu0 %2701 }
 0xb73   : > { %5082 = vrcp.f32 %v2702_v12 }
 0xb75   : > { %v5081_v33 = vpop.eup %5080 }
 0xb76   : > { %v2710_v47 = vmul.f32 %v5081_v33, %v5073_v37  ;;  %v2719_v62 = vpop.permute.xlu0 %2718  ;;  %v4932_v37 = vld [vmem:[%s5556_s17 + $0x20] sm:$0xff]  }
 0xb77   : > { %v2724_v61 = vsel %vm1396_vm2, %v2719_v62, 0 }
 0xb78   : > { %4733 = vmatpush3.bf16.msra.mxu1 %v2724_v61  ;;  %v2714_v6 = vpack.c.bf16 %v2710_v47, %v2710_v47 }
 0xb79   : > { %4744 = vmatprep.subr.bf16.mxu1 %v5279_v17 }
 0xb7a   : > { %v4868_v60 = vpop.permute.xlu0 %4867 }
 0xb7b   : > { %4735 = vmatmul.mubr.msk.bf16.vlgmr.msra.gmra.mrb[56].mxu1 %vm1344_vm3, %v2714_v6  ;;  %v4870_v3 = vunpack.i.h.bf16 %v4868_v60 }
 0xb7c   : > { %4746 = vmatprep.mubr.msk.bf16.mxu1 %vm5280_vm0, %v5279_v17 }
 0xb7d   : > { %v5083_v10 = vpop.eup %5082  ;;  %v2959_v33 = vsel %vm1159_vm1, %v5813_v54, %v4870_v3 }
 0xb7e   : > { %v2712_v49 = vmul.f32 %v5083_v10, %v5075_v42  ;;  %v4934_v42 = vld [vmem:[%s5556_s17 + $0x30] sm:$0xff]   ;;  %v4878_v45 = vpop.permute.xlu0 %4877 }
 0xb7f   : > { %v4880_v16 = vunpack.i.h.bf16 %v4878_v45  ;;  %v4879_v5 = vunpack.i.l.bf16 %v4878_v45 }
 0xb80   : > { %v2716_v57 = vpack.c.bf16 %v2712_v49, %v2712_v49 }
 0xba2   : > { %v2699_v21 = vpop.xlane.xlu1 %2698 }
 0xba3   : > { %5084 = vrcp.f32 %v2699_v21  ;;  %v2964_v21 = vsel %vm2962_vm4, %v2959_v33, %v4880_v16 }
 0xba6   : > { %v2767_v39 = vpop.permute.xlu1 %2766 }
 0xba7   : > { %v2772_v41 = vsel %vm1396_vm2, %v2767_v39, 0 }
 0xba8   : > { %4739 = vmatpush3.bf16.msra.mxu0 %v2772_v41 }
 0xba9   : > { %4750 = vmatprep.subr.bf16.mxu0 %v5279_v17 }
 0xbaa   : > { %v2815_v51 = vpop.permute.xlu1 %2814 }
 0xbab   : > { %v2820_v52 = vsel %vm1396_vm2, %v2815_v51, 0 }
 0xbac   : > { %4745 = vmatpush3.bf16.msra.mxu1 %v2820_v52 }
 0xbad   : > { %v5085_v56 = vpop.eup %5084 }
 0xbae   : > { %v2711_v58 = vmul.f32 %v5085_v56, %v5077_v53 }
 0xbaf   : > { %4747 = vmatmul.mubr.msk.bf16.vlgmr.msra.gmra.mrb[60].mxu1 %vm1344_vm3, %v2716_v57 }
 0xbb0   : > { %v2715_v59 = vpack.c.bf16 %v2711_v58, %v2711_v58 }
 0xbb2   : > { %4741 = vmatmul.mubr.msk.bf16.vlgmr.msra.gmra.mrb[68].mxu0 %vm1344_vm3, %v2715_v59 }
 0xbb3   : > { %4752 = vmatprep.mubr.msk.bf16.mxu0 %vm5280_vm0, %v5279_v17  ;;  %v4928_v17 = vld [vmem:[%s5556_s17] sm:$0xff]  }
 0xbb4   : > { %4756 = vmatprep.subr.bf16.mxu1 %v4928_v17 }
 0xbb5   : > { %4757 = vmatpush3.bf16.msra.mxu1 %v4928_v17 }
 0xbb6   : > { %4758 = vmatprep.subr.bf16.mxu1 %v4929_v24 }
 0xbb9   : > { %4759 = vmatpush3.bf16.msra.mxu1 %v4929_v24 }
 0xbba   : > { %4760 = vmatprep.subr.bf16.mxu1 %v4930_v29 }
 0xbbd   : > { %4761 = vmatpush3.bf16.msra.mxu1 %v4930_v29  ;;  %v5130_v29 = vld [vmem:[%s5589_s21 + $0x8] sm:$0xff] }
 0xbbe   : > { %4762 = vmatprep.subr.bf16.mxu1 %v4931_v32 }
 0xbc1   : > { %4763 = vmatpush3.bf16.msra.mxu1 %v4931_v32  ;;  %v4936_v32 = vld [vmem:[%s5574_s7] ss:$16 sps:$4 sm:$0xff]  }
 0xbc2   : > { %4764 = vmatprep.subr.bf16.mxu1 %v4932_v37 }
 0xbc5   : > { %4765 = vmatpush3.bf16.msra.mxu1 %v4932_v37  ;;  %v4938_v37 = vld [vmem:[%s5574_s7 + $0x4] ss:$16 sps:$4 sm:$0xff]  }
 0xbc6   : > { %4766 = vmatprep.subr.bf16.mxu1 %v4933_v38 }
 0xbc9   : > { %4767 = vmatpush3.bf16.msra.mxu1 %v4933_v38  ;;  %v4939_v38 = vld [vmem:[%s5574_s7 + $0x8] ss:$16 sps:$4 sm:$0xff]  }
 0xbca   : > { %4768 = vmatprep.subr.bf16.mxu1 %v4934_v42 }
 0xbcd   : > { %4769 = vmatpush3.bf16.msra.mxu1 %v4934_v42  ;;  %v4941_v42 = vld [vmem:[%s5574_s7 + $0xc] ss:$16 sps:$4 sm:$0xff]  }
 0xbce   : > { %4770 = vmatprep.subr.bf16.mxu1 %v4935_v8 }
 0xbd1   : > { %4771 = vmatpush3.bf16.msra.mxu1 %v4935_v8  ;;  %v4944_v8 = vld [vmem:[%s5574_s7 + $0x24] ss:$16 sps:$4 sm:$0xff]  }
 0xbd2   : > { %3437 = vmatprep.subr.bf16.mxu1 %v4941_v42 }
 0xbdb   : > { %v2705_v0 = vpop.xlane.xlu1 %2704 }
 0xbdc   : > { %5086 = vrcp.f32 %v2705_v0 }
 0xbdf   : > { %v2863_v1 = vpop.permute.xlu1 %2862 }
 0xbe0   : > { %v2868_v2 = vsel %vm1396_vm2, %v2863_v1, 0 }
 0xbe1   : > { %4751 = vmatpush3.bf16.msra.mxu0 %v2868_v2 }
 0xbe2   : > { %3384 = vmatprep.subr.bf16.mxu0 %v4938_v37 }
 0xbe3   : > { %v4873_v49 = vpop.permute.xlu1 %4872 }
 0xbe4   : > { %v4875_v52 = vunpack.i.h.bf16 %v4873_v49  ;;  %v4874_v56 = vunpack.i.l.bf16 %v4873_v49  ;;  %v4948_v49 = vld [vmem:[%s5574_s7 + $0x40] ss:$16 sps:$4 sm:$0xff]  }
 0xbe6   : > { %v5087_v4 = vpop.eup %5086  ;;  %v2961_v58 = vsel %vm1159_vm1, %v5821_v35, %v4875_v52  ;;  %v2960_v59 = vsel %vm1159_vm1, %v5815_v55, %v4874_v56  ;;  %v4319_v55 = vld [vmem:[%s6318_s25] ss:$0 sm:$0xff]  ;;  %v4956_v52 = vld [vmem:[%s5574_s7 + $0x64] ss:$16 sps:$4 sm:$0xff]   ;;  %v4959_v56 = vld [vmem:[%s5574_s7 + $0x6c] ss:$16 sps:$4 sm:$0xff]  }
 0xbe7   : > { %v2713_v7 = vmul.f32 %v5087_v4, %v5079_v15  ;;  %v4869_v15 = vunpack.i.l.bf16 %v4868_v60  ;;  %v4883_v51 = vpop.permute.xlu1 %4882 }
 0xbe8   : > { %v4885_v54 = vunpack.i.h.bf16 %v4883_v51  ;;  %v4884_v57 = vunpack.i.l.bf16 %v4883_v51  ;;  %v4951_v51 = vld [vmem:[%s5574_s7 + $0x48] ss:$16 sps:$4 sm:$0xff]  }
 0xbe9   : > { %v2717_v9 = vpack.c.bf16 %v2713_v7, %v2713_v7  ;;  %v2958_v47 = vsel %vm1159_vm1, %v5811_v48, %v4869_v15 }
 0xbea   : > { %v2963_v6 = vsel %vm2962_vm4, %v2958_v47, %v4879_v5  ;;  %v2965_v2 = vsel %vm2962_vm4, %v2960_v59, %v4884_v57  ;;  %v2966_v4 = vsel %vm2962_vm4, %v2961_v58, %v4885_v54  ;;  %v4954_v54 = vld [vmem:[%s5574_s7 + $0x60] ss:$16 sps:$4 sm:$0xff]   ;;  %v4957_v57 = vld [vmem:[%s5574_s7 + $0x68] ss:$16 sps:$4 sm:$0xff]   ;;  %v4965_v58 = vld [vmem:[%s5574_s7 + $0x8c] ss:$16 sps:$4 sm:$0xff]  }
 0xbeb   : > { %4753 = vmatmul.mubr.msk.bf16.vlgmr.msra.gmra.mrb[72].mxu0 %vm1344_vm3, %v2717_v9  ;;  %v4960_v59 = vld [vmem:[%s5574_s7 + $0x80] ss:$16 sps:$4 sm:$0xff]  }
 0xbec   : > { %3416 = vmatprep.mubr.bf16.mxu0 %v5278_v43  ;;  %3385 = vmatpush1.bf16.msra.mxu0 %v4936_v32 }
 0xbed   : > { %3386 = vmatprep.subr.bf16.mxu0 %v4944_v8 }
 0xc4e   : > { %v2760_v11 = vpop.f32.mrb[56].mxu1 }
 0xc4f   : > { %v4736_v13 = vpop.f32.mrb[57].mxu1 }
 0xc50   : > { %v2763_v14 = vpop.f32.mrb[58].mxu1 }
 0xc51   : > { %v4737_v18 = vpop.f32.mrb[59].mxu1  ;;  %v5128_v14 = vld [vmem:[%s5589_s21] sm:$0xff] }
 0xc82   : > { %v2856_v25 = vpop.f32.mrb[60].mxu1 }
 0xc83   : > { %v4748_v26 = vpop.f32.mrb[61].mxu1 }
 0xc84   : > { %v2859_v28 = vpop.f32.mrb[62].mxu1 }
 0xc85   : > { %v2808_v30 = vpop.f32.mrb[68].mxu0  ;;  %v4749_v27 = vpop.f32.mrb[63].mxu1 }
 0xc86   : > { %v4886_v40 = vpack.i.bf16 %v2808_v30, %v2760_v11  ;;  %v4742_v31 = vpop.f32.mrb[69].mxu0 }
 0xc87   : > { %v2811_v34 = vpop.f32.mrb[70].mxu0  ;;  %v5131_v31 = vld [vmem:[%s5589_s21 + $0x18] sm:$0xff] }
 0xc88   : > { %v4743_v36 = vpop.f32.mrb[71].mxu0  ;;  %4887 = vrot.lane.b32.xlu0 %v4886_v40, %s5281_s2 }
 0xcbe   : > { %v2904_v44 = vpop.f32.mrb[72].mxu0 }
 0xcbf   : > { %v4891_v46 = vpack.i.bf16 %v2904_v44, %v2856_v25  ;;  %v4754_v50 = vpop.f32.mrb[73].mxu0  ;;  %v5129_v25 = vld [vmem:[%s5589_s21 + $0x10] sm:$0xff]  ;;  %v4947_v44 = vld [vmem:[%s5574_s7 + $0x2c] ss:$16 sps:$4 sm:$0xff]  }
 0xcc0   : > { %v2907_v53 = vpop.f32.mrb[74].mxu0  ;;  %v4945_v50 = vld [vmem:[%s5574_s7 + $0x28] ss:$16 sps:$4 sm:$0xff]  }
 0xcc1   : > { %v4755_v63 = vpop.f32.mrb[75].mxu0  ;;  %4892 = vrot.lane.b32.xlu1 %v4891_v46, %s5281_s2  ;;  %v4942_v46 = vld [vmem:[%s5574_s7 + $0x20] ss:$16 sps:$4 sm:$0xff]  }
 0xcc2   : > { %3387 = vmatpush1.bf16.msra.mxu0 %v4942_v46  ;;  %v4320_v46 = vld [vmem:[%s6319_s6] ss:$0 sm:$0xff] }
 0xcfa   : > { %v4888_v12 = vpop.permute.xlu0 %4887 }
 0xcfb   : > { %v4890_v62 = vunpack.i.h.bf16 %v4888_v12  ;;  %v4889_v61 = vunpack.i.l.bf16 %v4888_v12 }
 0xcfd   : > { %v2968_v10 = vsel %vm2967_vm5, %v2963_v6, %v4889_v61  ;;  %v2969_v39 = vsel %vm2967_vm5, %v2964_v21, %v4890_v62 }
 0xcfe   : > { %v2972_v41 = vpack.c.bf16 %v2969_v39, %v2968_v10  ;;  %v4950_v39 = vld [vmem:[%s5574_s7 + $0x44] ss:$16 sps:$4 sm:$0xff]  }
 0xcff   : > { %3388 = vmatprep.subr.bf16.mxu0 %v4950_v39 }
 0xd00   : > { %4772 = vmatprep.mubr.bf16.mxu1 %v2972_v41  ;;  %v4953_v41 = vld [vmem:[%s5574_s7 + $0x4c] ss:$16 sps:$4 sm:$0xff]   ;;  %3389 = vmatpush1.bf16.msra.mxu0 %v4948_v49  ;;  %v4984_v49 = vld [vmem:[%s6320_s19 + $0x40] sm:$0xff]  }
 0xd01   : > { %3390 = vmatprep.subr.bf16.mxu0 %v4956_v52  ;;  %v4987_v52 = vld [vmem:[%s6320_s19 + $0x80] sm:$0xff]  }
 0xd04   : > { %3391 = vmatpush1.bf16.msra.mxu0 %v4954_v54  ;;  %v4990_v54 = vld [vmem:[%s6320_s19 + $0x8] sm:$0xff]  }
 0xd33   : > { %v4893_v48 = vpop.permute.xlu1 %4892 }
 0xd34   : > { %v4895_v0 = vunpack.i.h.bf16 %v4893_v48  ;;  %v4894_v1 = vunpack.i.l.bf16 %v4893_v48  ;;  %v4962_v48 = vld [vmem:[%s5574_s7 + $0x84] ss:$16 sps:$4 sm:$0xff]  }
 0xd35   : > { %3392 = vmatprep.subr.bf16.mxu0 %v4962_v48  ;;  %v4992_v48 = vld [vmem:[%s6320_s19 + $0x50] sm:$0xff]  }
 0xd36   : > { %v2971_v7 = vsel %vm2967_vm5, %v2966_v4, %v4895_v0  ;;  %v2970_v9 = vsel %vm2967_vm5, %v2965_v2, %v4894_v1  ;;  %v4963_v0 = vld [vmem:[%s5574_s7 + $0x88] ss:$16 sps:$4 sm:$0xff]   ;;  %3393 = vmatpush1.bf16.msra.mxu0 %v4960_v59  ;;  %v4968_v1 = vld [vmem:[%s5574_s7 + $0xa4] ss:$16 sps:$4 sm:$0xff]   ;;  %v4971_v2 = vld [vmem:[%s5574_s7 + $0xac] ss:$16 sps:$4 sm:$0xff]  }
 0xd37   : > { %v2973_v11 = vpack.c.bf16 %v2971_v7, %v2970_v9  ;;  %v4966_v4 = vld [vmem:[%s5574_s7 + $0xa0] ss:$16 sps:$4 sm:$0xff]   ;;  %v4969_v7 = vld [vmem:[%s5574_s7 + $0xa8] ss:$16 sps:$4 sm:$0xff]   ;;  %3394 = vmatprep.subr.bf16.mxu0 %v4968_v1 }
 0xd38   : > { %v4972_v9 = vld [vmem:[%s5574_s7 + $0xc0] ss:$16 sps:$4 sm:$0xff]   ;;  %v4996_v1 = vld [vmem:[%s6320_s19 + $0x58] sm:$0xff]  }
 0xd39   : > { %4773 = vmatmul.mubr.bf16.vlgmr.msra.gmra.mrb[64].mxu1 %v2973_v11  ;;  %v4974_v11 = vld [vmem:[%s5574_s7 + $0xc4] ss:$16 sps:$4 sm:$0xff]  }
 0xd3a   : > { %3469 = vmatprep.mubr.bf16.mxu1 %v5278_v43  ;;  %3438 = vmatpush1.bf16.msra.mxu1 %v4939_v38  ;;  %v4994_v59 = vld [vmem:[%s6320_s19 + $0x10] sm:$0xff]  }
 0xd3b   : > { %3439 = vmatprep.subr.bf16.mxu1 %v4947_v44  ;;  %3395 = vmatpush1.bf16.msra.mxu0 %v4966_v4  ;;  %v4998_v4 = vld [vmem:[%s6320_s19 + $0x18] sm:$0xff]  }
 0xd3c   : > { %3396 = vmatprep.subr.bf16.mxu0 %v4974_v11  ;;  %v5001_v11 = vld [vmem:[%s6320_s19 + $0xe0] sm:$0xff]  }
 0xd3e   : > { %3440 = vmatpush1.bf16.msra.mxu1 %v4945_v50 }
 0xd3f   : > { %3441 = vmatprep.subr.bf16.mxu1 %v4953_v41  ;;  %3397 = vmatpush1.bf16.msra.mxu0 %v4972_v9  ;;  %v5000_v9 = vld [vmem:[%s6320_s19 + $0x60] sm:$0xff]  }
 0xd42   : > { %3442 = vmatpush1.bf16.msra.mxu1 %v4951_v51  ;;  %v4986_v51 = vld [vmem:[%s6320_s19] sm:$0xff]  }
 0xd43   : > { %3443 = vmatprep.subr.bf16.mxu1 %v4959_v56  ;;  %v4989_v56 = vld [vmem:[%s6320_s19 + $0xc8] sm:$0xff]  }
 0xd46   : > { %3444 = vmatpush1.bf16.msra.mxu1 %v4957_v57  ;;  %v4991_v57 = vld [vmem:[%s6320_s19 + $0x88] sm:$0xff]  }
 0xd47   : > { %3445 = vmatprep.subr.bf16.mxu1 %v4965_v58  ;;  %v4993_v58 = vld [vmem:[%s6320_s19 + $0xd0] sm:$0xff]  }
 0xd4a   : > { %3446 = vmatpush1.bf16.msra.mxu1 %v4963_v0  ;;  %v4995_v0 = vld [vmem:[%s6320_s19 + $0x90] sm:$0xff]  }
 0xd4b   : > { %3447 = vmatprep.subr.bf16.mxu1 %v4971_v2  ;;  %v4997_v2 = vld [vmem:[%s6320_s19 + $0xd8] sm:$0xff]  }
 0xd4e   : > { %3448 = vmatpush1.bf16.msra.mxu1 %v4969_v7  ;;  %v4999_v7 = vld [vmem:[%s6320_s19 + $0x98] sm:$0xff]  }
 0xe0c   : > { %v4774_v35 = vpop.f32.mrb[64].mxu1 }
 0xe0d   : > { %v3072_v13 = vpop.f32.mrb[65].mxu1  ;;  %v3089_v26 = vadd.f32 %v5129_v25, %v4774_v35  ;;  %v4975_v35 = vld [vmem:[%s5574_s7 + $0xc8] ss:$16 sps:$4 sm:$0xff]  }
 0xe0e   : > { %v3087_v18 = vadd.f32 %v5128_v14, %v3072_v13  ;;  %v4775_v17 = vpop.f32.mrb[66].mxu1  ;;  %v4980_v13 = vld [vmem:[%s5574_s7 + $0xe4] ss:$16 sps:$4 sm:$0xff]   ;;  %v4983_v14 = vld [vmem:[%s5574_s7 + $0xec] ss:$16 sps:$4 sm:$0xff]  }
 0xe0f   : > { %v3075_v24 = vpop.f32.mrb[67].mxu1  ;;  %v6071_v40 = vadd.f32 %v4319_v55, %v3089_v26  ;;  %v3090_v34 = vadd.f32 %v5131_v31, %v4775_v17  ;;  %3398 = vmatprep.subr.bf16.mxu0 %v4980_v13  ;;  %v4981_v17 = vld [vmem:[%s5574_s7 + $0xe8] ss:$16 sps:$4 sm:$0xff]  }
 0xe10   : > { %v6065_v28 = vadd.f32 %v4319_v55, %v3087_v18  ;;  %v3088_v30 = vadd.f32 %v5130_v29, %v3075_v24  ;;  %v4978_v18 = vld [vmem:[%s5574_s7 + $0xe0] ss:$16 sps:$4 sm:$0xff]   ;;  %v5004_v13 = vld [vmem:[%s6320_s19 + $0x68] sm:$0xff]  }
 0xe11   : > { %v6076_v36 = vadd.f32 %v4319_v55, %v3090_v34  ;;  %3399 = vmatpush1.bf16.msra.mxu0 %v4978_v18  ;;  %v5006_v18 = vld [vmem:[%s6320_s19 + $0x28] sm:$0xff]  }
 0xe12   : > { %v6068_v27 = vadd.f32 %v4319_v55, %v3088_v30  ;;  %3104 = vadd.xlane.f32.xlu0 %v6065_v28  ;;  %v4977_v55 = vld [vmem:[%s5574_s7 + $0xcc] ss:$16 sps:$4 sm:$0xff]   ;;  %4488 = vmatprep.subr.bf16.mxu0 %v4984_v49 }
 0xe13   : > { %3449 = vmatprep.subr.bf16.mxu1 %v4977_v55  ;;  %v5003_v55 = vld [vmem:[%s6320_s19 + $0xa0] sm:$0xff]  }
 0xe14   : > { %3106 = vadd.xlane.f32.xlu1 %v6068_v27  ;;  %3450 = vmatpush1.bf16.msra.mxu1 %v4975_v35  ;;  %v5002_v35 = vld [vmem:[%s6320_s19 + $0x20] sm:$0xff]  }
 0xe15   : > { %3451 = vmatprep.subr.bf16.mxu1 %v4983_v14  ;;  %v5005_v14 = vld [vmem:[%s6320_s19 + $0xe8] sm:$0xff]  }
 0xe16   : > { %3108 = vadd.xlane.f32.xlu0 %v6071_v40 }
 0xe18   : > { %3452 = vmatpush1.bf16.msra.mxu1 %v4981_v17  ;;  %v5007_v17 = vld [vmem:[%s6320_s19 + $0xa8] sm:$0xff]  }
 0xe1a   : > { %3110 = vadd.xlane.f32.xlu0 %v6076_v36 }
 0xe9f   : > { %v3105_v53 = vpop.xlane.xlu0 %3104 }
 0xea0   : > { %v3112_v63 = vmul.f32 0.0078125, %v3105_v53 }
 0xea1   : > { %v3107_v60 = vpop.xlane.xlu1 %3106 }
 0xea2   : > { %v6088_v45 = vsub.f32 %v6065_v28, %v3112_v63  ;;  %v3113_v3 = vmul.f32 0.0078125, %v3107_v60 }
 0xea3   : > { %v3109_v15 = vpop.xlane.xlu0 %3108 }
 0xea4   : > { %v6091_v16 = vsub.f32 %v6068_v27, %v3113_v3  ;;  %v3114_v5 = vmul.f32 0.0078125, %v3109_v15  ;;  %v3120_v12 = vmul.f32 %v6088_v45, %v6088_v45  ;;  %v4321_v15 = vld [vmem:[%s756_s20] ss:$0 sm:$0xff] }
 0xea6   : > { %v6096_v33 = vsub.f32 %v6071_v40, %v3114_v5  ;;  %3124 = vadd.xlane.f32.xlu0 %v3120_v12  ;;  %v3121_v47 = vmul.f32 %v6091_v16, %v6091_v16 }
 0xea7   : > { %v3111_v62 = vpop.xlane.xlu0 %3110 }
 0xea8   : > { %v3115_v61 = vmul.f32 0.0078125, %v3111_v62  ;;  %3126 = vadd.xlane.f32.xlu1 %v3121_v47  ;;  %v3122_v6 = vmul.f32 %v6096_v33, %v6096_v33 }
 0xeaa   : > { %v6103_v21 = vsub.f32 %v6076_v36, %v3115_v61  ;;  %3128 = vadd.xlane.f32.xlu0 %v3122_v6 }
 0xeac   : > { %v3123_v10 = vmul.f32 %v6103_v21, %v6103_v21 }
 0xeae   : > { %3130 = vadd.xlane.f32.xlu1 %v3123_v10 }
 0xf33   : > { %v3125_v24 = vpop.xlane.xlu0 %3124 }
 0xf34   : > { %v3132_v25 = vmul.f32 0.0078125, %v3125_v24  ;;  %v5008_v24 = vld [vmem:[%s6320_s19 + $0x70] sm:$0xff]  }
 0xf35   : > { %v3127_v26 = vpop.xlane.xlu1 %3126 }
 0xf36   : > { %v3136_v29 = vadd.f32 1e-05, %v3132_v25  ;;  %v3133_v30 = vmul.f32 0.0078125, %v3127_v26  ;;  %v5009_v25 = vld [vmem:[%s6320_s19 + $0xf0] sm:$0xff]  }
 0xf37   : > { %v3129_v31 = vpop.xlane.xlu0 %3128  ;;  %v5010_v26 = vld [vmem:[%s6320_s19 + $0x30] sm:$0xff]  }
 0xf38   : > { %5088 = vrsqrt.f32 %v3136_v29  ;;  %v3137_v34 = vadd.f32 1e-05, %v3133_v30  ;;  %v3134_v32 = vmul.f32 0.0078125, %v3129_v31  ;;  %v5011_v29 = vld [vmem:[%s6320_s19 + $0xb0] sm:$0xff]   ;;  %v5012_v30 = vld [vmem:[%s6320_s19 + $0x78] sm:$0xff]  }
 0xf39   : > { %v5013_v31 = vld [vmem:[%s6320_s19 + $0xf8] sm:$0xff]  }
 0xf3a   : > { %5090 = vrsqrt.f32 %v3137_v34  ;;  %v3138_v37 = vadd.f32 1e-05, %v3134_v32  ;;  %v5014_v34 = vld [vmem:[%s6320_s19 + $0x38] sm:$0xff]  }
 0xf3b   : > { %v3131_v38 = vpop.xlane.xlu1 %3130  ;;  %v5015_v32 = vld [vmem:[%s6320_s19 + $0xb8] sm:$0xff]  }
 0xf3c   : > { %5092 = vrsqrt.f32 %v3138_v37  ;;  %v3135_v42 = vmul.f32 0.0078125, %v3131_v38  ;;  %v3202_v37 = vld [vmem:[%s5580_s23] sm:$0xf]  ;;  %v3218_v38 = vsub.s32 3, %v5662_v19 }
 0xf3e   : > { %v3139_v8 = vadd.f32 1e-05, %v3135_v42  ;;  %v3207_v42 = vrot.slane %v3202_v37, %v899_v22 }
 0xf40   : > { %5094 = vrsqrt.f32 %v3139_v8  ;;  %v3215_v8 = vrot.slane %v3202_v37, %v907_v23 }
 0xf42   : > { %v5089_v44 = vpop.eup %5088 }
 0xf43   : > { %v3144_v50 = vmul.f32 %v5089_v44, %v6088_v45 }
 0xf44   : > { %v5091_v53 = vpop.eup %5090 }
 0xf45   : > { %v3145_v63 = vmul.f32 %v5091_v53, %v6091_v16  ;;  %v3154_v60 = vmul.f32 %v4320_v46, %v3144_v50  ;;  %v3211_v50 = vrot.slane %v3202_v37, %v903_v20  ;;  %v3219_v53 = vrot.slane %v3202_v37, %v3218_v38 }
 0xf46   : > { %v5093_v3 = vpop.eup %5092 }
 0xf47   : > { %v3155_v5 = vmul.f32 %v4320_v46, %v3145_v63  ;;  %v3164_v12 = vadd.f32 %v4321_v15, %v3154_v60  ;;  %v3146_v62 = vmul.f32 %v5093_v3, %v6096_v33 }
 0xf49   : > { %v3165_v47 = vadd.f32 %v4321_v15, %v3155_v5  ;;  %v3156_v6 = vmul.f32 %v4320_v46, %v3146_v62 }
 0xf4a   : > { %v5095_v61 = vpop.eup %5094 }
 0xf4b   : > { %v3168_v45 = vpack.c.bf16 %v3165_v47, %v3164_v12  ;;  %v3147_v16 = vmul.f32 %v5095_v61, %v6103_v21  ;;  %v3166_v33 = vadd.f32 %v4321_v15, %v3156_v6  ;;  %v4985_v21 = vld [vmem:[%s6320_s19 + $0xc0] sm:$0xff]  }
 0xf4c   : > { %4516 = vmatprep.subr.bf16.mxu1 %v4985_v21 }
 0xf4d   : > { %3417 = vmatmul.mubr.bf16.vlgmr.msra.gmra.mrb[76].mxu0 %v3168_v45  ;;  %3470 = vmatmul.mubr.bf16.vlgmr.msra.gmra.mrb[68].mxu1 %v3168_v45  ;;  %v3157_v10 = vmul.f32 %v4320_v46, %v3147_v16 }
 0xf4e   : > { %3426 = vmatprep.mubr.bf16.mxu0 %v5278_v43  ;;  %3479 = vmatprep.mubr.bf16.mxu1 %v5278_v43  ;;  %v4988_v43 = vld [vmem:[%s6320_s19 + $0x48] sm:$0xff]  }
 0xf4f   : > { %v3167_v39 = vadd.f32 %v4321_v15, %v3157_v10  ;;  %4489 = vmatpush3.bf16.msra.mxu0 %v4986_v51  ;;  %4517 = vmatpush3.bf16.msra.mxu1 %v4987_v52 }
 0xf50   : > { %4490 = vmatprep.subr.bf16.mxu0 %v4988_v43  ;;  %4518 = vmatprep.subr.bf16.mxu1 %v4989_v56 }
 0xf51   : > { %v3169_v41 = vpack.c.bf16 %v3167_v39, %v3166_v33 }
 0xf53   : > { %4491 = vmatpush3.bf16.msra.mxu0 %v4990_v54  ;;  %4519 = vmatpush3.bf16.msra.mxu1 %v4991_v57 }
 0xf54   : > { %4492 = vmatprep.subr.bf16.mxu0 %v4992_v48  ;;  %4520 = vmatprep.subr.bf16.mxu1 %v4993_v58 }
 0xf55   : > { %3427 = vmatmul.mubr.bf16.gmra.mrb[80].mxu0 %v3169_v41  ;;  %3480 = vmatmul.mubr.bf16.gmra.mrb[72].mxu1 %v3169_v41 }
 0xf57   : > { %4493 = vmatpush3.bf16.msra.mxu0 %v4994_v59  ;;  %4521 = vmatpush3.bf16.msra.mxu1 %v4995_v0 }
 0xf58   : > { %4494 = vmatprep.subr.bf16.mxu0 %v4996_v1  ;;  %4522 = vmatprep.subr.bf16.mxu1 %v4997_v2 }
 0xf5b   : > { %4495 = vmatpush3.bf16.msra.mxu0 %v4998_v4  ;;  %4523 = vmatpush3.bf16.msra.mxu1 %v4999_v7 }
 0xf5c   : > { %4496 = vmatprep.subr.bf16.mxu0 %v5000_v9  ;;  %4524 = vmatprep.subr.bf16.mxu1 %v5001_v11 }
 0xf5f   : > { %4497 = vmatpush3.bf16.msra.mxu0 %v5002_v35  ;;  %4525 = vmatpush3.bf16.msra.mxu1 %v5003_v55 }
 0xf60   : > { %4498 = vmatprep.subr.bf16.mxu0 %v5004_v13  ;;  %4526 = vmatprep.subr.bf16.mxu1 %v5005_v14 }
 0xf63   : > { %4499 = vmatpush3.bf16.msra.mxu0 %v5006_v18  ;;  %4527 = vmatpush3.bf16.msra.mxu1 %v5007_v17 }
 0xf64   : > { %4500 = vmatprep.subr.bf16.mxu0 %v5008_v24  ;;  %4528 = vmatprep.subr.bf16.mxu1 %v5009_v25 }
 0xf67   : > { %4501 = vmatpush3.bf16.msra.mxu0 %v5010_v26  ;;  %4529 = vmatpush3.bf16.msra.mxu1 %v5011_v29 }
 0xf68   : > { %4502 = vmatprep.subr.bf16.mxu0 %v5012_v30  ;;  %4530 = vmatprep.subr.bf16.mxu1 %v5013_v31 }
 0xf6b   : > { %4503 = vmatpush3.bf16.msra.mxu0 %v5014_v34  ;;  %4531 = vmatpush3.bf16.msra.mxu1 %v5015_v32 }
0x1020   : > { %v3418_v44 = vpop.f32.mrb[76].mxu0  ;;  %v3471_v46 = vpop.f32.mrb[68].mxu1 }
0x1021   : > { %v3420_v63 = vpop.f32.mrb[77].mxu0  ;;  %v3473_v60 = vpop.f32.mrb[69].mxu1  ;;  %v3419_v5 = vadd.f32 %v3418_v44, %v3207_v42  ;;  %v3472_v12 = vadd.f32 %v3471_v46, %v3215_v8 }
0x1022   : > { %v3422_v3 = vpop.f32.mrb[78].mxu0  ;;  %v3475_v15 = vpop.f32.mrb[70].mxu1  ;;  %v3421_v22 = vadd.f32 %v3420_v63, %v3211_v50  ;;  %v3474_v16 = vadd.f32 %v3473_v60, %v3219_v53 }
0x1023   : > { %v3423_v47 = vadd.f32 %v3422_v3, %v3207_v42  ;;  %v3476_v62 = vadd.f32 %v3475_v15, %v3215_v8  ;;  %v3424_v61 = vpop.f32.mrb[79].mxu0  ;;  %v3477_v45 = vpop.f32.mrb[71].mxu1 }
0x1024   : > { %v3425_v6 = vadd.f32 %v3424_v61, %v3211_v50  ;;  %v3478_v23 = vadd.f32 %v3477_v45, %v3219_v53 }
0x1025   : > { %v6187_v10 = vpack.c.bf16 %v3423_v47, %v3419_v5  ;;  %v6189_v39 = vpack.c.bf16 %v3476_v62, %v3472_v12 }
0x1026   : > { %v6191_v19 = vpack.c.bf16 %v3425_v6, %v3421_v22  ;;  %v6193_v20 = vpack.c.bf16 %v3478_v23, %v3474_v16 }
0x1027   : > { %v4354_v33 = vmul.bf16 3218784218, %v6187_v10  ;;  %v4356_v41 = vmul.bf16 3218784218, %v6189_v39 }
0x1028   : > { %v4355_v49 = vmul.bf16 3218784218, %v6191_v19  ;;  %v4357_v21 = vmul.bf16 3218784218, %v6193_v20  ;;  %v3428_v51 = vpop.f32.mrb[80].mxu0  ;;  %v3481_v52 = vpop.f32.mrb[72].mxu1 }
0x1029   : > { %v3515_v43 = vmul.bf16 1069105081, %v4354_v33  ;;  %v3521_v56 = vmul.bf16 1069105081, %v4356_v41  ;;  %v3430_v54 = vpop.f32.mrb[81].mxu0  ;;  %v3483_v57 = vpop.f32.mrb[73].mxu1  ;;  %v3429_v59 = vadd.f32 %v3428_v51, %v3207_v42  ;;  %v3482_v0 = vadd.f32 %v3481_v52, %v3215_v8 }
0x102a   : > { %v3518_v48 = vmul.bf16 1069105081, %v4355_v49  ;;  %v3524_v58 = vmul.bf16 1069105081, %v4357_v21  ;;  %v3432_v1 = vpop.f32.mrb[82].mxu0  ;;  %v3485_v2 = vpop.f32.mrb[74].mxu1  ;;  %v3431_v4 = vadd.f32 %v3430_v54, %v3211_v50  ;;  %v3484_v55 = vadd.f32 %v3483_v57, %v3219_v53 }
0x102b   : > { %5096 = vpow.bf16 %v3515_v43  ;;  %v3433_v7 = vadd.f32 %v3432_v1, %v3207_v42  ;;  %v3486_v9 = vadd.f32 %v3485_v2, %v3215_v8  ;;  %v3434_v11 = vpop.f32.mrb[83].mxu0  ;;  %v3487_v35 = vpop.f32.mrb[75].mxu1 }
0x102c   : > { %5098 = vpow.bf16 %v3521_v56  ;;  %v3435_v13 = vadd.f32 %v3434_v11, %v3211_v50  ;;  %v3488_v14 = vadd.f32 %v3487_v35, %v3219_v53 }
0x102d   : > { %5100 = vpow.bf16 %v3518_v48  ;;  %v6199_v18 = vpack.c.bf16 %v3433_v7, %v3429_v59  ;;  %v6201_v17 = vpack.c.bf16 %v3486_v9, %v3482_v0  ;;  %v4362_v9 = vld [vmem:[%s768_s1] ss:$0 sm:$0xff] }
0x102e   : > { %5102 = vpow.bf16 %v3524_v58  ;;  %v3495_v24 = vpack.c.bf16 %v3435_v13, %v3431_v4  ;;  %v3497_v25 = vpack.c.bf16 %v3488_v14, %v3484_v55 }
0x102f   : > { %v4358_v26 = vmul.bf16 3218784218, %v6199_v18  ;;  %v4360_v29 = vmul.bf16 3218784218, %v6201_v17 }
0x1030   : > { %v4359_v30 = vmul.bf16 3218784218, %v3495_v24  ;;  %v4361_v31 = vmul.bf16 3218784218, %v3497_v25 }
0x1031   : > { %v3527_v34 = vmul.bf16 1069105081, %v4358_v26  ;;  %v3533_v32 = vmul.bf16 1069105081, %v4360_v29 }
0x1032   : > { %v3530_v37 = vmul.bf16 1069105081, %v4359_v30  ;;  %v3536_v38 = vmul.bf16 1069105081, %v4361_v31 }
0x1033   : > { %5104 = vpow.bf16 %v3527_v34 }
0x1034   : > { %5106 = vpow.bf16 %v3533_v32 }
0x1035   : > { %5108 = vpow.bf16 %v3530_v37 }
0x1036   : > { %v5097_v42 = vpop.eup %5096  ;;  %5110 = vpow.bf16 %v3536_v38 }
0x1037   : > { %v5099_v8 = vpop.eup %5098  ;;  %v3538_v44 = vadd.bf16 1065369472, %v5097_v42 }
0x1038   : > { %v5101_v46 = vpop.eup %5100  ;;  %v3540_v50 = vadd.bf16 1065369472, %v5099_v8 }
0x1039   : > { %v5103_v53 = vpop.eup %5102  ;;  %5112 = vrcp.bf16 %v3538_v44  ;;  %v3539_v63 = vadd.bf16 1065369472, %v5101_v46 }
0x103a   : > { %5114 = vrcp.bf16 %v3540_v50  ;;  %v3541_v60 = vadd.bf16 1065369472, %v5103_v53 }
0x103b   : > { %5116 = vrcp.bf16 %v3539_v63 }
0x103c   : > { %5118 = vrcp.bf16 %v3541_v60 }
0x103e   : > { %v5105_v3 = vpop.eup %5104 }
0x103f   : > { %v5107_v15 = vpop.eup %5106  ;;  %v3542_v5 = vadd.bf16 1065369472, %v5105_v3 }
0x1040   : > { %v5109_v12 = vpop.eup %5108  ;;  %v3544_v47 = vadd.bf16 1065369472, %v5107_v15 }
0x1041   : > { %v5111_v62 = vpop.eup %5110  ;;  %v3543_v61 = vadd.bf16 1065369472, %v5109_v12  ;;  %5120 = vrcp.bf16 %v3542_v5 }
0x1042   : > { %v3545_v45 = vadd.bf16 1065369472, %v5111_v62  ;;  %5122 = vrcp.bf16 %v3544_v47 }
0x1043   : > { %5124 = vrcp.bf16 %v3543_v61 }
0x1044   : > { %v5113_v22 = vpop.eup %5112  ;;  %5126 = vrcp.bf16 %v3545_v45 }
0x1045   : > { %v5115_v16 = vpop.eup %5114  ;;  %v3547_v23 = vmul.bf16 1065369472, %v5113_v22 }
0x1046   : > { %v5117_v6 = vpop.eup %5116  ;;  %v3551_v41 = vmul.bf16 1065369472, %v5115_v16 }
0x1047   : > { %v5119_v33 = vpop.eup %5118  ;;  %v3549_v49 = vmul.bf16 1065369472, %v5117_v6  ;;  %v3562_v52 = vmul.bf16 %v3547_v23, %v6187_v10 }
0x1048   : > { %v3553_v21 = vmul.bf16 1065369472, %v5119_v33  ;;  %v3564_v56 = vmul.bf16 %v3551_v41, %v6189_v39 }
0x1049   : > { %v3563_v51 = vmul.bf16 %v3549_v49, %v6191_v19 }
0x104a   : > { %v3565_v43 = vmul.bf16 %v3553_v21, %v6193_v20 }
0x104b   : > { %3865 = vmatprep.mubr.bf16.mxu0 %v3563_v51 }
0x104c   : > { %v5121_v54 = vpop.eup %5120  ;;  %3914 = vmatprep.mubr.bf16.mxu1 %v3565_v43  ;;  %3866 = vmatmul.mubr.bf16.vlgmr.msra.gmra.mrb[84].mxu0 %v3562_v52 }
0x104d   : > { %v5123_v57 = vpop.eup %5122  ;;  %3915 = vmatmul.mubr.bf16.vlgmr.msra.gmra.mrb[76].mxu1 %v3564_v56  ;;  %v3555_v58 = vmul.bf16 1065369472, %v5121_v54 }
0x104e   : > { %v5125_v48 = vpop.eup %5124  ;;  %v3559_v1 = vmul.bf16 1065369472, %v5123_v57 }
0x104f   : > { %v5127_v59 = vpop.eup %5126  ;;  %v3557_v0 = vmul.bf16 1065369472, %v5125_v48  ;;  %v3566_v10 = vmul.bf16 %v3555_v58, %v6199_v18 }
0x1050   : > { %v3561_v2 = vmul.bf16 1065369472, %v5127_v59  ;;  %v3568_v39 = vmul.bf16 %v3559_v1, %v6201_v17 }
0x1051   : > { %v3567_v19 = vmul.bf16 %v3557_v0, %v3495_v24 }
0x1052   : > { %v3569_v4 = vmul.bf16 %v3561_v2, %v3497_v25 }
0x1053   : > { %3873 = vmatprep.mubr.bf16.mxu0 %v3567_v19 }
0x1054   : > { %3922 = vmatprep.mubr.bf16.mxu1 %v3569_v4  ;;  %3874 = vmatmul.mubr.bf16.gmra.mrb[88].mxu0 %v3566_v10 }
0x1055   : > { %3923 = vmatmul.mubr.bf16.gmra.mrb[80].mxu1 %v3568_v39 }
0x111f   : > { %v4504_v20 = vpop.f32.mrb[84].mxu0 }
0x1120   : > { %v4532_v7 = vpop.f32.mrb[76].mxu1  ;;  %v4505_v11 = vpop.f32.mrb[85].mxu0 }
0x1121   : > { %v4506_v35 = vadd.f32 %v4505_v11, %v4504_v20  ;;  %v4533_v55 = vpop.f32.mrb[77].mxu1  ;;  %v4507_v13 = vpop.f32.mrb[86].mxu0 }
0x1122   : > { %v4534_v14 = vadd.f32 %v4533_v55, %v4532_v7  ;;  %v4535_v24 = vpop.f32.mrb[78].mxu1  ;;  %v4508_v18 = vpop.f32.mrb[87].mxu0 }
0x1123   : > { %v3868_v25 = vadd.f32 %v4506_v35, %v4362_v9  ;;  %v4509_v26 = vadd.f32 %v4508_v18, %v4507_v13  ;;  %v4536_v17 = vpop.f32.mrb[79].mxu1 }
0x1124   : > { %v4537_v29 = vadd.f32 %v4536_v17, %v4535_v24 }
0x1125   : > { %v3917_v30 = vadd.f32 %v4534_v14, %v3868_v25  ;;  %v3871_v31 = vadd.f32 %v4509_v26, %v4362_v9 }
0x1127   : > { %v3931_v34 = vadd.f32 %v3917_v30, %v6065_v28  ;;  %v3920_v32 = vadd.f32 %v4537_v29, %v3871_v31  ;;  %v4510_v37 = vpop.f32.mrb[88].mxu0 }
0x1128   : > { %v4538_v38 = vpop.f32.mrb[80].mxu1  ;;  %v4511_v42 = vpop.f32.mrb[89].mxu0 }
0x1129   : > { %v3932_v8 = vadd.f32 %v3920_v32, %v6068_v27  ;;  %v4512_v44 = vadd.f32 %v4511_v42, %v4510_v37  ;;  %v4539_v46 = vpop.f32.mrb[81].mxu1  ;;  %v4513_v50 = vpop.f32.mrb[90].mxu0  ;;  %3939 = vst [vmem:[%s5589_s21] sm:$0xff] (!%p4395_p8), %v3931_v34 }
0x112a   : > { %v4540_v53 = vadd.f32 %v4539_v46, %v4538_v38  ;;  %v4541_v63 = vpop.f32.mrb[82].mxu1  ;;  %v4514_v60 = vpop.f32.mrb[91].mxu0 }
0x112b   : > { %v3876_v3 = vadd.f32 %v4512_v44, %v4362_v9  ;;  %v4515_v15 = vadd.f32 %v4514_v60, %v4513_v50  ;;  %v4542_v5 = vpop.f32.mrb[83].mxu1  ;;  %3938 = sbr.rel (%p4395_p8) target bundleno = 4404 (0x1134), region = 100  ;;  %3940 = vst [vmem:[%s5589_s21 + $0x8] sm:$0xff] (!%p4395_p8), %v3932_v8 }
0x112c   : > { %v4543_v12 = vadd.f32 %v4542_v5, %v4541_v63 }
0x112d   : > { %v3925_v47 = vadd.f32 %v4540_v53, %v3876_v3  ;;  %v3879_v62 = vadd.f32 %v4515_v15, %v4362_v9 }
0x112f   : > { %v3933_v28 = vadd.f32 %v3925_v47, %v6071_v40  ;;  %v3928_v61 = vadd.f32 %v4543_v12, %v3879_v62 }
0x1131   : > { %v3934_v45 = vadd.f32 %v3928_v61, %v6076_v36  ;;  %3941 = vst [vmem:[%s5589_s21 + $0x10] sm:$0xff] (!%p4395_p8), %v3933_v28 }
0x1133   : > { %3942 = vst [vmem:[%s5589_s21 + $0x18] sm:$0xff] %v3934_v45 }
0x1134 PF: > { %p4396_p2 = scmp.ne.s32.totalorder %s5254_s24, 1 }
0x1135   : > { %3949 = vadd.xlane.f32.xlu0 (!%p4396_p2), %v3931_v34  ;;  %3953 = vadd.xlane.f32.xlu1 (!%p4396_p2), %v3933_v28  ;;  %s6322_s1 = sld [smem:[#allocation19_spill]] (!%p4396_p2)  ;;  %s6323_s22 = sld [smem:[#allocation20_spill]] (!%p4396_p2) }
0x1136   : > { %3946 = sbr.rel (%p4396_p2) target bundleno = 4725 (0x1275), region = 104 }
0x1139   : > { %3951 = vadd.xlane.f32.xlu0 (!%p4396_p2), %v3932_v8  ;;  %3955 = vadd.xlane.f32.xlu1 (!%p4396_p2), %v3934_v45 }
0x113b   : > { %v4397_v9 = vld [vmem:[%s6322_s1] ss:$0 sm:$0xff] (!%p4396_p2) }
0x113c   : > { %v4398_v35 = vld [vmem:[%s6323_s22] ss:$0 sm:$0xff] (!%p4396_p2) }
0x11c2   : > { %v3950_v27 = vpop.xlane.xlu0 %3949  ;;  %v3954_v40 = vpop.xlane.xlu1 %3953 }
0x11c3   : > { %v3957_v36 = vmul.f32 0.0078125, %v3950_v27  ;;  %v3959_v22 = vmul.f32 0.0078125, %v3954_v40 }
0x11c5   : > { %v3961_v16 = vsub.f32 %v3931_v34, %v3957_v36  ;;  %v3963_v6 = vsub.f32 %v3933_v28, %v3959_v22 }
0x11c6   : > { %v3952_v23 = vpop.xlane.xlu0 %3951  ;;  %v3956_v33 = vpop.xlane.xlu1 %3955 }
0x11c7   : > { %v3958_v41 = vmul.f32 0.0078125, %v3952_v23  ;;  %v3965_v49 = vmul.f32 %v3961_v16, %v3961_v16  ;;  %v3960_v21 = vmul.f32 0.0078125, %v3956_v33  ;;  %v3967_v43 = vmul.f32 %v3963_v6, %v3963_v6 }
0x11c9   : > { %v3962_v51 = vsub.f32 %v3932_v8, %v3958_v41  ;;  %3969 = vadd.xlane.f32.xlu0 %v3965_v49  ;;  %v3964_v52 = vsub.f32 %v3934_v45, %v3960_v21 }
0x11cb   : > { %v3966_v56 = vmul.f32 %v3962_v51, %v3962_v51  ;;  %v3968_v54 = vmul.f32 %v3964_v52, %v3964_v52 }
0x11cd   : > { %3973 = vadd.xlane.f32.xlu0 %v3967_v43  ;;  %3971 = vadd.xlane.f32.xlu1 %v3966_v56 }
0x11d1   : > { %3975 = vadd.xlane.f32.xlu1 %v3968_v54 }
0x1256   : > { %v3970_v57 = vpop.xlane.xlu0 %3969 }
0x1257   : > { %v3977_v48 = vmul.f32 0.0078125, %v3970_v57 }
0x1259   : > { %v3981_v58 = vadd.f32 1e-05, %v3977_v48 }
0x125a   : > { %v3972_v59 = vpop.xlane.xlu1 %3971  ;;  %v3974_v0 = vpop.xlane.xlu0 %3973 }
0x125b   : > { %5132 = vrsqrt.f32 %v3981_v58  ;;  %v3978_v1 = vmul.f32 0.0078125, %v3972_v59  ;;  %v3979_v2 = vmul.f32 0.0078125, %v3974_v0 }
0x125d   : > { %v3982_v19 = vadd.f32 1e-05, %v3978_v1  ;;  %v3983_v4 = vadd.f32 1e-05, %v3979_v2 }
0x125e   : > { %v3976_v10 = vpop.xlane.xlu1 %3975 }
0x125f   : > { %5134 = vrsqrt.f32 %v3982_v19  ;;  %v3980_v39 = vmul.f32 0.0078125, %v3976_v10 }
0x1260   : > { %5136 = vrsqrt.f32 %v3983_v4 }
0x1261   : > { %v3984_v20 = vadd.f32 1e-05, %v3980_v39 }
0x1263   : > { %5138 = vrsqrt.f32 %v3984_v20 }
0x1265   : > { %v5133_v7 = vpop.eup %5132 }
0x1266   : > { %v3989_v11 = vmul.f32 %v5133_v7, %v3961_v16 }
0x1268   : > { %v3999_v55 = vmul.f32 %v4397_v9, %v3989_v11 }
0x1269   : > { %v5135_v13 = vpop.eup %5134 }
0x126a   : > { %v5137_v14 = vpop.eup %5136  ;;  %v4009_v24 = vadd.f32 %v4398_v35, %v3999_v55  ;;  %v3990_v18 = vmul.f32 %v5135_v13, %v3962_v51 }
0x126b   : > { %v3991_v25 = vmul.f32 %v5137_v14, %v3963_v6 }
0x126c   : > { %4013 = vst [vmem:[%s5589_s21] sm:$0xff] %v4009_v24  ;;  %v4000_v26 = vmul.f32 %v4397_v9, %v3990_v18 }
0x126d   : > { %v5139_v17 = vpop.eup %5138  ;;  %v4001_v29 = vmul.f32 %v4397_v9, %v3991_v25 }
0x126e   : > { %v4010_v30 = vadd.f32 %v4398_v35, %v4000_v26  ;;  %v3992_v31 = vmul.f32 %v5139_v17, %v3964_v52 }
0x126f   : > { %v4011_v34 = vadd.f32 %v4398_v35, %v4001_v29 }
0x1270   : > { %4014 = vst [vmem:[%s5589_s21 + $0x8] sm:$0xff] %v4010_v30  ;;  %v4002_v32 = vmul.f32 %v4397_v9, %v3992_v31 }
0x1271   : > { %4015 = vst [vmem:[%s5589_s21 + $0x10] sm:$0xff] %v4011_v34 }
0x1272   : > { %v4012_v37 = vadd.f32 %v4398_v35, %v4002_v32 }
0x1274   : > { %4016 = vst [vmem:[%s5589_s21 + $0x18] sm:$0xff] %v4012_v37 }
0x1275 PF: > { %s6324_s14 = sld [smem:[#allocation12_spill]]  ;;  %s6325_s21 = sld [smem:[#allocation8_spill]] }
0x1276   : > { %s6326_s22 = sld [smem:[#allocation9_spill]]  ;;  %s6327_s23 = sld [smem:[#allocation15_spill]] }
0x1277   : > { %s6328_s24 = sld [smem:[#allocation10_spill]]  ;;  %s6329_s25 = sld [smem:[#allocation11_spill]] }
0x1278   : > { %s6330_s26 = sld [smem:[#allocation13_spill]]  ;;  %s6331_s27 = sld [smem:[#allocation14_spill]] }
0x127b   : > { %s32_s28 = sadd.s32 1, %s6324_s14  }
0x127c   : > { %p29_p3 = scmp.ge.s32.totalorder %s32_s28, 6  }
0x127e   :  { %31 = sbr.rel (!%p29_p3) target bundleno = 18 (0x12), region = 182 }
0x1285   :  { %4039 = vsyncpa [#allocation3], 1 }
0x1286   :  { %4041 = vsyncpa [#allocation3 + $0x1], 1 }
0x1287   :  { %4042 = vsyncpa [#allocation5], 1 }
0x1288   :  { %4044 = vsyncpa [#allocation5 + $0x1], 1 }

</bundles_post_ra>
